<compile_context>
chip_gen: v7x
topology: tpu7x:2x2x1
jax: 0.10.0
libtpu: 0.0.40
codegen_flags: <defaults>
</compile_context>

<pallas_src>
import jax
import jax.numpy as jnp
from jax.experimental import pallas as pl
from jax.experimental.pallas import tpu as pltpu

HIDDEN_PAD = 1024  # 1000 rounded up to a multiple of 128 (lane width)


def dis_z_kernel(z_ref, w1_ref, b1_ref, w2_ref, b2_ref, w3t_ref, b3_ref, o_ref):
    # layer 1: (bm, nz) @ (nz, Hp) + (1, Hp) -> relu   (bf16 operands, f32 acc)
    zb = z_ref[...].astype(jnp.bfloat16)
    h1 = jnp.dot(zb, w1_ref[...], preferred_element_type=jnp.float32)
    h1 = jnp.maximum(h1 + b1_ref[...], 0.0)

    # layer 2: (bm, Hp) @ (Hp, Hp) + (1, Hp) -> relu
    h2 = jnp.dot(h1.astype(jnp.bfloat16), w2_ref[...],
                 preferred_element_type=jnp.float32)
    h2 = jnp.maximum(h2 + b2_ref[...], 0.0)

    # layer 3: (Hp, 1) matmul replaced by a VPU multiply + XLU lane reduction;
    # zero-padded tail columns of h2 / w3t contribute nothing.
    w3_row = w3t_ref[...].astype(jnp.float32)                 # (1, Hp)
    logits = jnp.sum(h2 * w3_row, axis=-1, keepdims=True)     # (bm, 1)
    logits = logits + b3_ref[0, 0]                            # scalar bias from SMEM
    o_ref[...] = jax.nn.sigmoid(logits).astype(o_ref.dtype)


def _default_bm(batch):
    """Large tiles amortize per-step overhead and fill the MXU M dimension;
    keep >= 2 grid steps when the batch allows (v7x has 2 TensorCores)."""
    if batch >= 512:
        return 256
    if batch >= 32:
        half = -(-batch // 2)              # cdiv(batch, 2)
        return -(-half // 16) * 16         # multiple of 16 (bf16 sublane pack)
    return max(batch, 1)


def dis_z_forward(z, prepared_params, *, bm=None):
    """Pallas implementation of DIS_Z.forward / DIS_Z.discriminate.

    `prepared_params` comes from `prepare_params` (hidden padded to 1024,
    weights in bf16, w3 stored transposed, b3 as a (1,1) f32 scalar).
    """
    w1, b1, w2, b2, w3t, b3 = prepared_params
    B, nz = z.shape
    Hp = w1.shape[1]

    if bm is None:
        bm = _default_bm(B)
    bm = min(bm, B) if B >= 8 else B
    grid_b = pl.cdiv(B, bm)
    b_pad = grid_b * bm
    if b_pad != B:
        z = jnp.pad(z, ((0, b_pad - B), (0, 0)))  # padded rows are sliced off below

    def run(single_buffer_weights):
        if single_buffer_weights:
            # Constant-index operands: one VMEM copy is enough (saves ~2 MB
            # of VMEM on the bf16 w2, headroom for larger bm on v7x).
            def wspec(shape):
                return pl.BlockSpec(shape, lambda i: (0, 0),
                                    pipeline_mode=pl.Buffered(1))
        else:
            def wspec(shape):
                return pl.BlockSpec(shape, lambda i: (0, 0))

        in_specs = [
            pl.BlockSpec((bm, nz), lambda i: (i, 0)),   # z: tiled over batch
            wspec((nz, Hp)),                            # w1 (bf16)
            wspec((1, Hp)),                             # b1 (f32)
            wspec((Hp, Hp)),                            # w2 (bf16)
            wspec((1, Hp)),                             # b2 (f32)
            wspec((1, Hp)),                             # w3^T (bf16)
            pl.BlockSpec(memory_space=pltpu.MemorySpace.SMEM),  # b3 scalar
        ]
        out_specs = pl.BlockSpec((bm, 1), lambda i: (i, 0))

        out = pl.pallas_call(
            dis_z_kernel,
            out_shape=jax.ShapeDtypeStruct((b_pad, 1), z.dtype),
            grid=(grid_b,),
            in_specs=in_specs,
            out_specs=out_specs,
            compiler_params=pltpu.CompilerParams(
                dimension_semantics=("parallel",),
            ),
        )(z, w1, b1, w2, b2, w3t, b3)
        return jax.block_until_ready(out)

    try:
        out = run(single_buffer_weights=True)
    except Exception:
        # Conservative fallback if this JAX build rejects Buffered(1).
        out = run(single_buffer_weights=False)

    return out[:B]


def init_params(key, nz, hidden=1000):
    """Deterministic init matching nn.Linear shapes (stored as (in, out)), f32."""
    ks = jax.random.split(key, 6)

    def linear(kw, kb, fan_in, fan_out):
        bound = 1.0 / jnp.sqrt(fan_in)
        w = jax.random.uniform(kw, (fan_in, fan_out), jnp.float32, -bound, bound)
        b = jax.random.uniform(kb, (1, fan_out), jnp.float32, -bound, bound)
        return w, b

    w1, b1 = linear(ks[0], ks[1], nz, hidden)
    w2, b2 = linear(ks[2], ks[3], hidden, hidden)
    w3, b3 = linear(ks[4], ks[5], hidden, 1)
    return (w1, b1, w2, b2, w3, b3)


def prepare_params(params, hidden_pad=HIDDEN_PAD):
    """Zero-pad hidden 1000 -> 1024 (numerically exact) and cast weights to bf16.

    Returns (w1, b1, w2, b2, w3_transposed, b3) with weights in bf16 and
    biases in f32; w3 is stored as a (1, Hp) row for the in-kernel reduction.
    """
    w1, b1, w2, b2, w3, b3 = params
    H = w1.shape[1]
    pad = hidden_pad - H
    assert pad >= 0
    w1p = jnp.pad(w1, ((0, 0), (0, pad))).astype(jnp.bfloat16)
    b1p = jnp.pad(b1, ((0, 0), (0, pad)))                        # f32 (1, Hp)
    w2p = jnp.pad(w2, ((0, pad), (0, pad))).astype(jnp.bfloat16)
    b2p = jnp.pad(b2, ((0, 0), (0, pad)))                        # f32 (1, Hp)
    w3tp = jnp.pad(w3.T, ((0, 0), (0, pad))).astype(jnp.bfloat16)  # (1, Hp)
    b3p = b3.astype(jnp.float32)                                 # (1, 1) -> SMEM
    return (w1p, b1p, w2p, b2p, w3tp, b3p)


def dis_z_reference(z, params):
    """Original full-f32 model (matches the PyTorch module exactly)."""
    w1, b1, w2, b2, w3, b3 = params
    h = jnp.maximum(z @ w1 + b1, 0.0)
    h = jnp.maximum(h @ w2 + b2, 0.0)
    return jax.nn.sigmoid(h @ w3 + b3)


def dis_z_reference_prepared(z, prepared_params):
    """Plain-JAX emulation of the kernel's exact math (bf16 operands, f32 acc)."""
    w1, b1, w2, b2, w3t, b3 = prepared_params
    h = jnp.dot(z.astype(jnp.bfloat16), w1, preferred_element_type=jnp.float32)
    h = jnp.maximum(h + b1, 0.0)
    h = jnp.dot(h.astype(jnp.bfloat16), w2, preferred_element_type=jnp.float32)
    h = jnp.maximum(h + b2, 0.0)
    logits = jnp.sum(h * w3t.astype(jnp.float32), axis=-1, keepdims=True) + b3[0, 0]
    return jax.nn.sigmoid(logits)


if __name__ == "__main__":
    nz = 32        # latent dim (module arg)
    hidden = 1000  # fixed by the module definition
    B = 16         # small batch for the test

    key = jax.random.PRNGKey(0)
    k_param, k_z = jax.random.split(key)
    params = init_params(k_param, nz, hidden)      # f32, torch-equivalent
    prepared = prepare_params(params)              # padded H=1024, bf16 weights
    z = jax.random.normal(k_z, (B, nz), dtype=jnp.float32)

    out = dis_z_forward(z, prepared)
    out = jax.block_until_ready(out)
    assert out.shape == (B, 1)

    # Tight check vs. a JAX emulation of the kernel's exact bf16 math.
    ref_same = dis_z_reference_prepared(z, prepared)
    assert jnp.allclose(out, ref_same, atol=1e-3, rtol=1e-3), "mismatch vs bf16 reference"

    # Sanity check vs. the original f32 module (bf16 weights loosen tolerance).
    ref_f32 = dis_z_reference(z, params)
    assert jnp.allclose(out, ref_f32, atol=2e-2, rtol=2e-2), "mismatch vs f32 reference"

    # TODO(synk): dis_loss / gen_loss depend on an external `prior` sampler and
    # BCE reductions; only forward() (discriminate) is implemented as a kernel.
    print("KERNEL_OK")
</pallas_src>

<mosaic_0001>
module attributes {stable_mosaic.version = 11 : i64} {
  func.func @dis_z_kernel(%arg0: i32, %arg1: memref<16x32xf32, #tpu.memory_space<vmem>>, %arg2: memref<32x1024xbf16, #tpu.memory_space<vmem>>, %arg3: memref<1x1024xf32, #tpu.memory_space<vmem>>, %arg4: memref<1024x1024xbf16, #tpu.memory_space<vmem>>, %arg5: memref<1x1024xf32, #tpu.memory_space<vmem>>, %arg6: memref<1x1024xbf16, #tpu.memory_space<vmem>>, %arg7: memref<1x1xf32, #tpu.memory_space<smem>>, %arg8: memref<16x1xf32, #tpu.memory_space<vmem>>) attributes {dimension_semantics = [#tpu.dimension_semantics<parallel>], iteration_bounds = array<i64: 1>, scalar_prefetch = 0 : i64, scratch_operands = 0 : i64, tpu.core_type = #tpu.core_type<tc>, window_params = [{transform_indices = @transform_0, window_bounds = array<i64: 16, 32>}, {pipeline_mode = #tpu.pipeline_mode<synchronous>, transform_indices = @transform_1, window_bounds = array<i64: 32, 1024>}, {pipeline_mode = #tpu.pipeline_mode<synchronous>, transform_indices = @transform_2, window_bounds = array<i64: 1, 1024>}, {pipeline_mode = #tpu.pipeline_mode<synchronous>, transform_indices = @transform_3, window_bounds = array<i64: 1024, 1024>}, {pipeline_mode = #tpu.pipeline_mode<synchronous>, transform_indices = @transform_4, window_bounds = array<i64: 1, 1024>}, {pipeline_mode = #tpu.pipeline_mode<synchronous>, transform_indices = @transform_5, window_bounds = array<i64: 1, 1024>}, {transform_indices = @transform_6, window_bounds = array<i64: 1, 1>}, {transform_indices = @transform_7, window_bounds = array<i64: 16, 1>}]} {
    %c0 = arith.constant 0 : index
    %c0_0 = arith.constant 0 : index
    %0 = vector.load %arg1[%c0, %c0_0] : memref<16x32xf32, #tpu.memory_space<vmem>>, vector<16x32xf32>
    %1 = arith.truncf %0 : vector<16x32xf32> to vector<16x32xbf16>
    %c0_1 = arith.constant 0 : index
    %c0_2 = arith.constant 0 : index
    %2 = vector.load %arg2[%c0_1, %c0_2] : memref<32x1024xbf16, #tpu.memory_space<vmem>>, vector<32x1024xbf16>
    %cst = arith.constant dense<0.000000e+00> : vector<16x1024xf32>
    %3 = tpu.matmul %1, %2, %cst {dimension_numbers = #tpu.dot_dimension_numbers<[1], [0], [0], [1], [0, 0, 1, 1], [], []>} : vector<16x32xbf16>, vector<32x1024xbf16>, vector<16x1024xf32> -> vector<16x1024xf32>
    %c0_3 = arith.constant 0 : index
    %c0_4 = arith.constant 0 : index
    %4 = vector.load %arg3[%c0_3, %c0_4] : memref<1x1024xf32, #tpu.memory_space<vmem>>, vector<1x1024xf32>
    %5 = vector.broadcast %4 : vector<1x1024xf32> to vector<16x1024xf32>
    %6 = arith.addf %3, %5 : vector<16x1024xf32>
    %cst_5 = arith.constant 0.000000e+00 : f32
    %7 = vector.broadcast %cst_5 : f32 to vector<16x1024xf32>
    %8 = arith.maximumf %6, %7 : vector<16x1024xf32>
    %9 = arith.truncf %8 : vector<16x1024xf32> to vector<16x1024xbf16>
    %c0_6 = arith.constant 0 : index
    %c0_7 = arith.constant 0 : index
    %10 = vector.load %arg4[%c0_6, %c0_7] : memref<1024x1024xbf16, #tpu.memory_space<vmem>>, vector<1024x1024xbf16>
    %cst_8 = arith.constant dense<0.000000e+00> : vector<16x1024xf32>
    %11 = tpu.matmul %9, %10, %cst_8 {dimension_numbers = #tpu.dot_dimension_numbers<[1], [0], [0], [1], [0, 0, 1, 1], [], []>} : vector<16x1024xbf16>, vector<1024x1024xbf16>, vector<16x1024xf32> -> vector<16x1024xf32>
    %c0_9 = arith.constant 0 : index
    %c0_10 = arith.constant 0 : index
    %12 = vector.load %arg5[%c0_9, %c0_10] : memref<1x1024xf32, #tpu.memory_space<vmem>>, vector<1x1024xf32>
    %13 = vector.broadcast %12 : vector<1x1024xf32> to vector<16x1024xf32>
    %14 = arith.addf %11, %13 : vector<16x1024xf32>
    %cst_11 = arith.constant 0.000000e+00 : f32
    %15 = vector.broadcast %cst_11 : f32 to vector<16x1024xf32>
    %16 = arith.maximumf %14, %15 : vector<16x1024xf32>
    %c0_12 = arith.constant 0 : index
    %c0_13 = arith.constant 0 : index
    %17 = vector.load %arg6[%c0_12, %c0_13] : memref<1x1024xbf16, #tpu.memory_space<vmem>>, vector<1x1024xbf16>
    %18 = arith.extf %17 : vector<1x1024xbf16> to vector<1x1024xf32>
    %19 = vector.broadcast %18 : vector<1x1024xf32> to vector<16x1024xf32>
    %20 = arith.mulf %16, %19 : vector<16x1024xf32>
    %cst_14 = arith.constant dense<0.000000e+00> : vector<16xf32>
    %21 = vector.multi_reduction <add>, %20, %cst_14 [1] : vector<16x1024xf32> to vector<16xf32>
    %22 = vector.shape_cast %21 : vector<16xf32> to vector<16x1xf32>
    %c0_15 = arith.constant 0 : index
    %c0_16 = arith.constant 0 : index
    %23 = memref.load %arg7[%c0_15, %c0_16] : memref<1x1xf32, #tpu.memory_space<smem>>
    %24 = vector.broadcast %23 : f32 to vector<16x1xf32>
    %25 = arith.addf %22, %24 : vector<16x1xf32>
    %26 = arith.negf %25 : vector<16x1xf32>
    %27 = math.exp %26 : vector<16x1xf32>
    %cst_17 = arith.constant 1.000000e+00 : f32
    %28 = vector.broadcast %cst_17 : f32 to vector<16x1xf32>
    %29 = arith.addf %28, %27 : vector<16x1xf32>
    %30 = arith.divf %28, %29 : vector<16x1xf32>
    %c0_18 = arith.constant 0 : index
    %c0_19 = arith.constant 0 : index
    %31 = vector.load %arg8[%c0_18, %c0_19] : memref<16x1xf32, #tpu.memory_space<vmem>>, vector<16x1xf32>
    tpu.vector_store %arg8[%c0_18, %c0_19], %30 {strides = array<i32>} : memref<16x1xf32, #tpu.memory_space<vmem>>, vector<16x1xf32>,
    return
  }
  func.func @transform_0(%arg0: i32) -> (i32, i32) {
    %c0_i32 = arith.constant 0 : i32
    %c0_i32_0 = arith.constant 0 : i32
    return %arg0, %c0_i32 : i32, i32
  }
  func.func @transform_1(%arg0: i32) -> (i32, i32) {
    %c0_i32 = arith.constant 0 : i32
    %c0_i32_0 = arith.constant 0 : i32
    %c0_i32_1 = arith.constant 0 : i32
    return %c0_i32, %c0_i32_0 : i32, i32
  }
  func.func @transform_2(%arg0: i32) -> (i32, i32) {
    %c0_i32 = arith.constant 0 : i32
    %c0_i32_0 = arith.constant 0 : i32
    %c0_i32_1 = arith.constant 0 : i32
    return %c0_i32, %c0_i32_0 : i32, i32
  }
  func.func @transform_3(%arg0: i32) -> (i32, i32) {
    %c0_i32 = arith.constant 0 : i32
    %c0_i32_0 = arith.constant 0 : i32
    %c0_i32_1 = arith.constant 0 : i32
    return %c0_i32, %c0_i32_0 : i32, i32
  }
  func.func @transform_4(%arg0: i32) -> (i32, i32) {
    %c0_i32 = arith.constant 0 : i32
    %c0_i32_0 = arith.constant 0 : i32
    %c0_i32_1 = arith.constant 0 : i32
    return %c0_i32, %c0_i32_0 : i32, i32
  }
  func.func @transform_5(%arg0: i32) -> (i32, i32) {
    %c0_i32 = arith.constant 0 : i32
    %c0_i32_0 = arith.constant 0 : i32
    %c0_i32_1 = arith.constant 0 : i32
    return %c0_i32, %c0_i32_0 : i32, i32
  }
  func.func @transform_6(%arg0: i32) -> (i32, i32) {
    %c0_i32 = arith.constant 0 : i32
    %c0_i32_0 = arith.constant 0 : i32
    %c0_i32_1 = arith.constant 0 : i32
    return %c0_i32, %c0_i32_0 : i32, i32
  }
  func.func @transform_7(%arg0: i32) -> (i32, i32) {
    %c0_i32 = arith.constant 0 : i32
    %c0_i32_0 = arith.constant 0 : i32
    return %arg0, %c0_i32 : i32, i32
  }
}

module attributes {stable_mosaic.version = 11 : i64} {
  func.func @dis_z_kernel(%arg0: i32, %arg1: memref<16x32xf32, #tpu.memory_space<vmem>>, %arg2: memref<32x1024xbf16, #tpu.memory_space<vmem>>, %arg3: memref<1x1024xf32, #tpu.memory_space<vmem>>, %arg4: memref<1024x1024xbf16, #tpu.memory_space<vmem>>, %arg5: memref<1x1024xf32, #tpu.memory_space<vmem>>, %arg6: memref<1x1024xbf16, #tpu.memory_space<vmem>>, %arg7: memref<1x1xf32, #tpu.memory_space<smem>>, %arg8: memref<16x1xf32, #tpu.memory_space<vmem>>) attributes {dimension_semantics = [#tpu.dimension_semantics<parallel>], iteration_bounds = array<i64: 1>, scalar_prefetch = 0 : i64, scratch_operands = 0 : i64, tpu.core_type = #tpu.core_type<tc>, window_params = [{transform_indices = @transform_0, window_bounds = array<i64: 16, 32>}, {pipeline_mode = #tpu.pipeline_mode<synchronous>, transform_indices = @transform_1, window_bounds = array<i64: 32, 1024>}, {pipeline_mode = #tpu.pipeline_mode<synchronous>, transform_indices = @transform_2, window_bounds = array<i64: 1, 1024>}, {pipeline_mode = #tpu.pipeline_mode<synchronous>, transform_indices = @transform_3, window_bounds = array<i64: 1024, 1024>}, {pipeline_mode = #tpu.pipeline_mode<synchronous>, transform_indices = @transform_4, window_bounds = array<i64: 1, 1024>}, {pipeline_mode = #tpu.pipeline_mode<synchronous>, transform_indices = @transform_5, window_bounds = array<i64: 1, 1024>}, {transform_indices = @transform_6, window_bounds = array<i64: 1, 1>}, {transform_indices = @transform_7, window_bounds = array<i64: 16, 1>}]} {
    %c0 = arith.constant 0 : index
    %c0_0 = arith.constant 0 : index
    %0 = vector.load %arg1[%c0, %c0_0] : memref<16x32xf32, #tpu.memory_space<vmem>>, vector<16x32xf32>
    %1 = arith.truncf %0 : vector<16x32xf32> to vector<16x32xbf16>
    %c0_1 = arith.constant 0 : index
    %c0_2 = arith.constant 0 : index
    %2 = vector.load %arg2[%c0_1, %c0_2] : memref<32x1024xbf16, #tpu.memory_space<vmem>>, vector<32x1024xbf16>
    %cst = arith.constant dense<0.000000e+00> : vector<16x1024xf32>
    %3 = tpu.matmul %1, %2, %cst {dimension_numbers = #tpu.dot_dimension_numbers<[1], [0], [0], [1], [0, 0, 1, 1], [], []>} : vector<16x32xbf16>, vector<32x1024xbf16>, vector<16x1024xf32> -> vector<16x1024xf32>
    %c0_3 = arith.constant 0 : index
    %c0_4 = arith.constant 0 : index
    %4 = vector.load %arg3[%c0_3, %c0_4] : memref<1x1024xf32, #tpu.memory_space<vmem>>, vector<1x1024xf32>
    %5 = vector.broadcast %4 : vector<1x1024xf32> to vector<16x1024xf32>
    %6 = arith.addf %3, %5 : vector<16x1024xf32>
    %cst_5 = arith.constant 0.000000e+00 : f32
    %7 = vector.broadcast %cst_5 : f32 to vector<16x1024xf32>
    %8 = arith.maximumf %6, %7 : vector<16x1024xf32>
    %9 = arith.truncf %8 : vector<16x1024xf32> to vector<16x1024xbf16>
    %c0_6 = arith.constant 0 : index
    %c0_7 = arith.constant 0 : index
    %10 = vector.load %arg4[%c0_6, %c0_7] : memref<1024x1024xbf16, #tpu.memory_space<vmem>>, vector<1024x1024xbf16>
    %cst_8 = arith.constant dense<0.000000e+00> : vector<16x1024xf32>
    %11 = tpu.matmul %9, %10, %cst_8 {dimension_numbers = #tpu.dot_dimension_numbers<[1], [0], [0], [1], [0, 0, 1, 1], [], []>} : vector<16x1024xbf16>, vector<1024x1024xbf16>, vector<16x1024xf32> -> vector<16x1024xf32>
    %c0_9 = arith.constant 0 : index
    %c0_10 = arith.constant 0 : index
    %12 = vector.load %arg5[%c0_9, %c0_10] : memref<1x1024xf32, #tpu.memory_space<vmem>>, vector<1x1024xf32>
    %13 = vector.broadcast %12 : vector<1x1024xf32> to vector<16x1024xf32>
    %14 = arith.addf %11, %13 : vector<16x1024xf32>
    %cst_11 = arith.constant 0.000000e+00 : f32
    %15 = vector.broadcast %cst_11 : f32 to vector<16x1024xf32>
    %16 = arith.maximumf %14, %15 : vector<16x1024xf32>
    %c0_12 = arith.constant 0 : index
    %c0_13 = arith.constant 0 : index
    %17 = vector.load %arg6[%c0_12, %c0_13] : memref<1x1024xbf16, #tpu.memory_space<vmem>>, vector<1x1024xbf16>
    %18 = arith.extf %17 : vector<1x1024xbf16> to vector<1x1024xf32>
    %19 = vector.broadcast %18 : vector<1x1024xf32> to vector<16x1024xf32>
    %20 = arith.mulf %16, %19 : vector<16x1024xf32>
    %cst_14 = arith.constant dense<0.000000e+00> : vector<16xf32>
    %21 = vector.multi_reduction <add>, %20, %cst_14 [1] : vector<16x1024xf32> to vector<16xf32>
    %22 = vector.shape_cast %21 : vector<16xf32> to vector<16x1xf32>
    %c0_15 = arith.constant 0 : index
    %c0_16 = arith.constant 0 : index
    %23 = memref.load %arg7[%c0_15, %c0_16] : memref<1x1xf32, #tpu.memory_space<smem>>
    %24 = vector.broadcast %23 : f32 to vector<16x1xf32>
    %25 = arith.addf %22, %24 : vector<16x1xf32>
    %26 = arith.negf %25 : vector<16x1xf32>
    %27 = math.exp %26 : vector<16x1xf32>
    %cst_17 = arith.constant 1.000000e+00 : f32
    %28 = vector.broadcast %cst_17 : f32 to vector<16x1xf32>
    %29 = arith.addf %28, %27 : vector<16x1xf32>
    %30 = arith.divf %28, %29 : vector<16x1xf32>
    %c0_18 = arith.constant 0 : index
    %c0_19 = arith.constant 0 : index
    %31 = vector.load %arg8[%c0_18, %c0_19] : memref<16x1xf32, #tpu.memory_space<vmem>>, vector<16x1xf32>
    tpu.vector_store %arg8[%c0_18, %c0_19], %30 {strides = array<i32>} : memref<16x1xf32, #tpu.memory_space<vmem>>, vector<16x1xf32>,
    return
  }
  func.func @transform_0(%arg0: i32) -> (i32, i32) {
    %c0_i32 = arith.constant 0 : i32
    %c0_i32_0 = arith.constant 0 : i32
    return %arg0, %c0_i32 : i32, i32
  }
  func.func @transform_1(%arg0: i32) -> (i32, i32) {
    %c0_i32 = arith.constant 0 : i32
    %c0_i32_0 = arith.constant 0 : i32
    %c0_i32_1 = arith.constant 0 : i32
    return %c0_i32, %c0_i32_0 : i32, i32
  }
  func.func @transform_2(%arg0: i32) -> (i32, i32) {
    %c0_i32 = arith.constant 0 : i32
    %c0_i32_0 = arith.constant 0 : i32
    %c0_i32_1 = arith.constant 0 : i32
    return %c0_i32, %c0_i32_0 : i32, i32
  }
  func.func @transform_3(%arg0: i32) -> (i32, i32) {
    %c0_i32 = arith.constant 0 : i32
    %c0_i32_0 = arith.constant 0 : i32
    %c0_i32_1 = arith.constant 0 : i32
    return %c0_i32, %c0_i32_0 : i32, i32
  }
  func.func @transform_4(%arg0: i32) -> (i32, i32) {
    %c0_i32 = arith.constant 0 : i32
    %c0_i32_0 = arith.constant 0 : i32
    %c0_i32_1 = arith.constant 0 : i32
    return %c0_i32, %c0_i32_0 : i32, i32
  }
  func.func @transform_5(%arg0: i32) -> (i32, i32) {
    %c0_i32 = arith.constant 0 : i32
    %c0_i32_0 = arith.constant 0 : i32
    %c0_i32_1 = arith.constant 0 : i32
    return %c0_i32, %c0_i32_0 : i32, i32
  }
  func.func @transform_6(%arg0: i32) -> (i32, i32) {
    %c0_i32 = arith.constant 0 : i32
    %c0_i32_0 = arith.constant 0 : i32
    %c0_i32_1 = arith.constant 0 : i32
    return %c0_i32, %c0_i32_0 : i32, i32
  }
  func.func @transform_7(%arg0: i32) -> (i32, i32) {
    %c0_i32 = arith.constant 0 : i32
    %c0_i32_0 = arith.constant 0 : i32
    return %arg0, %c0_i32 : i32, i32
  }
}

</mosaic_0001>

<bundles_post_ra>
// kernel: tpu_custom_call.1
= control target key start
LH: loop header
LB: loop body
LE: loop exit
PB: predicated region body
PF: predicated region fallthrough
CT: control target
= control target key end

     0   :  { %13 = vsyncpa [#allocation4], 0  ;;  %s5468_s0 = inlined_call_operand.hbm [shape: f32[16,32], index: 0, kind: input, shape index: {}]   ;;  %s5469_s1 = inlined_call_operand.hbm [shape: bf16[32,1024], index: 1, kind: input, shape index: {}]   ;;  %s5470_s2 = inlined_call_operand.hbm [shape: f32[1,1024], index: 2, kind: input, shape index: {}]   ;;  %s5471_s3 = inlined_call_operand.hbm [shape: bf16[1024,1024], index: 3, kind: input, shape index: {}]   ;;  %s5472_s4 = inlined_call_operand.hbm [shape: f32[1,1024], index: 4, kind: input, shape index: {}]   ;;  %s5473_s5 = inlined_call_operand.hbm [shape: bf16[1,1024], index: 5, kind: input, shape index: {}]   ;;  %s5474_s6 = inlined_call_operand.<no memory space> [shape: f32[1,1], index: 6, kind: input, shape index: {}]   ;;  %s5475_s7 = inlined_call_operand.vmem [shape: f32[16,1], index: 7, kind: output, shape index: {}]  }
   0x1   :  { %14 = vsyncpa [#allocation6], 0 }
   0x2   :  { %15 = vsyncpa [#allocation9], 0 }
   0x3   :  { %16 = vsyncpa [#allocation12], 0  ;;  %s5158_s24 = smov [#allocation5]   ;;  %s5018_s28 = scalar_lea.hbm %s5469_s1, 2048 }
   0x4   :  { %s34_s25 = sshll.u32 %s5158_s24, 4  ;;  %p5019_p0 = scmp.ne.s32.totalorder %s5469_s1, %s5018_s28  ;;  %s35_s25 = int_to_ptr.vmem [resolvable:$true] %s34_s25 }
   0x5   :  { %p5022_p1 = scmp.lt.u32.totalorder %s5018_s28, %s5469_s1 }
   0x7   :  { %p5024_p2 = pnand %p5022_p1, %p5019_p0 }
   0x9   :  { %5027 = shalt.err (!%p5024_p2)
}
   0xa   :  { %s5028_s10 = scalar_lea.vmem %s35_s25, 2048  ;;  %p5033_p4 = scmp.lt.s32.totalorder %s35_s25, %s35_s25 }
   0xb   :  { %p5029_p3 = scmp.ne.s32.totalorder %s35_s25, %s5028_s10  ;;  %p5034_p5 = scmp.lt.s32.totalorder %s5028_s10, %s5028_s10 }
   0xd   :  { %p5035_p6 = por %p5034_p5, %p5033_p4 }
   0xf   :  { %p5036_p7 = pnand %p5035_p6, %p5029_p3 }
  0x11   :  { %5039 = shalt.err (!%p5036_p7)
}
  0x12   :  { %s5159_s11 = smov 512   ;;  %s5160_s12 = smov 32  }
  0x13   :  { %40 = dma.hbm_to_vmem [thread:$0]  %s5469_s1, 2048, %s35_s25, [#allocation6], %s5159_s11, %s5159_s11, %s5160_s12  }
  0x14   :  { %s5161_s15 = smov [#allocation8]   ;;  %s5162_s17 = smov [#allocation3]  }
  0x15   :  { %s56_s16 = sshll.u32 %s5161_s15, 4  ;;  %s22_s18 = sshll.u32 %s5162_s17, 4  ;;  %s57_s16 = int_to_ptr.vmem [resolvable:$true] %s56_s16  ;;  %s23_s18 = int_to_ptr.vmem [resolvable:$true] %s22_s18 }
  0x16   :  { %s5040_s21 = scalar_lea.hbm %s5471_s3, 65536 }
  0x17   :  { %p5041_p8 = scmp.ne.s32.totalorder %s5471_s3, %s5040_s21  ;;  %p5044_p9 = scmp.lt.u32.totalorder %s5040_s21, %s5471_s3 }
  0x19   :  { %p5046_p10 = pnand %p5044_p9, %p5041_p8 }
  0x1b   :  { %5049 = shalt.err (!%p5046_p10)
}
  0x1c   :  { %s5050_s1 = scalar_lea.vmem %s57_s16, 65536  ;;  %p5055_p12 = scmp.lt.s32.totalorder %s57_s16, %s57_s16 }
  0x1d   :  { %p5051_p11 = scmp.ne.s32.totalorder %s57_s16, %s5050_s1  ;;  %p5056_p13 = scmp.lt.s32.totalorder %s5050_s1, %s5050_s1 }
  0x1f   :  { %p5057_p0 = por %p5056_p13, %p5055_p12 }
  0x21   :  { %p5058_p1 = pnand %p5057_p0, %p5051_p11 }
  0x23   :  { %5061 = shalt.err (!%p5058_p1)
}
  0x24   :  { %62 = dma.hbm_to_vmem [thread:$0]  %s5471_s3, 65536, %s57_s16, [#allocation9], %s5159_s11, %s5159_s11, %s5160_s12  }
  0x25   :  { %s5062_s30 = scalar_lea.hbm %s5468_s0, 256 }
  0x26   :  { %p5063_p2 = scmp.ne.s32.totalorder %s5468_s0, %s5062_s30  ;;  %p5066_p3 = scmp.lt.u32.totalorder %s5062_s30, %s5468_s0 }
  0x28   :  { %p5068_p4 = pnand %p5066_p3, %p5063_p2 }
  0x2a   :  { %5071 = shalt.err (!%p5068_p4)
}
  0x2b   :  { %s5072_s14 = scalar_lea.vmem %s23_s18, 256  ;;  %p5077_p6 = scmp.lt.s32.totalorder %s23_s18, %s23_s18 }
  0x2c   :  { %p5073_p5 = scmp.ne.s32.totalorder %s23_s18, %s5072_s14  ;;  %p5078_p7 = scmp.lt.s32.totalorder %s5072_s14, %s5072_s14 }
  0x2e   :  { %p5079_p8 = por %p5078_p7, %p5077_p6 }
  0x30   :  { %p5080_p9 = pnand %p5079_p8, %p5073_p5 }
  0x32   :  { %5083 = shalt.err (!%p5080_p9)
}
  0x33   :  { %s5163_s3 = smov 128   ;;  %s5164_s11 = smov 8  }
  0x34   :  { %28 = dma.hbm_to_vmem [thread:$0]  %s5468_s0, 256, %s23_s18, [#allocation4], %s5163_s3, %s5163_s3, %s5164_s11  }
  0x35   :  { %s5165_s16 = smov [#allocation7]   ;;  %s5166_s19 = smov [#allocation10]  }
  0x36   :  { %s47_s17 = sshll.u32 %s5165_s16, 4  ;;  %s69_s20 = sshll.u32 %s5166_s19, 4  ;;  %s48_s17 = int_to_ptr.vmem [resolvable:$true] %s47_s17  ;;  %s70_s20 = int_to_ptr.vmem [resolvable:$true] %s69_s20 }
  0x37   :  { %s5084_s23 = scalar_lea.hbm %s5470_s2, 128 }
  0x38   :  { %p5085_p10 = scmp.ne.s32.totalorder %s5470_s2, %s5084_s23  ;;  %p5088_p11 = scmp.lt.u32.totalorder %s5084_s23, %s5470_s2 }
  0x3a   :  { %p5090_p12 = pnand %p5088_p11, %p5085_p10 }
  0x3c   :  { %5093 = shalt.err (!%p5090_p12)
}
  0x3d   :  { %s5094_s0 = scalar_lea.vmem %s48_s17, 128  ;;  %p5099_p0 = scmp.lt.s32.totalorder %s48_s17, %s48_s17 }
  0x3e   :  { %p5095_p13 = scmp.ne.s32.totalorder %s48_s17, %s5094_s0  ;;  %p5100_p1 = scmp.lt.s32.totalorder %s5094_s0, %s5094_s0 }
  0x40   :  { %p5101_p2 = por %p5100_p1, %p5099_p0 }
  0x42   :  { %p5102_p3 = pnand %p5101_p2, %p5095_p13 }
  0x44   :  { %5105 = shalt.err (!%p5102_p3)
}
  0x45   :  { %50 = dma.hbm_to_vmem [thread:$0]  %s5470_s2, 128, %s48_s17, [#allocation6]  }
  0x46   :  { %s5106_s30 = scalar_lea.hbm %s5472_s4, 128 }
  0x47   :  { %p5107_p4 = scmp.ne.s32.totalorder %s5472_s4, %s5106_s30  ;;  %p5110_p5 = scmp.lt.u32.totalorder %s5106_s30, %s5472_s4 }
  0x49   :  { %p5112_p6 = pnand %p5110_p5, %p5107_p4 }
  0x4b   :  { %5115 = shalt.err (!%p5112_p6)
}
  0x4c   :  { %s5116_s14 = scalar_lea.vmem %s70_s20, 128  ;;  %p5121_p8 = scmp.lt.s32.totalorder %s70_s20, %s70_s20 }
  0x4d   :  { %p5117_p7 = scmp.ne.s32.totalorder %s70_s20, %s5116_s14  ;;  %p5122_p9 = scmp.lt.s32.totalorder %s5116_s14, %s5116_s14 }
  0x4f   :  { %p5123_p10 = por %p5122_p9, %p5121_p8 }
  0x51   :  { %p5124_p11 = pnand %p5123_p10, %p5117_p7 }
  0x53   :  { %5127 = shalt.err (!%p5124_p11)
}
  0x54   :  { %72 = dma.hbm_to_vmem [thread:$0]  %s5472_s4, 128, %s70_s20, [#allocation9]  }
  0x55   :  { %s5167_s11 = smov [#allocation11]   ;;  %s5128_s17 = scalar_lea.hbm %s5473_s5, 128 }
  0x56   :  { %s79_s12 = sshll.u32 %s5167_s11, 4  ;;  %p5129_p12 = scmp.ne.s32.totalorder %s5473_s5, %s5128_s17  ;;  %s80_s12 = int_to_ptr.vmem [resolvable:$true] %s79_s12 }
  0x57   :  { %p5132_p13 = scmp.lt.u32.totalorder %s5128_s17, %s5473_s5 }
  0x59   :  { %p5134_p0 = pnand %p5132_p13, %p5129_p12 }
  0x5b   :  { %5137 = shalt.err (!%p5134_p0)
}
  0x5c   :  { %s5138_s24 = scalar_lea.vmem %s80_s12, 128  ;;  %p5143_p2 = scmp.lt.s32.totalorder %s80_s12, %s80_s12 }
  0x5d   :  { %p5139_p1 = scmp.ne.s32.totalorder %s80_s12, %s5138_s24  ;;  %p5144_p3 = scmp.lt.s32.totalorder %s5138_s24, %s5138_s24 }
  0x5f   :  { %p5145_p4 = por %p5144_p3, %p5143_p2 }
  0x61   :  { %p5146_p5 = pnand %p5145_p4, %p5139_p1 }
  0x63   :  { %5149 = shalt.err (!%p5146_p5)
}
  0x64   :  { %82 = dma.hbm_to_vmem [thread:$0]  %s5473_s5, 128, %s80_s12, [#allocation12]  }
  0x65   :  { %5150 = dma.done.wait [#allocation4], 256  }
  0x66   :  { %5151 = vsyncadd [#allocation4], 4294967040 }
  0x67   :  { %5152 = dma.done.wait [#allocation6], 2176  }
  0x68   :  { %5153 = vsyncadd [#allocation6], 4294965120 }
  0x69   :  { %5154 = dma.done.wait [#allocation9], 65664  }
  0x6a   :  { %5155 = vsyncadd [#allocation9], 4294901632 }
  0x6b   :  { %5156 = dma.done.wait [#allocation12], 128  }
  0x6c   :  { %5157 = vsyncadd [#allocation12], 4294967168  ;;  %v5168_v0 = vmov 0   ;;  %v107_v1 = vld [vmem:[#allocation5] sm:$0xff]  ;;  %v108_v8 = vld [vmem:[#allocation5 + $0x8] sm:$0xff]  ;;  %vm245_vm0 = vcmask 261120  }
  0x6d   :  { %281 = vmatprep.mubr.bf16.mxu0 %v5168_v0  ;;  %324 = vmatprep.mubr.bf16.mxu1 %v5168_v0  ;;  %v111_v2 = vld [vmem:[#allocation5 + $0x20] sm:$0xff]  ;;  %v112_v9 = vld [vmem:[#allocation5 + $0x28] sm:$0xff]  ;;  %v109_v14 = vld [vmem:[#allocation5 + $0x10] sm:$0xff]  ;;  %vm4390_vm1 = vcmask 7168  }
  0x6e   :  { %v115_v3 = vld [vmem:[#allocation5 + $0x40] sm:$0xff]  ;;  %v4402_v4 = vcombine.high %v107_v1, %v111_v2  ;;  %v4401_v5 = vcombine.low %v107_v1, %v111_v2  ;;  %v116_v10 = vld [vmem:[#allocation5 + $0x48] sm:$0xff]  ;;  %v4404_v11 = vcombine.high %v108_v8, %v112_v9  ;;  %v4403_v12 = vcombine.low %v108_v8, %v112_v9  ;;  %v113_v15 = vld [vmem:[#allocation5 + $0x30] sm:$0xff] }
  0x6f   :  { %v119_v6 = vld [vmem:[#allocation5 + $0x60] sm:$0xff]  ;;  %v120_v13 = vld [vmem:[#allocation5 + $0x68] sm:$0xff]  ;;  %v104_v17 = vld [vmem:[#allocation3] sm:$0xff]  ;;  %v4406_v21 = vcombine.high %v109_v14, %v113_v15  ;;  %v4405_v28 = vcombine.low %v109_v14, %v113_v15 }
  0x70   :  { %v4410_v7 = vcombine.high %v115_v3, %v119_v6  ;;  %249 = vmatprep.subr.bf16.mxu0 %v4402_v4  ;;  %v4409_v16 = vcombine.low %v115_v3, %v119_v6  ;;  %v105_v18 = vld [vmem:[#allocation3 + $0x8] sm:$0xff]  ;;  %v4412_v19 = vcombine.high %v116_v10, %v120_v13  ;;  %292 = vmatprep.subr.bf16.mxu1 %v4404_v11  ;;  %v117_v24 = vld [vmem:[#allocation5 + $0x50] sm:$0xff]  ;;  %v445_v33 = vld [vmem:[#allocation8] sm:$0xff] }
  0x71   :  { %250 = vmatpush1.bf16.msra.mxu0 %v4401_v5  ;;  %v110_v20 = vld [vmem:[#allocation5 + $0x18] sm:$0xff]  ;;  %293 = vmatpush1.bf16.msra.mxu1 %v4403_v12  ;;  %v4411_v23 = vcombine.low %v116_v10, %v120_v13  ;;  %v121_v25 = vld [vmem:[#allocation5 + $0x70] sm:$0xff]  ;;  %v106_v26 = vpack.c.bf16 %v105_v18, %v104_v17  ;;  %v449_v34 = vld [vmem:[#allocation8 + $0x20] sm:$0xff] }
  0x72   :  { %251 = vmatprep.subr.bf16.mxu0 %v4410_v7  ;;  %v114_v22 = vld [vmem:[#allocation5 + $0x38] sm:$0xff]  ;;  %294 = vmatprep.subr.bf16.mxu1 %v4412_v19  ;;  %v4414_v31 = vcombine.high %v117_v24, %v121_v25  ;;  %v4413_v36 = vcombine.low %v117_v24, %v121_v25  ;;  %v446_v37 = vld [vmem:[#allocation8 + $0x8] sm:$0xff]  ;;  %v4422_v39 = vcombine.high %v445_v33, %v449_v34  ;;  %v453_v41 = vld [vmem:[#allocation8 + $0x40] sm:$0xff] }
  0x73   :  { %v4408_v27 = vcombine.high %v110_v20, %v114_v22  ;;  %v118_v29 = vld [vmem:[#allocation5 + $0x58] sm:$0xff]  ;;  %v4407_v32 = vcombine.low %v110_v20, %v114_v22  ;;  %v450_v38 = vld [vmem:[#allocation8 + $0x28] sm:$0xff]  ;;  %v457_v42 = vld [vmem:[#allocation8 + $0x60] sm:$0xff]  ;;  %v4421_v44 = vcombine.low %v445_v33, %v449_v34 }
  0x74   :  { %v122_v30 = vld [vmem:[#allocation5 + $0x78] sm:$0xff]  ;;  %v4424_v43 = vcombine.high %v446_v37, %v450_v38  ;;  %v454_v45 = vld [vmem:[#allocation8 + $0x48] sm:$0xff]  ;;  %v4430_v47 = vcombine.high %v453_v41, %v457_v42  ;;  %v4423_v48 = vcombine.low %v446_v37, %v450_v38  ;;  %v461_v49 = vld [vmem:[#allocation8 + $0x80] sm:$0xff]  ;;  %v4429_v52 = vcombine.low %v453_v41, %v457_v42 }
  0x75   :  { %252 = vmatpush1.bf16.msra.mxu0 %v4409_v16  ;;  %295 = vmatpush1.bf16.msra.mxu1 %v4411_v23  ;;  %v4416_v35 = vcombine.high %v118_v29, %v122_v30  ;;  %v4415_v40 = vcombine.low %v118_v29, %v122_v30  ;;  %v458_v46 = vld [vmem:[#allocation8 + $0x68] sm:$0xff]  ;;  %v465_v50 = vld [vmem:[#allocation8 + $0xa0] sm:$0xff] }
  0x76   :  { %335 = vmatprep.subr.bf16.mxu0 %v4406_v21  ;;  %378 = vmatprep.subr.bf16.mxu1 %v4408_v27  ;;  %v4432_v51 = vcombine.high %v454_v45, %v458_v46  ;;  %v462_v53 = vld [vmem:[#allocation8 + $0x88] sm:$0xff]  ;;  %v4438_v55 = vcombine.high %v461_v49, %v465_v50  ;;  %v4431_v56 = vcombine.low %v454_v45, %v458_v46  ;;  %v469_v57 = vld [vmem:[#allocation8 + $0xc0] sm:$0xff] }
  0x77   :  { %v466_v54 = vld [vmem:[#allocation8 + $0xa8] sm:$0xff]  ;;  %v473_v58 = vld [vmem:[#allocation8 + $0xe0] sm:$0xff]  ;;  %v4437_v60 = vcombine.low %v461_v49, %v465_v50 }
  0x78   :  { %4417 = vmatmul.mubr.msk.bf16.vlgmr.msra.gmra.mrb[0].mxu0 %vm245_vm0, %v106_v26  ;;  %4418 = vmatmul.mubr.msk.bf16.vlgmr.msra.gmra.mrb[0].mxu1 %vm245_vm0, %v106_v26  ;;  %v4440_v59 = vcombine.high %v462_v53, %v466_v54  ;;  %v470_v61 = vld [vmem:[#allocation8 + $0xc8] sm:$0xff]  ;;  %v4446_v63 = vcombine.high %v469_v57, %v473_v58  ;;  %v477_v1 = vld [vmem:[#allocation8 + $0x100] sm:$0xff]  ;;  %v4445_v4 = vcombine.low %v469_v57, %v473_v58 }
  0x79   :  { %336 = vmatpush1.bf16.msra.mxu0 %v4405_v28  ;;  %367 = vmatprep.mubr.bf16.mxu0 %v5168_v0  ;;  %v474_v62 = vld [vmem:[#allocation8 + $0xe8] sm:$0xff]  ;;  %v481_v2 = vld [vmem:[#allocation8 + $0x120] sm:$0xff] }
  0x7a   :  { %337 = vmatprep.subr.bf16.mxu0 %v4414_v31  ;;  %379 = vmatpush1.bf16.msra.mxu1 %v4407_v32  ;;  %v4448_v3 = vcombine.high %v470_v61, %v474_v62  ;;  %v478_v5 = vld [vmem:[#allocation8 + $0x108] sm:$0xff]  ;;  %v4454_v7 = vcombine.high %v477_v1, %v481_v2  ;;  %v4447_v8 = vcombine.low %v470_v61, %v474_v62  ;;  %v485_v9 = vld [vmem:[#allocation8 + $0x140] sm:$0xff] }
  0x7b   :  { %410 = vmatprep.mubr.bf16.mxu1 %v5168_v0  ;;  %380 = vmatprep.subr.bf16.mxu1 %v4416_v35  ;;  %v4439_v0 = vcombine.low %v462_v53, %v466_v54  ;;  %v482_v6 = vld [vmem:[#allocation8 + $0x128] sm:$0xff]  ;;  %v489_v10 = vld [vmem:[#allocation8 + $0x160] sm:$0xff]  ;;  %v4453_v12 = vcombine.low %v477_v1, %v481_v2 }
  0x7c   :  { %v4456_v11 = vcombine.high %v478_v5, %v482_v6  ;;  %v486_v13 = vld [vmem:[#allocation8 + $0x148] sm:$0xff]  ;;  %v4462_v15 = vcombine.high %v485_v9, %v489_v10  ;;  %v4455_v16 = vcombine.low %v478_v5, %v482_v6  ;;  %v493_v17 = vld [vmem:[#allocation8 + $0x180] sm:$0xff]  ;;  %v4461_v20 = vcombine.low %v485_v9, %v489_v10 }
  0x7d   :  { %338 = vmatpush1.bf16.msra.mxu0 %v4413_v36  ;;  %v490_v14 = vld [vmem:[#allocation8 + $0x168] sm:$0xff]  ;;  %v497_v18 = vld [vmem:[#allocation8 + $0x1a0] sm:$0xff] }
  0x7e   :  { %3559 = vmatprep.subr.bf16.mxu0 %v4422_v39  ;;  %381 = vmatpush1.bf16.msra.mxu1 %v4415_v40  ;;  %v4464_v19 = vcombine.high %v486_v13, %v490_v14  ;;  %v494_v21 = vld [vmem:[#allocation8 + $0x188] sm:$0xff]  ;;  %v4470_v23 = vcombine.high %v493_v17, %v497_v18  ;;  %v4463_v24 = vcombine.low %v486_v13, %v490_v14  ;;  %v501_v25 = vld [vmem:[#allocation8 + $0x1c0] sm:$0xff] }
  0x7f   :  { %3731 = vmatprep.subr.bf16.mxu1 %v4424_v43  ;;  %v498_v22 = vld [vmem:[#allocation8 + $0x1a8] sm:$0xff]  ;;  %v4469_v28 = vcombine.low %v493_v17, %v497_v18  ;;  %v509_v33 = vld [vmem:[#allocation8 + $0x200] sm:$0xff] }
  0x80   :  { %4419 = vmatmul.mubr.msk.bf16.vlgmr.msra.gmra.mrb[4].mxu0 %vm245_vm0, %v106_v26  ;;  %v4472_v27 = vcombine.high %v494_v21, %v498_v22  ;;  %v502_v29 = vld [vmem:[#allocation8 + $0x1c8] sm:$0xff]  ;;  %v4471_v32 = vcombine.low %v494_v21, %v498_v22  ;;  %v513_v34 = vld [vmem:[#allocation8 + $0x220] sm:$0xff] }
  0x81   :  { %3560 = vmatpush1.bf16.msra.mxu0 %v4421_v44  ;;  %4420 = vmatmul.mubr.msk.bf16.vlgmr.msra.gmra.mrb[4].mxu1 %vm245_vm0, %v106_v26  ;;  %v505_v26 = vld [vmem:[#allocation8 + $0x1e0] sm:$0xff]  ;;  %v506_v30 = vld [vmem:[#allocation8 + $0x1e8] sm:$0xff]  ;;  %v4486_v39 = vcombine.high %v509_v33, %v513_v34  ;;  %v4485_v44 = vcombine.low %v509_v33, %v513_v34 }
  0x82   :  { %3561 = vmatprep.subr.bf16.mxu0 %v4430_v47  ;;  %3732 = vmatpush1.bf16.msra.mxu1 %v4423_v48  ;;  %v4478_v31 = vcombine.high %v501_v25, %v505_v26  ;;  %v4480_v35 = vcombine.high %v502_v29, %v506_v30  ;;  %v4477_v36 = vcombine.low %v501_v25, %v505_v26  ;;  %v510_v37 = vld [vmem:[#allocation8 + $0x208] sm:$0xff]  ;;  %v517_v41 = vld [vmem:[#allocation8 + $0x240] sm:$0xff] }
  0x83   :  { %3733 = vmatprep.subr.bf16.mxu1 %v4432_v51  ;;  %v514_v38 = vld [vmem:[#allocation8 + $0x228] sm:$0xff]  ;;  %v4479_v40 = vcombine.low %v502_v29, %v506_v30  ;;  %v521_v42 = vld [vmem:[#allocation8 + $0x260] sm:$0xff] }
  0x84   :  { %v4488_v43 = vcombine.high %v510_v37, %v514_v38  ;;  %v518_v45 = vld [vmem:[#allocation8 + $0x248] sm:$0xff]  ;;  %v4494_v47 = vcombine.high %v517_v41, %v521_v42  ;;  %v4487_v48 = vcombine.low %v510_v37, %v514_v38  ;;  %v525_v49 = vld [vmem:[#allocation8 + $0x280] sm:$0xff] }
  0x85   :  { %3562 = vmatpush1.bf16.msra.mxu0 %v4429_v52  ;;  %v522_v46 = vld [vmem:[#allocation8 + $0x268] sm:$0xff]  ;;  %v529_v50 = vld [vmem:[#allocation8 + $0x2a0] sm:$0xff]  ;;  %v4493_v52 = vcombine.low %v517_v41, %v521_v42 }
  0x86   :  { %3563 = vmatprep.subr.bf16.mxu0 %v4438_v55  ;;  %3734 = vmatpush1.bf16.msra.mxu1 %v4431_v56  ;;  %v4496_v51 = vcombine.high %v518_v45, %v522_v46  ;;  %v526_v53 = vld [vmem:[#allocation8 + $0x288] sm:$0xff]  ;;  %v4502_v55 = vcombine.high %v525_v49, %v529_v50  ;;  %v4495_v56 = vcombine.low %v518_v45, %v522_v46  ;;  %v533_v57 = vld [vmem:[#allocation8 + $0x2c0] sm:$0xff] }
  0x87   :  { %3735 = vmatprep.subr.bf16.mxu1 %v4440_v59  ;;  %v530_v54 = vld [vmem:[#allocation8 + $0x2a8] sm:$0xff]  ;;  %v537_v58 = vld [vmem:[#allocation8 + $0x2e0] sm:$0xff] }
  0x88   :  { %v4504_v59 = vcombine.high %v526_v53, %v530_v54  ;;  %v534_v61 = vld [vmem:[#allocation8 + $0x2c8] sm:$0xff]  ;;  %v541_v1 = vld [vmem:[#allocation8 + $0x300] sm:$0xff] }
  0x89   :  { %3564 = vmatpush1.bf16.msra.mxu0 %v4437_v60  ;;  %v4501_v60 = vcombine.low %v525_v49, %v529_v50  ;;  %v538_v62 = vld [vmem:[#allocation8 + $0x2e8] sm:$0xff]  ;;  %v545_v2 = vld [vmem:[#allocation8 + $0x320] sm:$0xff] }
  0x8a   :  { %3565 = vmatprep.subr.bf16.mxu0 %v4446_v63  ;;  %3736 = vmatpush1.bf16.msra.mxu1 %v4439_v0  ;;  %v4510_v63 = vcombine.high %v533_v57, %v537_v58  ;;  %v4503_v0 = vcombine.low %v526_v53, %v530_v54  ;;  %v542_v5 = vld [vmem:[#allocation8 + $0x308] sm:$0xff]  ;;  %v549_v9 = vld [vmem:[#allocation8 + $0x340] sm:$0xff] }
  0x8b   :  { %3737 = vmatprep.subr.bf16.mxu1 %v4448_v3  ;;  %v4512_v3 = vcombine.high %v534_v61, %v538_v62  ;;  %v546_v6 = vld [vmem:[#allocation8 + $0x328] sm:$0xff]  ;;  %v553_v10 = vld [vmem:[#allocation8 + $0x360] sm:$0xff] }
  0x8c   :  { %v550_v13 = vld [vmem:[#allocation8 + $0x348] sm:$0xff]  ;;  %v4525_v18 = vcombine.low %v549_v9, %v553_v10  ;;  %v561_v21 = vld [vmem:[#allocation8 + $0x3a0] sm:$0xff] }
  0x8d   :  { %3566 = vmatpush1.bf16.msra.mxu0 %v4445_v4  ;;  %v4509_v4 = vcombine.low %v533_v57, %v537_v58  ;;  %v554_v14 = vld [vmem:[#allocation8 + $0x368] sm:$0xff]  ;;  %v569_v29 = vld [vmem:[#allocation8 + $0x3e0] sm:$0xff] }
  0x8e   :  { %3567 = vmatprep.subr.bf16.mxu0 %v4454_v7  ;;  %3738 = vmatpush1.bf16.msra.mxu1 %v4447_v8  ;;  %v4518_v7 = vcombine.high %v541_v1, %v545_v2  ;;  %v4511_v8 = vcombine.low %v534_v61, %v538_v62  ;;  %v4528_v17 = vcombine.high %v550_v13, %v554_v14  ;;  %v558_v22 = vld [vmem:[#allocation8 + $0x388] sm:$0xff]  ;;  %v5287_v37 = vld [vmem:[#allocation8 + $0x420] sm:$0xff] }
  0x8f   :  { %3739 = vmatprep.subr.bf16.mxu1 %v4456_v11  ;;  %v4520_v11 = vcombine.high %v542_v5, %v546_v6  ;;  %v566_v30 = vld [vmem:[#allocation8 + $0x3c8] sm:$0xff] }
  0x90   :  { %v5289_v38 = vld [vmem:[#allocation8 + $0x408] sm:$0xff] }
  0x91   :  { %3568 = vmatpush1.bf16.msra.mxu0 %v4453_v12  ;;  %v4517_v12 = vcombine.low %v541_v1, %v545_v2 }
  0x92   :  { %3569 = vmatprep.subr.bf16.mxu0 %v4462_v15  ;;  %3740 = vmatpush1.bf16.msra.mxu1 %v4455_v16  ;;  %v4526_v15 = vcombine.high %v549_v9, %v553_v10  ;;  %v4519_v16 = vcombine.low %v542_v5, %v546_v6  ;;  %v581_v10 = vld [vmem:[#allocation8 + $0x440] sm:$0xff] }
  0x93   :  { %3741 = vmatprep.subr.bf16.mxu1 %v4464_v19  ;;  %v4527_v19 = vcombine.low %v550_v13, %v554_v14 }
  0x95   :  { %3570 = vmatpush1.bf16.msra.mxu0 %v4461_v20  ;;  %v557_v20 = vld [vmem:[#allocation8 + $0x380] sm:$0xff] }
  0x96   :  { %3571 = vmatprep.subr.bf16.mxu0 %v4470_v23  ;;  %3742 = vmatpush1.bf16.msra.mxu1 %v4463_v24  ;;  %v4534_v23 = vcombine.high %v557_v20, %v561_v21  ;;  %v562_v24 = vld [vmem:[#allocation8 + $0x3a8] sm:$0xff]  ;;  %v4533_v25 = vcombine.low %v557_v20, %v561_v21 }
  0x97   :  { %3743 = vmatprep.subr.bf16.mxu1 %v4472_v27  ;;  %v4535_v26 = vcombine.low %v558_v22, %v562_v24  ;;  %v4536_v27 = vcombine.high %v558_v22, %v562_v24 }
  0x99   :  { %3572 = vmatpush1.bf16.msra.mxu0 %v4469_v28  ;;  %v565_v28 = vld [vmem:[#allocation8 + $0x3c0] sm:$0xff] }
  0x9a   :  { %3573 = vmatprep.subr.bf16.mxu0 %v4478_v31  ;;  %3744 = vmatpush1.bf16.msra.mxu1 %v4471_v32  ;;  %v4542_v31 = vcombine.high %v565_v28, %v569_v29  ;;  %v570_v32 = vld [vmem:[#allocation8 + $0x3e8] sm:$0xff]  ;;  %v4541_v33 = vcombine.low %v565_v28, %v569_v29  ;;  %v589_v28 = vld [vmem:[#allocation8 + $0x480] sm:$0xff] }
  0x9b   :  { %3745 = vmatprep.subr.bf16.mxu1 %v4480_v35  ;;  %v4543_v34 = vcombine.low %v566_v30, %v570_v32  ;;  %v4544_v35 = vcombine.high %v566_v30, %v570_v32  ;;  %v593_v32 = vld [vmem:[#allocation8 + $0x4a0] sm:$0xff] }
  0x9d   :  { %3574 = vmatpush1.bf16.msra.mxu0 %v4477_v36  ;;  %v5285_v36 = vld [vmem:[#allocation8 + $0x400] sm:$0xff] }
  0x9e   :  { %3575 = vmatprep.subr.bf16.mxu0 %v4486_v39  ;;  %3746 = vmatpush1.bf16.msra.mxu1 %v4479_v40  ;;  %v4550_v39 = vcombine.high %v5285_v36, %v5287_v37  ;;  %v5293_v40 = vld [vmem:[#allocation8 + $0x428] sm:$0xff]  ;;  %v4549_v41 = vcombine.low %v5285_v36, %v5287_v37 }
  0x9f   :  { %3747 = vmatprep.subr.bf16.mxu1 %v4488_v43  ;;  %v4551_v42 = vcombine.low %v5289_v38, %v5293_v40  ;;  %v4552_v43 = vcombine.high %v5289_v38, %v5293_v40  ;;  %v4565_v38 = vcombine.low %v589_v28, %v593_v32 }
  0xa1   :  { %3576 = vmatpush1.bf16.msra.mxu0 %v4485_v44  ;;  %v125_v44 = vlaneseq }
  0xa2   :  { %3577 = vmatprep.subr.bf16.mxu0 %v4494_v47  ;;  %3748 = vmatpush1.bf16.msra.mxu1 %v4487_v48  ;;  %v5306_v47 = vld [vmem:[#allocation7] sm:$0xff] }
  0xa3   :  { %3749 = vmatprep.subr.bf16.mxu1 %v4496_v51  ;;  %v5301_v45 = vshrl.u32 %v125_v44, 7 }
  0xa5   :  { %3578 = vmatpush1.bf16.msra.mxu0 %v4493_v52  ;;  %v5304_v46 = vsub.s32 0, %v5301_v45  ;;  %v131_v48 = vsub.s32 1, %v5301_v45  ;;  %v5310_v49 = vsub.s32 2, %v5301_v45  ;;  %v139_v50 = vsub.s32 3, %v5301_v45 }
  0xa6   :  { %3579 = vmatprep.subr.bf16.mxu0 %v4502_v55  ;;  %3750 = vmatpush1.bf16.msra.mxu1 %v4495_v56  ;;  %v5324_v56 = vsub.s32 4, %v5301_v45  ;;  %v147_v57 = vsub.s32 5, %v5301_v45 }
  0xa7   :  { %3751 = vmatprep.subr.bf16.mxu1 %v4504_v59  ;;  %v128_v51 = vrot.slane %v5306_v47, %v5304_v46  ;;  %v132_v52 = vrot.slane %v5306_v47, %v131_v48  ;;  %v136_v53 = vrot.slane %v5306_v47, %v5310_v49  ;;  %v140_v55 = vrot.slane %v5306_v47, %v139_v50 }
  0xa8   :  { %v144_v6 = vrot.slane %v5306_v47, %v5324_v56 }
  0xa9   :  { %3580 = vmatpush1.bf16.msra.mxu0 %v4501_v60 }
  0xaa   :  { %3581 = vmatprep.subr.bf16.mxu0 %v4510_v63  ;;  %3752 = vmatpush1.bf16.msra.mxu1 %v4503_v0 }
  0xab   :  { %3753 = vmatprep.subr.bf16.mxu1 %v4512_v3 }
  0xad   :  { %3582 = vmatpush1.bf16.msra.mxu0 %v4509_v4 }
  0xae   :  { %3583 = vmatprep.subr.bf16.mxu0 %v4518_v7  ;;  %3754 = vmatpush1.bf16.msra.mxu1 %v4511_v8  ;;  %v148_v7 = vrot.slane %v5306_v47, %v147_v57 }
  0xaf   :  { %3755 = vmatprep.subr.bf16.mxu1 %v4520_v11 }
  0xb1   :  { %3584 = vmatpush1.bf16.msra.mxu0 %v4517_v12 }
  0xb2   :  { %3585 = vmatprep.subr.bf16.mxu0 %v4526_v15  ;;  %3756 = vmatpush1.bf16.msra.mxu1 %v4519_v16  ;;  %v585_v16 = vld [vmem:[#allocation8 + $0x460] sm:$0xff] }
  0xb3   :  { %3757 = vmatprep.subr.bf16.mxu1 %v4528_v17  ;;  %v582_v17 = vld [vmem:[#allocation8 + $0x448] sm:$0xff] }
  0xb5   :  { %3586 = vmatpush1.bf16.msra.mxu0 %v4525_v18  ;;  %v586_v18 = vld [vmem:[#allocation8 + $0x468] sm:$0xff] }
  0xb6   :  { %3758 = vmatpush1.bf16.msra.mxu1 %v4527_v19  ;;  %3587 = vmatprep.subr.bf16.mxu0 %v4534_v23 }
  0xb7   :  { %3759 = vmatprep.subr.bf16.mxu1 %v4536_v27  ;;  %v4560_v27 = vcombine.high %v582_v17, %v586_v18 }
  0xb9   :  { %3588 = vmatpush1.bf16.msra.mxu0 %v4533_v25 }
  0xba   :  { %3760 = vmatpush1.bf16.msra.mxu1 %v4535_v26  ;;  %3589 = vmatprep.subr.bf16.mxu0 %v4542_v31  ;;  %v4558_v26 = vcombine.high %v581_v10, %v585_v16 }
  0xbb   :  { %3761 = vmatprep.subr.bf16.mxu1 %v4544_v35 }
  0xbd   :  { %3590 = vmatpush1.bf16.msra.mxu0 %v4541_v33  ;;  %v590_v33 = vld [vmem:[#allocation8 + $0x488] sm:$0xff] }
  0xbe   :  { %3762 = vmatpush1.bf16.msra.mxu1 %v4543_v34  ;;  %3602 = vmatprep.subr.bf16.mxu0 %v4550_v39  ;;  %v594_v34 = vld [vmem:[#allocation8 + $0x4a8] sm:$0xff] }
  0xbf   :  { %3774 = vmatprep.subr.bf16.mxu1 %v4552_v43  ;;  %v4567_v40 = vcombine.low %v590_v33, %v594_v34 }
 0x14b   :  { %v283_v54 = vpop.f32.mrb[0].mxu0  ;;  %v326_v62 = vpop.f32.mrb[0].mxu1 }
 0x14c   :  { %v284_v58 = vadd.f32 %v283_v54, %v128_v51  ;;  %v285_v59 = vpop.f32.mrb[1].mxu0  ;;  %v327_v1 = vadd.f32 %v326_v62, %v136_v53  ;;  %v328_v2 = vpop.f32.mrb[1].mxu1  ;;  %v4559_v54 = vcombine.low %v582_v17, %v586_v18 }
 0x14d   :  { %v286_v60 = vadd.f32 %v285_v59, %v132_v52  ;;  %v287_v61 = vpop.f32.mrb[2].mxu0  ;;  %v329_v4 = vadd.f32 %v328_v2, %v140_v55  ;;  %v330_v5 = vpop.f32.mrb[2].mxu1  ;;  %v4566_v59 = vcombine.high %v589_v28, %v593_v32 }
 0x14e   :  { %v288_v63 = vadd.f32 %v287_v61, %v128_v51  ;;  %v289_v0 = vpop.f32.mrb[3].mxu0  ;;  %v421_v8 = vmax.f32 %v284_v58, 0.0  ;;  %v423_v11 = vmax.f32 %v327_v1, 0.0  ;;  %v331_v12 = vadd.f32 %v330_v5, %v136_v53  ;;  %v332_v13 = vpop.f32.mrb[3].mxu1  ;;  %v597_v61 = vld [vmem:[#allocation8 + $0x4c0] sm:$0xff]  ;;  %v602_v1 = vld [vmem:[#allocation8 + $0x4e8] sm:$0xff] }
 0x14f   :  { %v290_v3 = vadd.f32 %v289_v0, %v132_v52  ;;  %v422_v14 = vmax.f32 %v286_v60, 0.0  ;;  %v424_v19 = vmax.f32 %v329_v4, 0.0  ;;  %v333_v20 = vadd.f32 %v332_v13, %v140_v55  ;;  %v598_v0 = vld [vmem:[#allocation8 + $0x4c8] sm:$0xff]  ;;  %v609_v4 = vld [vmem:[#allocation8 + $0x520] sm:$0xff] }
 0x150   :  { %v429_v9 = vmax.f32 %v288_v63, 0.0  ;;  %v431_v22 = vmax.f32 %v331_v12, 0.0  ;;  %v4557_v53 = vcombine.low %v581_v10, %v585_v16  ;;  %v4568_v60 = vcombine.high %v590_v33, %v594_v34  ;;  %v601_v63 = vld [vmem:[#allocation8 + $0x4e0] sm:$0xff]  ;;  %v606_v5 = vld [vmem:[#allocation8 + $0x508] sm:$0xff] }
 0x151   :  { %v430_v15 = vmax.f32 %v290_v3, 0.0  ;;  %v432_v24 = vmax.f32 %v333_v20, 0.0  ;;  %v4576_v2 = vcombine.high %v598_v0, %v602_v1  ;;  %v605_v3 = vld [vmem:[#allocation8 + $0x500] sm:$0xff]  ;;  %v614_v13 = vld [vmem:[#allocation8 + $0x548] sm:$0xff] }
 0x152   :  { %v5332_v21 = vpack.c.bf16 %v429_v9, %v421_v8  ;;  %v5336_v29 = vpack.c.bf16 %v431_v22, %v423_v11  ;;  %v4575_v8 = vcombine.low %v598_v0, %v602_v1  ;;  %v4582_v9 = vcombine.high %v605_v3, %v609_v4  ;;  %v613_v11 = vld [vmem:[#allocation8 + $0x540] sm:$0xff]  ;;  %v622_v22 = vld [vmem:[#allocation8 + $0x588] sm:$0xff] }
 0x153   :  { %v5334_v23 = vpack.c.bf16 %v430_v15, %v422_v14  ;;  %v369_v25 = vpop.f32.mrb[4].mxu0  ;;  %v5340_v35 = vpack.c.bf16 %v432_v24, %v424_v19  ;;  %v617_v12 = vld [vmem:[#allocation8 + $0x560] sm:$0xff]  ;;  %v618_v14 = vld [vmem:[#allocation8 + $0x568] sm:$0xff]  ;;  %v4581_v15 = vcombine.low %v605_v3, %v609_v4 }
 0x154   :  { %v370_v30 = vadd.f32 %v369_v25, %v144_v6  ;;  %v371_v31 = vpop.f32.mrb[5].mxu0  ;;  %v4590_v17 = vcombine.high %v613_v11, %v617_v12  ;;  %v4592_v18 = vcombine.high %v614_v13, %v618_v14  ;;  %v621_v19 = vld [vmem:[#allocation8 + $0x580] sm:$0xff]  ;;  %v626_v24 = vld [vmem:[#allocation8 + $0x5a8] sm:$0xff]  ;;  %v4589_v25 = vcombine.low %v613_v11, %v617_v12  ;;  %v412_v32 = vpop.f32.mrb[4].mxu1 }
 0x155   :  { %3591 = vmatprep.mubr.bf16.mxu0 %v5334_v23  ;;  %3763 = vmatprep.mubr.bf16.mxu1 %v5334_v23  ;;  %v372_v39 = vadd.f32 %v371_v31, %v148_v7  ;;  %v373_v43 = vpop.f32.mrb[6].mxu0  ;;  %v625_v20 = vld [vmem:[#allocation8 + $0x5a0] sm:$0xff]  ;;  %v4600_v28 = vcombine.high %v622_v22, %v626_v24  ;;  %v5357_v31 = vsub.s32 6, %v5301_v45  ;;  %v630_v34 = vld [vmem:[#allocation8 + $0x5c8] sm:$0xff] }
 0x156   :  { %3592 = vmatmul.mubr.bf16.vlgmr.msra.gmra.mrb[8].mxu0 %v5332_v21  ;;  %3764 = vmatmul.mubr.bf16.vlgmr.msra.gmra.mrb[8].mxu1 %v5332_v21  ;;  %v425_v44 = vmax.f32 %v370_v30, 0.0  ;;  %v374_v51 = vadd.f32 %v373_v43, %v144_v6  ;;  %v375_v52 = vpop.f32.mrb[7].mxu0  ;;  %v610_v6 = vld [vmem:[#allocation8 + $0x528] sm:$0xff]  ;;  %v629_v30 = vld [vmem:[#allocation8 + $0x5c0] sm:$0xff] }
 0x157   :  { %3603 = vmatpush1.bf16.msra.mxu0 %v4549_v41  ;;  %3775 = vmatpush1.bf16.msra.mxu1 %v4551_v42  ;;  %v426_v55 = vmax.f32 %v372_v39, 0.0  ;;  %v376_v58 = vadd.f32 %v375_v52, %v148_v7  ;;  %v4574_v42 = vcombine.high %v597_v61, %v601_v63  ;;  %v4573_v7 = vcombine.low %v597_v61, %v601_v63  ;;  %v633_v33 = vld [vmem:[#allocation8 + $0x5e0] sm:$0xff]  ;;  %v634_v39 = vld [vmem:[#allocation8 + $0x5e8] sm:$0xff] }
 0x158   :  { %3604 = vmatprep.subr.bf16.mxu0 %v4558_v26  ;;  %3776 = vmatprep.subr.bf16.mxu1 %v4560_v27  ;;  %v433_v62 = vmax.f32 %v374_v51, 0.0  ;;  %v4584_v10 = vcombine.high %v606_v5, %v610_v6  ;;  %v4583_v16 = vcombine.low %v606_v5, %v610_v6  ;;  %v4591_v26 = vcombine.low %v614_v13, %v618_v14  ;;  %v641_v61 = vld [vmem:[#allocation8 + $0x620] sm:$0xff]  ;;  %v642_v63 = vld [vmem:[#allocation8 + $0x628] sm:$0xff] }
 0x159   :  { %3634 = vmatprep.mubr.bf16.mxu0 %v5340_v35  ;;  %3806 = vmatprep.mubr.bf16.mxu1 %v5340_v35  ;;  %v434_v36 = vmax.f32 %v376_v58, 0.0  ;;  %v4598_v27 = vcombine.high %v621_v19, %v625_v20  ;;  %v152_v43 = vrot.slane %v5306_v47, %v5357_v31  ;;  %v4599_v51 = vcombine.low %v622_v22, %v626_v24  ;;  %v637_v58 = vld [vmem:[#allocation8 + $0x600] sm:$0xff]  ;;  %v658_v22 = vld [vmem:[#allocation8 + $0x6a8] sm:$0xff] }
 0x15a   :  { %v5352_v37 = vpack.c.bf16 %v433_v62, %v425_v44  ;;  %v4597_v44 = vcombine.low %v621_v19, %v625_v20  ;;  %v155_v52 = vsub.s32 7, %v5301_v45  ;;  %v638_v62 = vld [vmem:[#allocation8 + $0x608] sm:$0xff]  ;;  %v4614_v5 = vcombine.high %v637_v58, %v641_v61  ;;  %v657_v19 = vld [vmem:[#allocation8 + $0x6a0] sm:$0xff] }
 0x15b   :  { %3605 = vmatpush1.bf16.msra.mxu0 %v4557_v53  ;;  %3777 = vmatpush1.bf16.msra.mxu1 %v4559_v54  ;;  %v5354_v41 = vpack.c.bf16 %v434_v36, %v426_v55  ;;  %v414_v53 = vpop.f32.mrb[5].mxu1  ;;  %v4606_v54 = vcombine.high %v629_v30, %v633_v33  ;;  %v4608_v55 = vcombine.high %v630_v34, %v634_v39  ;;  %v654_v20 = vld [vmem:[#allocation8 + $0x688] sm:$0xff] }
 0x15c   :  { %3606 = vmatprep.subr.bf16.mxu0 %v4566_v59  ;;  %3778 = vmatprep.subr.bf16.mxu1 %v4568_v60  ;;  %v413_v59 = vadd.f32 %v412_v32, %v152_v43  ;;  %v416_v60 = vpop.f32.mrb[6].mxu1  ;;  %v156_v0 = vrot.slane %v5306_v47, %v155_v52  ;;  %v4616_v6 = vcombine.high %v638_v62, %v642_v63  ;;  %v662_v32 = vld [vmem:[#allocation8 + $0x6c8] sm:$0xff] }
 0x15d   :  { %v417_v1 = vadd.f32 %v416_v60, %v152_v43  ;;  %v418_v36 = vpop.f32.mrb[7].mxu1  ;;  %v4613_v13 = vcombine.low %v637_v58, %v641_v61  ;;  %v4615_v14 = vcombine.low %v638_v62, %v642_v63  ;;  %v677_v62 = vld [vmem:[#allocation8 + $0x740] sm:$0xff] }
 0x15e   :  { %v419_v4 = vadd.f32 %v418_v36, %v156_v0  ;;  %v681_v63 = vld [vmem:[#allocation8 + $0x760] sm:$0xff] }
 0x15f   :  { %3607 = vmatpush1.bf16.msra.mxu0 %v4565_v38  ;;  %3779 = vmatpush1.bf16.msra.mxu1 %v4567_v40  ;;  %v4605_v38 = vcombine.low %v629_v30, %v633_v33  ;;  %v427_v40 = vmax.f32 %v413_v59, 0.0  ;;  %v435_v3 = vmax.f32 %v417_v1, 0.0  ;;  %v665_v30 = vld [vmem:[#allocation8 + $0x6e0] sm:$0xff]  ;;  %v666_v33 = vld [vmem:[#allocation8 + $0x6e8] sm:$0xff] }
 0x160   :  { %3608 = vmatprep.subr.bf16.mxu0 %v4574_v42  ;;  %3780 = vmatprep.subr.bf16.mxu1 %v4576_v2  ;;  %v4607_v42 = vcombine.low %v630_v34, %v634_v39  ;;  %v415_v2 = vadd.f32 %v414_v53, %v156_v0  ;;  %v436_v12 = vmax.f32 %v419_v4, 0.0  ;;  %v4631_v39 = vcombine.low %v654_v20, %v658_v22  ;;  %v673_v53 = vld [vmem:[#allocation8 + $0x720] sm:$0xff]  ;;  %v678_v0 = vld [vmem:[#allocation8 + $0x748] sm:$0xff] }
 0x161   :  { %v5365_v47 = vpack.c.bf16 %v435_v3, %v427_v40  ;;  %v4639_v59 = vcombine.low %v662_v32, %v666_v33  ;;  %v682_v1 = vld [vmem:[#allocation8 + $0x768] sm:$0xff]  ;;  %v4654_v40 = vcombine.high %v677_v62, %v681_v63  ;;  %v689_v3 = vld [vmem:[#allocation8 + $0x7a0] sm:$0xff] }
 0x162   :  { %v428_v11 = vmax.f32 %v415_v2, 0.0  ;;  %v685_v2 = vld [vmem:[#allocation8 + $0x780] sm:$0xff]  ;;  %v686_v4 = vld [vmem:[#allocation8 + $0x788] sm:$0xff] }
 0x163   :  { %3609 = vmatpush1.bf16.msra.mxu0 %v4573_v7  ;;  %3781 = vmatpush1.bf16.msra.mxu1 %v4575_v8  ;;  %v645_v7 = vld [vmem:[#allocation8 + $0x640] sm:$0xff] }
 0x164   :  { %3610 = vmatprep.subr.bf16.mxu0 %v4582_v9  ;;  %3782 = vmatprep.subr.bf16.mxu1 %v4584_v10  ;;  %v649_v8 = vld [vmem:[#allocation8 + $0x660] sm:$0xff]  ;;  %v646_v9 = vld [vmem:[#allocation8 + $0x648] sm:$0xff] }
 0x165   :  { %v650_v10 = vld [vmem:[#allocation8 + $0x668] sm:$0xff]  ;;  %v4621_v24 = vcombine.low %v645_v7, %v649_v8 }
 0x167   :  { %3611 = vmatpush1.bf16.msra.mxu0 %v4581_v15  ;;  %3783 = vmatpush1.bf16.msra.mxu1 %v4583_v16  ;;  %v5367_v15 = vpack.c.bf16 %v436_v12, %v428_v11  ;;  %v4622_v16 = vcombine.high %v645_v7, %v649_v8  ;;  %v4655_v7 = vcombine.low %v678_v0, %v682_v1  ;;  %v697_v11 = vld [vmem:[#allocation8 + $0x7e0] sm:$0xff]  ;;  %v694_v12 = vld [vmem:[#allocation8 + $0x7c8] sm:$0xff] }
 0x168   :  { %3612 = vmatprep.subr.bf16.mxu0 %v4590_v17  ;;  %3784 = vmatprep.subr.bf16.mxu1 %v4592_v18  ;;  %v4624_v17 = vcombine.high %v646_v9, %v650_v10  ;;  %v653_v18 = vld [vmem:[#allocation8 + $0x680] sm:$0xff]  ;;  %v4662_v8 = vcombine.high %v685_v2, %v689_v3 }
 0x169   :  { %v4629_v34 = vcombine.low %v653_v18, %v657_v19 }
 0x16b   :  { %3613 = vmatpush1.bf16.msra.mxu0 %v4589_v25  ;;  %3785 = vmatpush1.bf16.msra.mxu1 %v4591_v26  ;;  %v4623_v25 = vcombine.low %v646_v9, %v650_v10  ;;  %v4630_v26 = vcombine.high %v653_v18, %v657_v19  ;;  %v693_v10 = vld [vmem:[#allocation8 + $0x7c0] sm:$0xff] }
 0x16c   :  { %3614 = vmatprep.subr.bf16.mxu0 %v4598_v27  ;;  %3786 = vmatprep.subr.bf16.mxu1 %v4600_v28  ;;  %v4632_v27 = vcombine.high %v654_v20, %v658_v22  ;;  %v661_v28 = vld [vmem:[#allocation8 + $0x6c0] sm:$0xff]  ;;  %v702_v22 = vld [vmem:[#allocation8 + $0x808] sm:$0xff] }
 0x16d   :  { %v4638_v43 = vcombine.high %v661_v28, %v665_v30  ;;  %v4637_v58 = vcombine.low %v661_v28, %v665_v30  ;;  %v701_v19 = vld [vmem:[#allocation8 + $0x800] sm:$0xff] }
 0x16e   :  { %v705_v20 = vld [vmem:[#allocation8 + $0x820] sm:$0xff] }
 0x16f   :  { %3615 = vmatpush1.bf16.msra.mxu0 %v4597_v44  ;;  %3787 = vmatpush1.bf16.msra.mxu1 %v4599_v51  ;;  %v4640_v44 = vcombine.high %v662_v32, %v666_v33  ;;  %v669_v51 = vld [vmem:[#allocation8 + $0x700] sm:$0xff]  ;;  %v710_v33 = vld [vmem:[#allocation8 + $0x848] sm:$0xff] }
 0x170   :  { %3616 = vmatprep.subr.bf16.mxu0 %v4606_v54  ;;  %3788 = vmatprep.subr.bf16.mxu1 %v4608_v55  ;;  %v670_v54 = vld [vmem:[#allocation8 + $0x708] sm:$0xff]  ;;  %v4646_v60 = vcombine.high %v669_v51, %v673_v53  ;;  %v4645_v36 = vcombine.low %v669_v51, %v673_v53  ;;  %v709_v30 = vld [vmem:[#allocation8 + $0x840] sm:$0xff] }
 0x171   :  { %v674_v55 = vld [vmem:[#allocation8 + $0x728] sm:$0xff]  ;;  %v713_v32 = vld [vmem:[#allocation8 + $0x860] sm:$0xff] }
 0x172   :  { %v4648_v61 = vcombine.high %v670_v54, %v674_v55  ;;  %v717_v53 = vld [vmem:[#allocation8 + $0x880] sm:$0xff] }
 0x173   :  { %3617 = vmatpush1.bf16.msra.mxu0 %v4605_v38  ;;  %3789 = vmatpush1.bf16.msra.mxu1 %v4607_v42  ;;  %v4647_v38 = vcombine.low %v670_v54, %v674_v55  ;;  %v4656_v42 = vcombine.high %v678_v0, %v682_v1  ;;  %v721_v54 = vld [vmem:[#allocation8 + $0x8a0] sm:$0xff]  ;;  %v718_v55 = vld [vmem:[#allocation8 + $0x888] sm:$0xff] }
 0x174   :  { %3618 = vmatprep.subr.bf16.mxu0 %v4614_v5  ;;  %3790 = vmatprep.subr.bf16.mxu1 %v4616_v6  ;;  %v690_v5 = vld [vmem:[#allocation8 + $0x7a8] sm:$0xff]  ;;  %v4653_v6 = vcombine.low %v677_v62, %v681_v63  ;;  %v725_v63 = vld [vmem:[#allocation8 + $0x8c0] sm:$0xff] }
 0x175   :  { %v4664_v9 = vcombine.high %v686_v4, %v690_v5  ;;  %v729_v0 = vld [vmem:[#allocation8 + $0x8e0] sm:$0xff]  ;;  %v726_v1 = vld [vmem:[#allocation8 + $0x8c8] sm:$0xff] }
 0x177   :  { %3619 = vmatpush1.bf16.msra.mxu0 %v4613_v13  ;;  %3791 = vmatpush1.bf16.msra.mxu1 %v4615_v14  ;;  %v698_v13 = vld [vmem:[#allocation8 + $0x7e8] sm:$0xff]  ;;  %v4661_v14 = vcombine.low %v685_v2, %v689_v3  ;;  %v733_v3 = vld [vmem:[#allocation8 + $0x900] sm:$0xff] }
 0x178   :  { %3620 = vmatprep.subr.bf16.mxu0 %v4622_v16  ;;  %3792 = vmatprep.subr.bf16.mxu1 %v4624_v17  ;;  %v4663_v16 = vcombine.low %v686_v4, %v690_v5  ;;  %v4670_v17 = vcombine.high %v693_v10, %v697_v11  ;;  %v4672_v18 = vcombine.high %v694_v12, %v698_v13  ;;  %v737_v4 = vld [vmem:[#allocation8 + $0x920] sm:$0xff]  ;;  %v734_v5 = vld [vmem:[#allocation8 + $0x908] sm:$0xff] }
 0x17b   :  { %3621 = vmatpush1.bf16.msra.mxu0 %v4621_v24  ;;  %3793 = vmatpush1.bf16.msra.mxu1 %v4623_v25  ;;  %v706_v24 = vld [vmem:[#allocation8 + $0x828] sm:$0xff]  ;;  %v4669_v25 = vcombine.low %v693_v10, %v697_v11  ;;  %v741_v11 = vld [vmem:[#allocation8 + $0x940] sm:$0xff] }
 0x17c   :  { %3622 = vmatprep.subr.bf16.mxu0 %v4630_v26  ;;  %3794 = vmatprep.subr.bf16.mxu1 %v4632_v27  ;;  %v4671_v26 = vcombine.low %v694_v12, %v698_v13  ;;  %v4678_v27 = vcombine.high %v701_v19, %v705_v20  ;;  %v4680_v28 = vcombine.high %v702_v22, %v706_v24  ;;  %v745_v12 = vld [vmem:[#allocation8 + $0x960] sm:$0xff]  ;;  %v742_v13 = vld [vmem:[#allocation8 + $0x948] sm:$0xff] }
 0x17f   :  { %3623 = vmatpush1.bf16.msra.mxu0 %v4629_v34  ;;  %3795 = vmatpush1.bf16.msra.mxu1 %v4631_v39  ;;  %v714_v34 = vld [vmem:[#allocation8 + $0x868] sm:$0xff]  ;;  %v4677_v39 = vcombine.low %v701_v19, %v705_v20  ;;  %v749_v20 = vld [vmem:[#allocation8 + $0x980] sm:$0xff] }
 0x180   :  { %3624 = vmatprep.subr.bf16.mxu0 %v4638_v43  ;;  %3796 = vmatprep.subr.bf16.mxu1 %v4640_v44  ;;  %v4679_v43 = vcombine.low %v702_v22, %v706_v24  ;;  %v4686_v44 = vcombine.high %v709_v30, %v713_v32  ;;  %v4688_v51 = vcombine.high %v710_v33, %v714_v34  ;;  %v753_v22 = vld [vmem:[#allocation8 + $0x9a0] sm:$0xff]  ;;  %v750_v24 = vld [vmem:[#allocation8 + $0x988] sm:$0xff] }
 0x183   :  { %3625 = vmatpush1.bf16.msra.mxu0 %v4637_v58  ;;  %3797 = vmatpush1.bf16.msra.mxu1 %v4639_v59  ;;  %v722_v58 = vld [vmem:[#allocation8 + $0x8a8] sm:$0xff]  ;;  %v4685_v59 = vcombine.low %v709_v30, %v713_v32  ;;  %v757_v32 = vld [vmem:[#allocation8 + $0x9c0] sm:$0xff] }
 0x184   :  { %3626 = vmatprep.subr.bf16.mxu0 %v4646_v60  ;;  %3798 = vmatprep.subr.bf16.mxu1 %v4648_v61  ;;  %v4687_v60 = vcombine.low %v710_v33, %v714_v34  ;;  %v4694_v61 = vcombine.high %v717_v53, %v721_v54  ;;  %v4696_v62 = vcombine.high %v718_v55, %v722_v58  ;;  %v761_v33 = vld [vmem:[#allocation8 + $0x9e0] sm:$0xff]  ;;  %v758_v34 = vld [vmem:[#allocation8 + $0x9c8] sm:$0xff] }
 0x187   :  { %3627 = vmatpush1.bf16.msra.mxu0 %v4645_v36  ;;  %3799 = vmatpush1.bf16.msra.mxu1 %v4647_v38  ;;  %v730_v36 = vld [vmem:[#allocation8 + $0x8e8] sm:$0xff]  ;;  %v4693_v38 = vcombine.low %v717_v53, %v721_v54  ;;  %v765_v54 = vld [vmem:[#allocation8 + $0xa00] sm:$0xff] }
 0x188   :  { %3628 = vmatprep.subr.bf16.mxu0 %v4654_v40  ;;  %3800 = vmatprep.subr.bf16.mxu1 %v4656_v42  ;;  %v4695_v40 = vcombine.low %v718_v55, %v722_v58  ;;  %v4702_v42 = vcombine.high %v725_v63, %v729_v0  ;;  %v4704_v2 = vcombine.high %v726_v1, %v730_v36  ;;  %v769_v55 = vld [vmem:[#allocation8 + $0xa20] sm:$0xff]  ;;  %v766_v58 = vld [vmem:[#allocation8 + $0xa08] sm:$0xff] }
 0x18b   :  { %3629 = vmatpush1.bf16.msra.mxu0 %v4653_v6  ;;  %3801 = vmatpush1.bf16.msra.mxu1 %v4655_v7  ;;  %v738_v6 = vld [vmem:[#allocation8 + $0x928] sm:$0xff]  ;;  %v4701_v7 = vcombine.low %v725_v63, %v729_v0  ;;  %v773_v0 = vld [vmem:[#allocation8 + $0xa40] sm:$0xff] }
 0x18c   :  { %3630 = vmatprep.subr.bf16.mxu0 %v4662_v8  ;;  %3802 = vmatprep.subr.bf16.mxu1 %v4664_v9  ;;  %v4703_v8 = vcombine.low %v726_v1, %v730_v36  ;;  %v4710_v9 = vcombine.high %v733_v3, %v737_v4  ;;  %v4712_v10 = vcombine.high %v734_v5, %v738_v6  ;;  %v777_v1 = vld [vmem:[#allocation8 + $0xa60] sm:$0xff]  ;;  %v774_v36 = vld [vmem:[#allocation8 + $0xa48] sm:$0xff] }
 0x18f   :  { %3631 = vmatpush1.bf16.msra.mxu0 %v4661_v14  ;;  %3803 = vmatpush1.bf16.msra.mxu1 %v4663_v16  ;;  %v746_v14 = vld [vmem:[#allocation8 + $0x968] sm:$0xff]  ;;  %v4709_v16 = vcombine.low %v733_v3, %v737_v4  ;;  %v781_v4 = vld [vmem:[#allocation8 + $0xa80] sm:$0xff] }
 0x190   :  { %3632 = vmatprep.subr.bf16.mxu0 %v4670_v17  ;;  %3804 = vmatprep.subr.bf16.mxu1 %v4672_v18  ;;  %v4711_v17 = vcombine.low %v734_v5, %v738_v6  ;;  %v4718_v18 = vcombine.high %v741_v11, %v745_v12  ;;  %v4720_v19 = vcombine.high %v742_v13, %v746_v14  ;;  %v785_v5 = vld [vmem:[#allocation8 + $0xaa0] sm:$0xff]  ;;  %v782_v6 = vld [vmem:[#allocation8 + $0xa88] sm:$0xff] }
 0x193   :  { %3633 = vmatpush1.bf16.msra.mxu0 %v4669_v25  ;;  %3805 = vmatpush1.bf16.msra.mxu1 %v4671_v26  ;;  %v754_v25 = vld [vmem:[#allocation8 + $0x9a8] sm:$0xff]  ;;  %v4717_v26 = vcombine.low %v741_v11, %v745_v12  ;;  %v789_v12 = vld [vmem:[#allocation8 + $0xac0] sm:$0xff] }
 0x194   :  { %3645 = vmatprep.subr.bf16.mxu0 %v4678_v27  ;;  %3817 = vmatprep.subr.bf16.mxu1 %v4680_v28  ;;  %v4719_v27 = vcombine.low %v742_v13, %v746_v14  ;;  %v4726_v28 = vcombine.high %v749_v20, %v753_v22  ;;  %v4728_v30 = vcombine.high %v750_v24, %v754_v25  ;;  %v793_v13 = vld [vmem:[#allocation8 + $0xae0] sm:$0xff]  ;;  %v790_v14 = vld [vmem:[#allocation8 + $0xac8] sm:$0xff] }
 0x196   :  { %3635 = vmatmul.mubr.bf16.vlgmr.msra.gmra.mrb[8].mxu0 %v5336_v29  ;;  %3807 = vmatmul.mubr.bf16.vlgmr.msra.gmra.mrb[8].mxu1 %v5336_v29 }
 0x197   :  { %3646 = vmatpush1.bf16.msra.mxu0 %v4677_v39  ;;  %3818 = vmatpush1.bf16.msra.mxu1 %v4679_v43  ;;  %v762_v39 = vld [vmem:[#allocation8 + $0x9e8] sm:$0xff]  ;;  %v4725_v43 = vcombine.low %v749_v20, %v753_v22  ;;  %v797_v22 = vld [vmem:[#allocation8 + $0xb00] sm:$0xff] }
 0x198   :  { %3647 = vmatprep.subr.bf16.mxu0 %v4686_v44  ;;  %3819 = vmatprep.subr.bf16.mxu1 %v4688_v51  ;;  %v4727_v44 = vcombine.low %v750_v24, %v754_v25  ;;  %v4734_v51 = vcombine.high %v757_v32, %v761_v33  ;;  %v4736_v53 = vcombine.high %v758_v34, %v762_v39  ;;  %v801_v24 = vld [vmem:[#allocation8 + $0xb20] sm:$0xff]  ;;  %v798_v25 = vld [vmem:[#allocation8 + $0xb08] sm:$0xff] }
 0x199   :  { %3677 = vmatprep.mubr.bf16.mxu0 %v5354_v41  ;;  %3849 = vmatprep.mubr.bf16.mxu1 %v5354_v41 }
 0x19b   :  { %3648 = vmatpush1.bf16.msra.mxu0 %v4685_v59  ;;  %3820 = vmatpush1.bf16.msra.mxu1 %v4687_v60  ;;  %v770_v59 = vld [vmem:[#allocation8 + $0xa28] sm:$0xff]  ;;  %v4733_v60 = vcombine.low %v757_v32, %v761_v33  ;;  %v805_v33 = vld [vmem:[#allocation8 + $0xb40] sm:$0xff] }
 0x19c   :  { %3649 = vmatprep.subr.bf16.mxu0 %v4694_v61  ;;  %3821 = vmatprep.subr.bf16.mxu1 %v4696_v62  ;;  %v4735_v61 = vcombine.low %v758_v34, %v762_v39  ;;  %v4742_v62 = vcombine.high %v765_v54, %v769_v55  ;;  %v4744_v63 = vcombine.high %v766_v58, %v770_v59  ;;  %v809_v34 = vld [vmem:[#allocation8 + $0xb60] sm:$0xff]  ;;  %v806_v39 = vld [vmem:[#allocation8 + $0xb48] sm:$0xff] }
 0x19f   :  { %3650 = vmatpush1.bf16.msra.mxu0 %v4693_v38  ;;  %3822 = vmatpush1.bf16.msra.mxu1 %v4695_v40  ;;  %v778_v38 = vld [vmem:[#allocation8 + $0xa68] sm:$0xff]  ;;  %v4741_v40 = vcombine.low %v765_v54, %v769_v55  ;;  %v813_v55 = vld [vmem:[#allocation8 + $0xb80] sm:$0xff] }
 0x1a0   :  { %3651 = vmatprep.subr.bf16.mxu0 %v4702_v42  ;;  %3823 = vmatprep.subr.bf16.mxu1 %v4704_v2  ;;  %v4743_v42 = vcombine.low %v766_v58, %v770_v59  ;;  %v4750_v2 = vcombine.high %v773_v0, %v777_v1  ;;  %v4752_v3 = vcombine.high %v774_v36, %v778_v38  ;;  %v817_v58 = vld [vmem:[#allocation8 + $0xba0] sm:$0xff]  ;;  %v814_v59 = vld [vmem:[#allocation8 + $0xb88] sm:$0xff] }
 0x1a3   :  { %3652 = vmatpush1.bf16.msra.mxu0 %v4701_v7  ;;  %3824 = vmatpush1.bf16.msra.mxu1 %v4703_v8  ;;  %v786_v7 = vld [vmem:[#allocation8 + $0xaa8] sm:$0xff]  ;;  %v4749_v8 = vcombine.low %v773_v0, %v777_v1  ;;  %v821_v1 = vld [vmem:[#allocation8 + $0xbc0] sm:$0xff] }
 0x1a4   :  { %3653 = vmatprep.subr.bf16.mxu0 %v4710_v9  ;;  %3825 = vmatprep.subr.bf16.mxu1 %v4712_v10  ;;  %v4751_v9 = vcombine.low %v774_v36, %v778_v38  ;;  %v4758_v10 = vcombine.high %v781_v4, %v785_v5  ;;  %v4760_v11 = vcombine.high %v782_v6, %v786_v7  ;;  %v825_v36 = vld [vmem:[#allocation8 + $0xbe0] sm:$0xff]  ;;  %v822_v38 = vld [vmem:[#allocation8 + $0xbc8] sm:$0xff] }
 0x1a7   :  { %3654 = vmatpush1.bf16.msra.mxu0 %v4709_v16  ;;  %3826 = vmatpush1.bf16.msra.mxu1 %v4711_v17  ;;  %v794_v16 = vld [vmem:[#allocation8 + $0xae8] sm:$0xff]  ;;  %v4757_v17 = vcombine.low %v781_v4, %v785_v5  ;;  %v829_v5 = vld [vmem:[#allocation8 + $0xc00] sm:$0xff] }
 0x1a8   :  { %3655 = vmatprep.subr.bf16.mxu0 %v4718_v18  ;;  %3827 = vmatprep.subr.bf16.mxu1 %v4720_v19  ;;  %v4759_v18 = vcombine.low %v782_v6, %v786_v7  ;;  %v4766_v19 = vcombine.high %v789_v12, %v793_v13  ;;  %v4768_v20 = vcombine.high %v790_v14, %v794_v16  ;;  %v833_v6 = vld [vmem:[#allocation8 + $0xc20] sm:$0xff]  ;;  %v830_v7 = vld [vmem:[#allocation8 + $0xc08] sm:$0xff] }
 0x1ab   :  { %3656 = vmatpush1.bf16.msra.mxu0 %v4717_v26  ;;  %3828 = vmatpush1.bf16.msra.mxu1 %v4719_v27  ;;  %v802_v26 = vld [vmem:[#allocation8 + $0xb28] sm:$0xff]  ;;  %v4765_v27 = vcombine.low %v789_v12, %v793_v13  ;;  %v837_v13 = vld [vmem:[#allocation8 + $0xc40] sm:$0xff] }
 0x1ac   :  { %3657 = vmatprep.subr.bf16.mxu0 %v4726_v28  ;;  %3829 = vmatprep.subr.bf16.mxu1 %v4728_v30  ;;  %v4767_v28 = vcombine.low %v790_v14, %v794_v16  ;;  %v4774_v30 = vcombine.high %v797_v22, %v801_v24  ;;  %v4776_v32 = vcombine.high %v798_v25, %v802_v26  ;;  %v841_v14 = vld [vmem:[#allocation8 + $0xc60] sm:$0xff]  ;;  %v838_v16 = vld [vmem:[#allocation8 + $0xc48] sm:$0xff] }
 0x1af   :  { %3658 = vmatpush1.bf16.msra.mxu0 %v4725_v43  ;;  %3830 = vmatpush1.bf16.msra.mxu1 %v4727_v44  ;;  %v810_v43 = vld [vmem:[#allocation8 + $0xb68] sm:$0xff]  ;;  %v4773_v44 = vcombine.low %v797_v22, %v801_v24  ;;  %v845_v24 = vld [vmem:[#allocation8 + $0xc80] sm:$0xff] }
 0x1b0   :  { %3659 = vmatprep.subr.bf16.mxu0 %v4734_v51  ;;  %3831 = vmatprep.subr.bf16.mxu1 %v4736_v53  ;;  %v4775_v51 = vcombine.low %v798_v25, %v802_v26  ;;  %v4782_v53 = vcombine.high %v805_v33, %v809_v34  ;;  %v4784_v54 = vcombine.high %v806_v39, %v810_v43  ;;  %v849_v25 = vld [vmem:[#allocation8 + $0xca0] sm:$0xff]  ;;  %v846_v26 = vld [vmem:[#allocation8 + $0xc88] sm:$0xff] }
 0x1b3   :  { %3660 = vmatpush1.bf16.msra.mxu0 %v4733_v60  ;;  %3832 = vmatpush1.bf16.msra.mxu1 %v4735_v61  ;;  %v818_v60 = vld [vmem:[#allocation8 + $0xba8] sm:$0xff]  ;;  %v4781_v61 = vcombine.low %v805_v33, %v809_v34  ;;  %v853_v34 = vld [vmem:[#allocation8 + $0xcc0] sm:$0xff] }
 0x1b4   :  { %3661 = vmatprep.subr.bf16.mxu0 %v4742_v62  ;;  %3833 = vmatprep.subr.bf16.mxu1 %v4744_v63  ;;  %v4783_v62 = vcombine.low %v806_v39, %v810_v43  ;;  %v4790_v63 = vcombine.high %v813_v55, %v817_v58  ;;  %v4792_v0 = vcombine.high %v814_v59, %v818_v60  ;;  %v857_v39 = vld [vmem:[#allocation8 + $0xce0] sm:$0xff]  ;;  %v854_v43 = vld [vmem:[#allocation8 + $0xcc8] sm:$0xff] }
 0x1b7   :  { %3662 = vmatpush1.bf16.msra.mxu0 %v4741_v40  ;;  %3834 = vmatpush1.bf16.msra.mxu1 %v4743_v42  ;;  %v826_v40 = vld [vmem:[#allocation8 + $0xbe8] sm:$0xff]  ;;  %v4789_v42 = vcombine.low %v813_v55, %v817_v58  ;;  %v861_v58 = vld [vmem:[#allocation8 + $0xd00] sm:$0xff] }
 0x1b8   :  { %3663 = vmatprep.subr.bf16.mxu0 %v4750_v2  ;;  %3835 = vmatprep.subr.bf16.mxu1 %v4752_v3  ;;  %v4791_v2 = vcombine.low %v814_v59, %v818_v60  ;;  %v4798_v3 = vcombine.high %v821_v1, %v825_v36  ;;  %v4800_v4 = vcombine.high %v822_v38, %v826_v40  ;;  %v865_v59 = vld [vmem:[#allocation8 + $0xd20] sm:$0xff]  ;;  %v862_v60 = vld [vmem:[#allocation8 + $0xd08] sm:$0xff] }
 0x1bb   :  { %3664 = vmatpush1.bf16.msra.mxu0 %v4749_v8  ;;  %3836 = vmatpush1.bf16.msra.mxu1 %v4751_v9  ;;  %v834_v8 = vld [vmem:[#allocation8 + $0xc28] sm:$0xff]  ;;  %v4797_v9 = vcombine.low %v821_v1, %v825_v36  ;;  %v869_v36 = vld [vmem:[#allocation8 + $0xd40] sm:$0xff] }
 0x1bc   :  { %3665 = vmatprep.subr.bf16.mxu0 %v4758_v10  ;;  %3837 = vmatprep.subr.bf16.mxu1 %v4760_v11  ;;  %v4799_v10 = vcombine.low %v822_v38, %v826_v40  ;;  %v4806_v11 = vcombine.high %v829_v5, %v833_v6  ;;  %v4808_v12 = vcombine.high %v830_v7, %v834_v8  ;;  %v873_v38 = vld [vmem:[#allocation8 + $0xd60] sm:$0xff]  ;;  %v870_v40 = vld [vmem:[#allocation8 + $0xd48] sm:$0xff] }
 0x1bf   :  { %3666 = vmatpush1.bf16.msra.mxu0 %v4757_v17  ;;  %3838 = vmatpush1.bf16.msra.mxu1 %v4759_v18  ;;  %v842_v17 = vld [vmem:[#allocation8 + $0xc68] sm:$0xff]  ;;  %v4805_v18 = vcombine.low %v829_v5, %v833_v6  ;;  %v877_v6 = vld [vmem:[#allocation8 + $0xd80] sm:$0xff] }
 0x1c0   :  { %3667 = vmatprep.subr.bf16.mxu0 %v4766_v19  ;;  %3839 = vmatprep.subr.bf16.mxu1 %v4768_v20  ;;  %v4807_v19 = vcombine.low %v830_v7, %v834_v8  ;;  %v4814_v20 = vcombine.high %v837_v13, %v841_v14  ;;  %v4816_v22 = vcombine.high %v838_v16, %v842_v17  ;;  %v881_v7 = vld [vmem:[#allocation8 + $0xda0] sm:$0xff]  ;;  %v878_v8 = vld [vmem:[#allocation8 + $0xd88] sm:$0xff] }
 0x1c3   :  { %3668 = vmatpush1.bf16.msra.mxu0 %v4765_v27  ;;  %3840 = vmatpush1.bf16.msra.mxu1 %v4767_v28  ;;  %v850_v27 = vld [vmem:[#allocation8 + $0xca8] sm:$0xff]  ;;  %v4813_v28 = vcombine.low %v837_v13, %v841_v14  ;;  %v885_v14 = vld [vmem:[#allocation8 + $0xdc0] sm:$0xff] }
 0x1c4   :  { %3669 = vmatprep.subr.bf16.mxu0 %v4774_v30  ;;  %3841 = vmatprep.subr.bf16.mxu1 %v4776_v32  ;;  %v4815_v30 = vcombine.low %v838_v16, %v842_v17  ;;  %v4822_v32 = vcombine.high %v845_v24, %v849_v25  ;;  %v4824_v33 = vcombine.high %v846_v26, %v850_v27  ;;  %v889_v16 = vld [vmem:[#allocation8 + $0xde0] sm:$0xff]  ;;  %v886_v17 = vld [vmem:[#allocation8 + $0xdc8] sm:$0xff] }
 0x1c7   :  { %3670 = vmatpush1.bf16.msra.mxu0 %v4773_v44  ;;  %3842 = vmatpush1.bf16.msra.mxu1 %v4775_v51  ;;  %v858_v44 = vld [vmem:[#allocation8 + $0xce8] sm:$0xff]  ;;  %v4821_v51 = vcombine.low %v845_v24, %v849_v25  ;;  %v893_v25 = vld [vmem:[#allocation8 + $0xe00] sm:$0xff] }
 0x1c8   :  { %3671 = vmatprep.subr.bf16.mxu0 %v4782_v53  ;;  %3843 = vmatprep.subr.bf16.mxu1 %v4784_v54  ;;  %v4823_v53 = vcombine.low %v846_v26, %v850_v27  ;;  %v4830_v54 = vcombine.high %v853_v34, %v857_v39  ;;  %v4832_v55 = vcombine.high %v854_v43, %v858_v44  ;;  %v897_v26 = vld [vmem:[#allocation8 + $0xe20] sm:$0xff]  ;;  %v894_v27 = vld [vmem:[#allocation8 + $0xe08] sm:$0xff] }
 0x1cb   :  { %3672 = vmatpush1.bf16.msra.mxu0 %v4781_v61  ;;  %3844 = vmatpush1.bf16.msra.mxu1 %v4783_v62  ;;  %v866_v61 = vld [vmem:[#allocation8 + $0xd28] sm:$0xff]  ;;  %v4829_v62 = vcombine.low %v853_v34, %v857_v39  ;;  %v901_v39 = vld [vmem:[#allocation8 + $0xe40] sm:$0xff] }
 0x1cc   :  { %3673 = vmatprep.subr.bf16.mxu0 %v4790_v63  ;;  %3845 = vmatprep.subr.bf16.mxu1 %v4792_v0  ;;  %v4831_v63 = vcombine.low %v854_v43, %v858_v44  ;;  %v4838_v0 = vcombine.high %v861_v58, %v865_v59  ;;  %v4840_v1 = vcombine.high %v862_v60, %v866_v61  ;;  %v905_v43 = vld [vmem:[#allocation8 + $0xe60] sm:$0xff]  ;;  %v902_v44 = vld [vmem:[#allocation8 + $0xe48] sm:$0xff] }
 0x1cf   :  { %3674 = vmatpush1.bf16.msra.mxu0 %v4789_v42  ;;  %3846 = vmatpush1.bf16.msra.mxu1 %v4791_v2  ;;  %v874_v42 = vld [vmem:[#allocation8 + $0xd68] sm:$0xff]  ;;  %v4837_v2 = vcombine.low %v861_v58, %v865_v59  ;;  %v909_v59 = vld [vmem:[#allocation8 + $0xe80] sm:$0xff] }
 0x1d0   :  { %3675 = vmatprep.subr.bf16.mxu0 %v4798_v3  ;;  %3847 = vmatprep.subr.bf16.mxu1 %v4800_v4  ;;  %v4839_v3 = vcombine.low %v862_v60, %v866_v61  ;;  %v4846_v4 = vcombine.high %v869_v36, %v873_v38  ;;  %v4848_v5 = vcombine.high %v870_v40, %v874_v42  ;;  %v913_v60 = vld [vmem:[#allocation8 + $0xea0] sm:$0xff]  ;;  %v910_v61 = vld [vmem:[#allocation8 + $0xe88] sm:$0xff] }
 0x1d3   :  { %3676 = vmatpush1.bf16.msra.mxu0 %v4797_v9  ;;  %3848 = vmatpush1.bf16.msra.mxu1 %v4799_v10  ;;  %v882_v9 = vld [vmem:[#allocation8 + $0xda8] sm:$0xff]  ;;  %v4845_v10 = vcombine.low %v869_v36, %v873_v38  ;;  %v917_v38 = vld [vmem:[#allocation8 + $0xec0] sm:$0xff] }
 0x1d4   :  { %3688 = vmatprep.subr.bf16.mxu0 %v4806_v11  ;;  %3860 = vmatprep.subr.bf16.mxu1 %v4808_v12  ;;  %v4847_v11 = vcombine.low %v870_v40, %v874_v42  ;;  %v4854_v12 = vcombine.high %v877_v6, %v881_v7  ;;  %v4856_v13 = vcombine.high %v878_v8, %v882_v9  ;;  %v921_v40 = vld [vmem:[#allocation8 + $0xee0] sm:$0xff]  ;;  %v918_v42 = vld [vmem:[#allocation8 + $0xec8] sm:$0xff] }
 0x1d6   :  { %3678 = vmatmul.mubr.bf16.vlgmr.msra.gmra.mrb[8].mxu0 %v5352_v37  ;;  %3850 = vmatmul.mubr.bf16.vlgmr.msra.gmra.mrb[8].mxu1 %v5352_v37 }
 0x1d7   :  { %3689 = vmatpush1.bf16.msra.mxu0 %v4805_v18  ;;  %3861 = vmatpush1.bf16.msra.mxu1 %v4807_v19  ;;  %v890_v18 = vld [vmem:[#allocation8 + $0xde8] sm:$0xff]  ;;  %v4853_v19 = vcombine.low %v877_v6, %v881_v7  ;;  %v925_v7 = vld [vmem:[#allocation8 + $0xf00] sm:$0xff] }
 0x1d8   :  { %3690 = vmatprep.subr.bf16.mxu0 %v4814_v20  ;;  %3862 = vmatprep.subr.bf16.mxu1 %v4816_v22  ;;  %v4855_v20 = vcombine.low %v878_v8, %v882_v9  ;;  %v4862_v22 = vcombine.high %v885_v14, %v889_v16  ;;  %v4864_v24 = vcombine.high %v886_v17, %v890_v18  ;;  %v929_v8 = vld [vmem:[#allocation8 + $0xf20] sm:$0xff]  ;;  %v926_v9 = vld [vmem:[#allocation8 + $0xf08] sm:$0xff] }
 0x1d9   :  { %3720 = vmatprep.mubr.bf16.mxu0 %v5367_v15  ;;  %3892 = vmatprep.mubr.bf16.mxu1 %v5367_v15 }
 0x1db   :  { %3691 = vmatpush1.bf16.msra.mxu0 %v4813_v28  ;;  %3863 = vmatpush1.bf16.msra.mxu1 %v4815_v30  ;;  %v898_v28 = vld [vmem:[#allocation8 + $0xe28] sm:$0xff]  ;;  %v4861_v30 = vcombine.low %v885_v14, %v889_v16  ;;  %v933_v16 = vld [vmem:[#allocation8 + $0xf40] sm:$0xff] }
 0x1dc   :  { %3692 = vmatprep.subr.bf16.mxu0 %v4822_v32  ;;  %3864 = vmatprep.subr.bf16.mxu1 %v4824_v33  ;;  %v4863_v32 = vcombine.low %v886_v17, %v890_v18  ;;  %v4870_v33 = vcombine.high %v893_v25, %v897_v26  ;;  %v4872_v34 = vcombine.high %v894_v27, %v898_v28  ;;  %v937_v17 = vld [vmem:[#allocation8 + $0xf60] sm:$0xff]  ;;  %v934_v18 = vld [vmem:[#allocation8 + $0xf48] sm:$0xff] }
 0x1df   :  { %3693 = vmatpush1.bf16.msra.mxu0 %v4821_v51  ;;  %3865 = vmatpush1.bf16.msra.mxu1 %v4823_v53  ;;  %v906_v51 = vld [vmem:[#allocation8 + $0xe68] sm:$0xff]  ;;  %v4869_v53 = vcombine.low %v893_v25, %v897_v26  ;;  %v941_v26 = vld [vmem:[#allocation8 + $0xf80] sm:$0xff] }
 0x1e0   :  { %3694 = vmatprep.subr.bf16.mxu0 %v4830_v54  ;;  %3866 = vmatprep.subr.bf16.mxu1 %v4832_v55  ;;  %v4871_v54 = vcombine.low %v894_v27, %v898_v28  ;;  %v4878_v55 = vcombine.high %v901_v39, %v905_v43  ;;  %v4880_v58 = vcombine.high %v902_v44, %v906_v51  ;;  %v945_v27 = vld [vmem:[#allocation8 + $0xfa0] sm:$0xff]  ;;  %v942_v28 = vld [vmem:[#allocation8 + $0xf88] sm:$0xff] }
 0x1e3   :  { %3695 = vmatpush1.bf16.msra.mxu0 %v4829_v62  ;;  %3867 = vmatpush1.bf16.msra.mxu1 %v4831_v63  ;;  %v914_v62 = vld [vmem:[#allocation8 + $0xea8] sm:$0xff]  ;;  %v4877_v63 = vcombine.low %v901_v39, %v905_v43  ;;  %v949_v43 = vld [vmem:[#allocation8 + $0xfc0] sm:$0xff] }
 0x1e4   :  { %3696 = vmatprep.subr.bf16.mxu0 %v4838_v0  ;;  %3868 = vmatprep.subr.bf16.mxu1 %v4840_v1  ;;  %v4879_v0 = vcombine.low %v902_v44, %v906_v51  ;;  %v4886_v1 = vcombine.high %v909_v59, %v913_v60  ;;  %v4888_v36 = vcombine.high %v910_v61, %v914_v62  ;;  %v953_v44 = vld [vmem:[#allocation8 + $0xfe0] sm:$0xff]  ;;  %v950_v51 = vld [vmem:[#allocation8 + $0xfc8] sm:$0xff] }
 0x1e7   :  { %3697 = vmatpush1.bf16.msra.mxu0 %v4837_v2  ;;  %3869 = vmatpush1.bf16.msra.mxu1 %v4839_v3  ;;  %v922_v2 = vld [vmem:[#allocation8 + $0xee8] sm:$0xff]  ;;  %v4885_v3 = vcombine.low %v909_v59, %v913_v60  ;;  %v447_v60 = vld [vmem:[#allocation8 + $0x10] sm:$0xff] }
 0x1e8   :  { %3698 = vmatprep.subr.bf16.mxu0 %v4846_v4  ;;  %3870 = vmatprep.subr.bf16.mxu1 %v4848_v5  ;;  %v4887_v4 = vcombine.low %v910_v61, %v914_v62  ;;  %v4894_v5 = vcombine.high %v917_v38, %v921_v40  ;;  %v4896_v6 = vcombine.high %v918_v42, %v922_v2  ;;  %v451_v61 = vld [vmem:[#allocation8 + $0x30] sm:$0xff]  ;;  %v448_v62 = vld [vmem:[#allocation8 + $0x18] sm:$0xff] }
 0x1eb   :  { %3699 = vmatpush1.bf16.msra.mxu0 %v4845_v10  ;;  %3871 = vmatpush1.bf16.msra.mxu1 %v4847_v11  ;;  %v930_v10 = vld [vmem:[#allocation8 + $0xf28] sm:$0xff]  ;;  %v4893_v11 = vcombine.low %v917_v38, %v921_v40  ;;  %v455_v40 = vld [vmem:[#allocation8 + $0x50] sm:$0xff] }
 0x1ec   :  { %3700 = vmatprep.subr.bf16.mxu0 %v4854_v12  ;;  %3872 = vmatprep.subr.bf16.mxu1 %v4856_v13  ;;  %v4895_v12 = vcombine.low %v918_v42, %v922_v2  ;;  %v4902_v13 = vcombine.high %v925_v7, %v929_v8  ;;  %v4904_v14 = vcombine.high %v926_v9, %v930_v10  ;;  %v459_v42 = vld [vmem:[#allocation8 + $0x70] sm:$0xff]  ;;  %v456_v2 = vld [vmem:[#allocation8 + $0x58] sm:$0xff] }
 0x1ef   :  { %3701 = vmatpush1.bf16.msra.mxu0 %v4853_v19  ;;  %3873 = vmatpush1.bf16.msra.mxu1 %v4855_v20  ;;  %v938_v19 = vld [vmem:[#allocation8 + $0xf68] sm:$0xff]  ;;  %v4901_v20 = vcombine.low %v925_v7, %v929_v8  ;;  %v463_v8 = vld [vmem:[#allocation8 + $0x90] sm:$0xff] }
 0x1f0   :  { %3702 = vmatprep.subr.bf16.mxu0 %v4862_v22  ;;  %3874 = vmatprep.subr.bf16.mxu1 %v4864_v24  ;;  %v4903_v22 = vcombine.low %v926_v9, %v930_v10  ;;  %v4910_v24 = vcombine.high %v933_v16, %v937_v17  ;;  %v4912_v25 = vcombine.high %v934_v18, %v938_v19  ;;  %v467_v9 = vld [vmem:[#allocation8 + $0xb0] sm:$0xff]  ;;  %v464_v10 = vld [vmem:[#allocation8 + $0x98] sm:$0xff] }
 0x1f3   :  { %3703 = vmatpush1.bf16.msra.mxu0 %v4861_v30  ;;  %3875 = vmatpush1.bf16.msra.mxu1 %v4863_v32  ;;  %v946_v30 = vld [vmem:[#allocation8 + $0xfa8] sm:$0xff]  ;;  %v4909_v32 = vcombine.low %v933_v16, %v937_v17  ;;  %v471_v17 = vld [vmem:[#allocation8 + $0xd0] sm:$0xff] }
 0x1f4   :  { %3704 = vmatprep.subr.bf16.mxu0 %v4870_v33  ;;  %3876 = vmatprep.subr.bf16.mxu1 %v4872_v34  ;;  %v4911_v33 = vcombine.low %v934_v18, %v938_v19  ;;  %v4918_v34 = vcombine.high %v941_v26, %v945_v27  ;;  %v4920_v39 = vcombine.high %v942_v28, %v946_v30  ;;  %v475_v18 = vld [vmem:[#allocation8 + $0xf0] sm:$0xff]  ;;  %v472_v19 = vld [vmem:[#allocation8 + $0xd8] sm:$0xff] }
 0x1f7   :  { %3705 = vmatpush1.bf16.msra.mxu0 %v4869_v53  ;;  %3877 = vmatpush1.bf16.msra.mxu1 %v4871_v54  ;;  %v954_v53 = vld [vmem:[#allocation8 + $0xfe8] sm:$0xff]  ;;  %v4917_v54 = vcombine.low %v941_v26, %v945_v27  ;;  %v479_v27 = vld [vmem:[#allocation8 + $0x110] sm:$0xff] }
 0x1f8   :  { %3706 = vmatprep.subr.bf16.mxu0 %v4878_v55  ;;  %3878 = vmatprep.subr.bf16.mxu1 %v4880_v58  ;;  %v4919_v55 = vcombine.low %v942_v28, %v946_v30  ;;  %v4926_v58 = vcombine.high %v949_v43, %v953_v44  ;;  %v4928_v59 = vcombine.high %v950_v51, %v954_v53  ;;  %v483_v28 = vld [vmem:[#allocation8 + $0x130] sm:$0xff]  ;;  %v484_v30 = vld [vmem:[#allocation8 + $0x138] sm:$0xff] }
 0x1fb   :  { %3707 = vmatpush1.bf16.msra.mxu0 %v4877_v63  ;;  %3879 = vmatpush1.bf16.msra.mxu1 %v4879_v0  ;;  %v452_v63 = vld [vmem:[#allocation8 + $0x38] sm:$0xff]  ;;  %v4925_v0 = vcombine.low %v949_v43, %v953_v44  ;;  %v487_v43 = vld [vmem:[#allocation8 + $0x150] sm:$0xff] }
 0x1fc   :  { %3708 = vmatprep.subr.bf16.mxu0 %v4886_v1  ;;  %3880 = vmatprep.subr.bf16.mxu1 %v4888_v36  ;;  %v4927_v1 = vcombine.low %v950_v51, %v954_v53  ;;  %v4426_v36 = vcombine.high %v447_v60, %v451_v61  ;;  %v4428_v38 = vcombine.high %v448_v62, %v452_v63  ;;  %v491_v44 = vld [vmem:[#allocation8 + $0x170] sm:$0xff]  ;;  %v488_v51 = vld [vmem:[#allocation8 + $0x158] sm:$0xff] }
 0x1fd   :  { %v492_v53 = vld [vmem:[#allocation8 + $0x178] sm:$0xff] }
 0x1ff   :  { %3709 = vmatpush1.bf16.msra.mxu0 %v4885_v3  ;;  %3881 = vmatpush1.bf16.msra.mxu1 %v4887_v4  ;;  %v460_v3 = vld [vmem:[#allocation8 + $0x78] sm:$0xff]  ;;  %v4425_v4 = vcombine.low %v447_v60, %v451_v61  ;;  %v495_v60 = vld [vmem:[#allocation8 + $0x190] sm:$0xff] }
 0x200   :  { %3710 = vmatprep.subr.bf16.mxu0 %v4894_v5  ;;  %3882 = vmatprep.subr.bf16.mxu1 %v4896_v6  ;;  %v4427_v5 = vcombine.low %v448_v62, %v452_v63  ;;  %v4434_v6 = vcombine.high %v455_v40, %v459_v42  ;;  %v4436_v7 = vcombine.high %v456_v2, %v460_v3  ;;  %v499_v61 = vld [vmem:[#allocation8 + $0x1b0] sm:$0xff]  ;;  %v496_v62 = vld [vmem:[#allocation8 + $0x198] sm:$0xff] }
 0x201   :  { %v500_v63 = vld [vmem:[#allocation8 + $0x1b8] sm:$0xff] }
 0x203   :  { %3711 = vmatpush1.bf16.msra.mxu0 %v4893_v11  ;;  %3883 = vmatpush1.bf16.msra.mxu1 %v4895_v12  ;;  %v468_v11 = vld [vmem:[#allocation8 + $0xb8] sm:$0xff]  ;;  %v4433_v12 = vcombine.low %v455_v40, %v459_v42  ;;  %v503_v40 = vld [vmem:[#allocation8 + $0x1d0] sm:$0xff] }
 0x204   :  { %3712 = vmatprep.subr.bf16.mxu0 %v4902_v13  ;;  %3884 = vmatprep.subr.bf16.mxu1 %v4904_v14  ;;  %v4435_v13 = vcombine.low %v456_v2, %v460_v3  ;;  %v4442_v14 = vcombine.high %v463_v8, %v467_v9  ;;  %v4444_v16 = vcombine.high %v464_v10, %v468_v11  ;;  %v507_v42 = vld [vmem:[#allocation8 + $0x1f0] sm:$0xff]  ;;  %v504_v2 = vld [vmem:[#allocation8 + $0x1d8] sm:$0xff] }
 0x205   :  { %v508_v3 = vld [vmem:[#allocation8 + $0x1f8] sm:$0xff] }
 0x207   :  { %3713 = vmatpush1.bf16.msra.mxu0 %v4901_v20  ;;  %3885 = vmatpush1.bf16.msra.mxu1 %v4903_v22  ;;  %v476_v20 = vld [vmem:[#allocation8 + $0xf8] sm:$0xff]  ;;  %v4441_v22 = vcombine.low %v463_v8, %v467_v9  ;;  %v511_v8 = vld [vmem:[#allocation8 + $0x210] sm:$0xff] }
 0x208   :  { %3714 = vmatprep.subr.bf16.mxu0 %v4910_v24  ;;  %3886 = vmatprep.subr.bf16.mxu1 %v4912_v25  ;;  %v4443_v24 = vcombine.low %v464_v10, %v468_v11  ;;  %v4450_v25 = vcombine.high %v471_v17, %v475_v18  ;;  %v4452_v26 = vcombine.high %v472_v19, %v476_v20  ;;  %v515_v9 = vld [vmem:[#allocation8 + $0x230] sm:$0xff]  ;;  %v512_v10 = vld [vmem:[#allocation8 + $0x218] sm:$0xff] }
 0x209   :  { %v516_v11 = vld [vmem:[#allocation8 + $0x238] sm:$0xff] }
 0x20b   :  { %3715 = vmatpush1.bf16.msra.mxu0 %v4909_v32  ;;  %3887 = vmatpush1.bf16.msra.mxu1 %v4911_v33  ;;  %v4449_v32 = vcombine.low %v471_v17, %v475_v18  ;;  %v4451_v33 = vcombine.low %v472_v19, %v476_v20  ;;  %v519_v17 = vld [vmem:[#allocation8 + $0x250] sm:$0xff]  ;;  %v520_v19 = vld [vmem:[#allocation8 + $0x258] sm:$0xff] }
 0x20c   :  { %3716 = vmatprep.subr.bf16.mxu0 %v4918_v34  ;;  %3888 = vmatprep.subr.bf16.mxu1 %v4920_v39  ;;  %v4458_v34 = vcombine.high %v479_v27, %v483_v28  ;;  %v523_v18 = vld [vmem:[#allocation8 + $0x270] sm:$0xff]  ;;  %v524_v20 = vld [vmem:[#allocation8 + $0x278] sm:$0xff] }
 0x20f   :  { %3717 = vmatpush1.bf16.msra.mxu0 %v4917_v54  ;;  %3889 = vmatpush1.bf16.msra.mxu1 %v4919_v55  ;;  %v4457_v54 = vcombine.low %v479_v27, %v483_v28  ;;  %v527_v27 = vld [vmem:[#allocation8 + $0x290] sm:$0xff] }
 0x210   :  { %3718 = vmatprep.subr.bf16.mxu0 %v4926_v58  ;;  %3890 = vmatprep.subr.bf16.mxu1 %v4928_v59  ;;  %v4466_v58 = vcombine.high %v487_v43, %v491_v44  ;;  %v4468_v59 = vcombine.high %v488_v51, %v492_v53  ;;  %v531_v28 = vld [vmem:[#allocation8 + $0x2b0] sm:$0xff] }
 0x213   :  { %3719 = vmatpush1.bf16.msra.mxu0 %v4925_v0  ;;  %3891 = vmatpush1.bf16.msra.mxu1 %v4927_v1  ;;  %v4465_v0 = vcombine.low %v487_v43, %v491_v44  ;;  %v4467_v1 = vcombine.low %v488_v51, %v492_v53  ;;  %v535_v43 = vld [vmem:[#allocation8 + $0x2d0] sm:$0xff]  ;;  %v536_v51 = vld [vmem:[#allocation8 + $0x2d8] sm:$0xff] }
 0x214   :  { %3903 = vmatprep.subr.bf16.mxu0 %v4426_v36  ;;  %4075 = vmatprep.subr.bf16.mxu1 %v4428_v38  ;;  %v4474_v36 = vcombine.high %v495_v60, %v499_v61  ;;  %v4476_v38 = vcombine.high %v496_v62, %v500_v63  ;;  %v539_v44 = vld [vmem:[#allocation8 + $0x2f0] sm:$0xff]  ;;  %v540_v53 = vld [vmem:[#allocation8 + $0x2f8] sm:$0xff] }
 0x216   :  { %3721 = vmatmul.mubr.bf16.vlgmr.msra.gmra.mrb[8].mxu0 %v5365_v47  ;;  %3893 = vmatmul.mubr.bf16.vlgmr.msra.gmra.mrb[8].mxu1 %v5365_v47 }
 0x217   :  { %3904 = vmatpush1.bf16.msra.mxu0 %v4425_v4  ;;  %3935 = vmatprep.mubr.bf16.mxu0 %v5334_v23  ;;  %v4473_v4 = vcombine.low %v495_v60, %v499_v61  ;;  %v543_v60 = vld [vmem:[#allocation8 + $0x310] sm:$0xff] }
 0x218   :  { %4076 = vmatpush1.bf16.msra.mxu1 %v4427_v5  ;;  %4107 = vmatprep.mubr.bf16.mxu1 %v5334_v23  ;;  %v480_v23 = vld [vmem:[#allocation8 + $0x118] sm:$0xff]  ;;  %v4475_v5 = vcombine.low %v496_v62, %v500_v63  ;;  %v547_v61 = vld [vmem:[#allocation8 + $0x330] sm:$0xff] }
 0x219   :  { %3905 = vmatprep.subr.bf16.mxu0 %v4434_v6  ;;  %4077 = vmatprep.subr.bf16.mxu1 %v4436_v7  ;;  %v4460_v39 = vcombine.high %v480_v23, %v484_v30  ;;  %v4459_v55 = vcombine.low %v480_v23, %v484_v30  ;;  %v4482_v6 = vcombine.high %v503_v40, %v507_v42  ;;  %v528_v23 = vld [vmem:[#allocation8 + $0x298] sm:$0xff] }
 0x21a   :  { %v4484_v7 = vcombine.high %v504_v2, %v508_v3  ;;  %v532_v30 = vld [vmem:[#allocation8 + $0x2b8] sm:$0xff] }
 0x21b   :  { %3906 = vmatpush1.bf16.msra.mxu0 %v4433_v12  ;;  %v4481_v12 = vcombine.low %v503_v40, %v507_v42  ;;  %v544_v62 = vld [vmem:[#allocation8 + $0x318] sm:$0xff]  ;;  %v551_v40 = vld [vmem:[#allocation8 + $0x350] sm:$0xff] }
 0x21c   :  { %4078 = vmatpush1.bf16.msra.mxu1 %v4435_v13  ;;  %3907 = vmatprep.subr.bf16.mxu0 %v4442_v14  ;;  %v4483_v13 = vcombine.low %v504_v2, %v508_v3  ;;  %v4490_v14 = vcombine.high %v511_v8, %v515_v9  ;;  %v548_v63 = vld [vmem:[#allocation8 + $0x338] sm:$0xff]  ;;  %v555_v42 = vld [vmem:[#allocation8 + $0x370] sm:$0xff] }
 0x21d   :  { %4079 = vmatprep.subr.bf16.mxu1 %v4444_v16  ;;  %v4492_v16 = vcombine.high %v512_v10, %v516_v11  ;;  %v552_v2 = vld [vmem:[#allocation8 + $0x358] sm:$0xff] }
 0x21e   :  { %v556_v3 = vld [vmem:[#allocation8 + $0x378] sm:$0xff] }
 0x21f   :  { %3908 = vmatpush1.bf16.msra.mxu0 %v4441_v22  ;;  %v4489_v22 = vcombine.low %v511_v8, %v515_v9  ;;  %v559_v8 = vld [vmem:[#allocation8 + $0x390] sm:$0xff] }
 0x220   :  { %4080 = vmatpush1.bf16.msra.mxu1 %v4443_v24  ;;  %3909 = vmatprep.subr.bf16.mxu0 %v4450_v25  ;;  %v4491_v24 = vcombine.low %v512_v10, %v516_v11  ;;  %v4498_v25 = vcombine.high %v519_v17, %v523_v18  ;;  %v563_v9 = vld [vmem:[#allocation8 + $0x3b0] sm:$0xff]  ;;  %v560_v10 = vld [vmem:[#allocation8 + $0x398] sm:$0xff] }
 0x221   :  { %4081 = vmatprep.subr.bf16.mxu1 %v4452_v26  ;;  %v4500_v26 = vcombine.high %v520_v19, %v524_v20  ;;  %v564_v11 = vld [vmem:[#allocation8 + $0x3b8] sm:$0xff] }
 0x223   :  { %3910 = vmatpush1.bf16.msra.mxu0 %v4449_v32  ;;  %v4497_v32 = vcombine.low %v519_v17, %v523_v18  ;;  %v567_v17 = vld [vmem:[#allocation8 + $0x3d0] sm:$0xff] }
 0x224   :  { %4082 = vmatpush1.bf16.msra.mxu1 %v4451_v33  ;;  %3911 = vmatprep.subr.bf16.mxu0 %v4458_v34  ;;  %v4499_v33 = vcombine.low %v520_v19, %v524_v20  ;;  %v4506_v34 = vcombine.high %v527_v27, %v531_v28  ;;  %v571_v18 = vld [vmem:[#allocation8 + $0x3f0] sm:$0xff]  ;;  %v568_v19 = vld [vmem:[#allocation8 + $0x3d8] sm:$0xff] }
 0x225   :  { %4083 = vmatprep.subr.bf16.mxu1 %v4460_v39  ;;  %v4508_v39 = vcombine.high %v528_v23, %v532_v30  ;;  %v572_v20 = vld [vmem:[#allocation8 + $0x3f8] sm:$0xff] }
 0x227   :  { %3912 = vmatpush1.bf16.msra.mxu0 %v4457_v54  ;;  %v4505_v54 = vcombine.low %v527_v27, %v531_v28  ;;  %v575_v27 = vld [vmem:[#allocation8 + $0x410] sm:$0xff] }
 0x228   :  { %4084 = vmatpush1.bf16.msra.mxu1 %v4459_v55  ;;  %3913 = vmatprep.subr.bf16.mxu0 %v4466_v58  ;;  %v4507_v55 = vcombine.low %v528_v23, %v532_v30  ;;  %v4514_v58 = vcombine.high %v535_v43, %v539_v44  ;;  %v579_v28 = vld [vmem:[#allocation8 + $0x430] sm:$0xff]  ;;  %v576_v23 = vld [vmem:[#allocation8 + $0x418] sm:$0xff] }
 0x229   :  { %4085 = vmatprep.subr.bf16.mxu1 %v4468_v59  ;;  %v4516_v59 = vcombine.high %v536_v51, %v540_v53  ;;  %v580_v30 = vld [vmem:[#allocation8 + $0x438] sm:$0xff] }
 0x22b   :  { %3914 = vmatpush1.bf16.msra.mxu0 %v4465_v0  ;;  %v4513_v0 = vcombine.low %v535_v43, %v539_v44  ;;  %v583_v43 = vld [vmem:[#allocation8 + $0x450] sm:$0xff] }
 0x22c   :  { %4086 = vmatpush1.bf16.msra.mxu1 %v4467_v1  ;;  %3915 = vmatprep.subr.bf16.mxu0 %v4474_v36  ;;  %v4515_v1 = vcombine.low %v536_v51, %v540_v53  ;;  %v4522_v36 = vcombine.high %v543_v60, %v547_v61  ;;  %v587_v44 = vld [vmem:[#allocation8 + $0x470] sm:$0xff]  ;;  %v4553_v51 = vcombine.low %v575_v27, %v579_v28  ;;  %v584_v53 = vld [vmem:[#allocation8 + $0x458] sm:$0xff] }
 0x22d   :  { %4087 = vmatprep.subr.bf16.mxu1 %v4476_v38  ;;  %v4524_v38 = vcombine.high %v544_v62, %v548_v63 }
 0x22f   :  { %3916 = vmatpush1.bf16.msra.mxu0 %v4473_v4  ;;  %v4521_v4 = vcombine.low %v543_v60, %v547_v61  ;;  %v595_v60 = vld [vmem:[#allocation8 + $0x4b0] sm:$0xff] }
 0x230   :  { %4088 = vmatpush1.bf16.msra.mxu1 %v4475_v5  ;;  %3917 = vmatprep.subr.bf16.mxu0 %v4482_v6  ;;  %v4523_v5 = vcombine.low %v544_v62, %v548_v63  ;;  %v4530_v6 = vcombine.high %v551_v40, %v555_v42  ;;  %v592_v62 = vld [vmem:[#allocation8 + $0x498] sm:$0xff] }
 0x231   :  { %4089 = vmatprep.subr.bf16.mxu1 %v4484_v7  ;;  %v4532_v7 = vcombine.high %v552_v2, %v556_v3  ;;  %v596_v63 = vld [vmem:[#allocation8 + $0x4b8] sm:$0xff] }
 0x233   :  { %3918 = vmatpush1.bf16.msra.mxu0 %v4481_v12  ;;  %v4529_v12 = vcombine.low %v551_v40, %v555_v42  ;;  %v599_v40 = vld [vmem:[#allocation8 + $0x4d0] sm:$0xff] }
 0x234   :  { %4090 = vmatpush1.bf16.msra.mxu1 %v4483_v13  ;;  %3919 = vmatprep.subr.bf16.mxu0 %v4490_v14  ;;  %v4531_v13 = vcombine.low %v552_v2, %v556_v3  ;;  %v4538_v14 = vcombine.high %v559_v8, %v563_v9  ;;  %v603_v42 = vld [vmem:[#allocation8 + $0x4f0] sm:$0xff]  ;;  %v600_v2 = vld [vmem:[#allocation8 + $0x4d8] sm:$0xff] }
 0x235   :  { %4091 = vmatprep.subr.bf16.mxu1 %v4492_v16  ;;  %v4540_v16 = vcombine.high %v560_v10, %v564_v11  ;;  %v604_v3 = vld [vmem:[#allocation8 + $0x4f8] sm:$0xff] }
 0x237   :  { %3920 = vmatpush1.bf16.msra.mxu0 %v4489_v22  ;;  %v4537_v22 = vcombine.low %v559_v8, %v563_v9  ;;  %v611_v8 = vld [vmem:[#allocation8 + $0x530] sm:$0xff]  ;;  %v608_v9 = vld [vmem:[#allocation8 + $0x518] sm:$0xff] }
 0x238   :  { %4092 = vmatpush1.bf16.msra.mxu1 %v4491_v24  ;;  %3921 = vmatprep.subr.bf16.mxu0 %v4498_v25  ;;  %v4539_v24 = vcombine.low %v560_v10, %v564_v11  ;;  %v4546_v25 = vcombine.high %v567_v17, %v571_v18  ;;  %v612_v10 = vld [vmem:[#allocation8 + $0x538] sm:$0xff]  ;;  %v4579_v11 = vcombine.low %v600_v2, %v604_v3 }
 0x239   :  { %4093 = vmatprep.subr.bf16.mxu1 %v4500_v26  ;;  %v4548_v26 = vcombine.high %v568_v19, %v572_v20 }
 0x23b   :  { %3922 = vmatpush1.bf16.msra.mxu0 %v4497_v32  ;;  %v4545_v32 = vcombine.low %v567_v17, %v571_v18  ;;  %v616_v17 = vld [vmem:[#allocation8 + $0x558] sm:$0xff] }
 0x23c   :  { %4094 = vmatpush1.bf16.msra.mxu1 %v4499_v33  ;;  %3923 = vmatprep.subr.bf16.mxu0 %v4506_v34  ;;  %v4547_v33 = vcombine.low %v568_v19, %v572_v20  ;;  %v4554_v34 = vcombine.high %v575_v27, %v579_v28  ;;  %v620_v18 = vld [vmem:[#allocation8 + $0x578] sm:$0xff]  ;;  %v4587_v20 = vcombine.low %v608_v9, %v612_v10 }
 0x23d   :  { %4095 = vmatprep.subr.bf16.mxu1 %v4508_v39  ;;  %v4556_v39 = vcombine.high %v576_v23, %v580_v30  ;;  %v624_v27 = vld [vmem:[#allocation8 + $0x598] sm:$0xff] }
 0x23e   :  { %v628_v28 = vld [vmem:[#allocation8 + $0x5b8] sm:$0xff] }
 0x23f   :  { %3924 = vmatpush1.bf16.msra.mxu0 %v4505_v54  ;;  %v588_v54 = vld [vmem:[#allocation8 + $0x478] sm:$0xff] }
 0x240   :  { %4096 = vmatpush1.bf16.msra.mxu1 %v4507_v55  ;;  %3925 = vmatprep.subr.bf16.mxu0 %v4514_v58  ;;  %v4555_v55 = vcombine.low %v576_v23, %v580_v30  ;;  %v4562_v58 = vcombine.high %v583_v43, %v587_v44  ;;  %v4564_v61 = vcombine.high %v584_v53, %v588_v54 }
 0x241   :  { %4097 = vmatprep.subr.bf16.mxu1 %v4516_v59  ;;  %v591_v59 = vld [vmem:[#allocation8 + $0x490] sm:$0xff]  ;;  %v4595_v30 = vcombine.low %v616_v17, %v620_v18 }
 0x243   :  { %3926 = vmatpush1.bf16.msra.mxu0 %v4513_v0  ;;  %v4561_v0 = vcombine.low %v583_v43, %v587_v44  ;;  %v632_v43 = vld [vmem:[#allocation8 + $0x5d8] sm:$0xff] }
 0x244   :  { %4098 = vmatpush1.bf16.msra.mxu1 %v4515_v1  ;;  %3927 = vmatprep.subr.bf16.mxu0 %v4522_v36  ;;  %v4563_v1 = vcombine.low %v584_v53, %v588_v54  ;;  %v4570_v36 = vcombine.high %v591_v59, %v595_v60  ;;  %v636_v44 = vld [vmem:[#allocation8 + $0x5f8] sm:$0xff]  ;;  %v4603_v53 = vcombine.low %v624_v27, %v628_v28 }
 0x245   :  { %4099 = vmatprep.subr.bf16.mxu1 %v4524_v38  ;;  %v4572_v38 = vcombine.high %v592_v62, %v596_v63 }
 0x247   :  { %3928 = vmatpush1.bf16.msra.mxu0 %v4521_v4  ;;  %v4569_v4 = vcombine.low %v591_v59, %v595_v60  ;;  %v643_v59 = vld [vmem:[#allocation8 + $0x630] sm:$0xff]  ;;  %v640_v60 = vld [vmem:[#allocation8 + $0x618] sm:$0xff] }
 0x248   :  { %4100 = vmatpush1.bf16.msra.mxu1 %v4523_v5  ;;  %3929 = vmatprep.subr.bf16.mxu0 %v4530_v6  ;;  %v4578_v5 = vcombine.high %v599_v40, %v603_v42  ;;  %v4580_v6 = vcombine.high %v600_v2, %v604_v3 }
 0x249   :  { %4101 = vmatprep.subr.bf16.mxu1 %v4532_v7  ;;  %v607_v7 = vld [vmem:[#allocation8 + $0x510] sm:$0xff] }
 0x24a   :  { %v4585_v19 = vcombine.low %v607_v7, %v611_v8 }
 0x24b   :  { %3930 = vmatpush1.bf16.msra.mxu0 %v4529_v12  ;;  %v4586_v12 = vcombine.high %v607_v7, %v611_v8  ;;  %v656_v7 = vld [vmem:[#allocation8 + $0x698] sm:$0xff] }
 0x24c   :  { %4102 = vmatpush1.bf16.msra.mxu1 %v4531_v13  ;;  %3931 = vmatprep.subr.bf16.mxu0 %v4538_v14  ;;  %v4588_v13 = vcombine.high %v608_v9, %v612_v10  ;;  %v615_v14 = vld [vmem:[#allocation8 + $0x550] sm:$0xff]  ;;  %v660_v8 = vld [vmem:[#allocation8 + $0x6b8] sm:$0xff] }
 0x24d   :  { %4103 = vmatprep.subr.bf16.mxu1 %v4540_v16  ;;  %v619_v16 = vld [vmem:[#allocation8 + $0x570] sm:$0xff] }
 0x24e   :  { %v4593_v23 = vcombine.low %v615_v14, %v619_v16 }
 0x24f   :  { %3932 = vmatpush1.bf16.msra.mxu0 %v4537_v22  ;;  %v4594_v22 = vcombine.high %v615_v14, %v619_v16  ;;  %v664_v14 = vld [vmem:[#allocation8 + $0x6d8] sm:$0xff] }
 0x250   :  { %4104 = vmatpush1.bf16.msra.mxu1 %v4539_v24  ;;  %3933 = vmatprep.subr.bf16.mxu0 %v4546_v25  ;;  %v4596_v24 = vcombine.high %v616_v17, %v620_v18  ;;  %v623_v25 = vld [vmem:[#allocation8 + $0x590] sm:$0xff]  ;;  %v668_v16 = vld [vmem:[#allocation8 + $0x6f8] sm:$0xff]  ;;  %v4635_v18 = vcombine.low %v656_v7, %v660_v8 }
 0x251   :  { %4105 = vmatprep.subr.bf16.mxu1 %v4548_v26  ;;  %v627_v26 = vld [vmem:[#allocation8 + $0x5b0] sm:$0xff] }
 0x253   :  { %3934 = vmatpush1.bf16.msra.mxu0 %v4545_v32  ;;  %v4602_v32 = vcombine.high %v623_v25, %v627_v26 }
 0x254   :  { %4106 = vmatpush1.bf16.msra.mxu1 %v4547_v33  ;;  %3946 = vmatprep.subr.bf16.mxu0 %v4554_v34  ;;  %v4604_v33 = vcombine.high %v624_v27, %v628_v28  ;;  %v631_v34 = vld [vmem:[#allocation8 + $0x5d0] sm:$0xff]  ;;  %v4643_v28 = vcombine.low %v664_v14, %v668_v16 }
 0x255   :  { %4118 = vmatprep.subr.bf16.mxu1 %v4556_v39  ;;  %v635_v39 = vld [vmem:[#allocation8 + $0x5f0] sm:$0xff] }
 0x256   :  { %3936 = vmatmul.mubr.bf16.vlgmr.msra.gmra.mrb[12].mxu0 %v5332_v21  ;;  %v4610_v54 = vcombine.high %v631_v34, %v635_v39 }
 0x257   :  { %4108 = vmatmul.mubr.bf16.vlgmr.msra.gmra.mrb[12].mxu1 %v5332_v21  ;;  %3947 = vmatpush1.bf16.msra.mxu0 %v4553_v51  ;;  %v4571_v21 = vcombine.low %v592_v62, %v596_v63  ;;  %v4601_v51 = vcombine.low %v623_v25, %v627_v26  ;;  %v4609_v62 = vcombine.low %v631_v34, %v635_v39  ;;  %v672_v25 = vld [vmem:[#allocation8 + $0x718] sm:$0xff] }
 0x258   :  { %3978 = vmatprep.mubr.bf16.mxu0 %v5340_v35  ;;  %4119 = vmatpush1.bf16.msra.mxu1 %v4555_v55  ;;  %v4612_v55 = vcombine.high %v632_v43, %v636_v44  ;;  %v4611_v63 = vcombine.low %v632_v43, %v636_v44  ;;  %v676_v26 = vld [vmem:[#allocation8 + $0x738] sm:$0xff] }
 0x259   :  { %4150 = vmatprep.mubr.bf16.mxu1 %v5340_v35  ;;  %3948 = vmatprep.subr.bf16.mxu0 %v4562_v58  ;;  %v4577_v35 = vcombine.low %v599_v40, %v603_v42  ;;  %v639_v58 = vld [vmem:[#allocation8 + $0x610] sm:$0xff]  ;;  %v648_v40 = vld [vmem:[#allocation8 + $0x658] sm:$0xff]  ;;  %v4651_v44 = vcombine.low %v672_v25, %v676_v26 }
 0x25a   :  { %4120 = vmatprep.subr.bf16.mxu1 %v4564_v61  ;;  %v644_v61 = vld [vmem:[#allocation8 + $0x638] sm:$0xff]  ;;  %v4617_v2 = vcombine.low %v639_v58, %v643_v59 }
 0x25b   :  { %3949 = vmatpush1.bf16.msra.mxu0 %v4561_v0  ;;  %v4618_v0 = vcombine.high %v639_v58, %v643_v59  ;;  %v652_v42 = vld [vmem:[#allocation8 + $0x678] sm:$0xff]  ;;  %v4619_v3 = vcombine.low %v640_v60, %v644_v61 }
 0x25c   :  { %4121 = vmatpush1.bf16.msra.mxu1 %v4563_v1  ;;  %3950 = vmatprep.subr.bf16.mxu0 %v4570_v36  ;;  %v4620_v1 = vcombine.high %v640_v60, %v644_v61  ;;  %v647_v36 = vld [vmem:[#allocation8 + $0x650] sm:$0xff]  ;;  %v4627_v10 = vcombine.low %v648_v40, %v652_v42  ;;  %v680_v34 = vld [vmem:[#allocation8 + $0x758] sm:$0xff] }
 0x25d   :  { %4122 = vmatprep.subr.bf16.mxu1 %v4572_v38  ;;  %v651_v38 = vld [vmem:[#allocation8 + $0x670] sm:$0xff]  ;;  %v684_v39 = vld [vmem:[#allocation8 + $0x778] sm:$0xff] }
 0x25e   :  { %v4625_v9 = vcombine.low %v647_v36, %v651_v38  ;;  %v688_v58 = vld [vmem:[#allocation8 + $0x798] sm:$0xff]  ;;  %v4659_v61 = vcombine.low %v680_v34, %v684_v39 }
 0x25f   :  { %3951 = vmatpush1.bf16.msra.mxu0 %v4569_v4  ;;  %v4626_v4 = vcombine.high %v647_v36, %v651_v38  ;;  %v692_v59 = vld [vmem:[#allocation8 + $0x7b8] sm:$0xff] }
 0x260   :  { %4123 = vmatpush1.bf16.msra.mxu1 %v4571_v21  ;;  %3952 = vmatprep.subr.bf16.mxu0 %v4578_v5  ;;  %v4628_v21 = vcombine.high %v648_v40, %v652_v42  ;;  %v655_v5 = vld [vmem:[#allocation8 + $0x690] sm:$0xff]  ;;  %v696_v36 = vld [vmem:[#allocation8 + $0x7d8] sm:$0xff]  ;;  %v4667_v42 = vcombine.low %v688_v58, %v692_v59 }
 0x261   :  { %4124 = vmatprep.subr.bf16.mxu1 %v4580_v6  ;;  %v659_v6 = vld [vmem:[#allocation8 + $0x6b0] sm:$0xff]  ;;  %v700_v38 = vld [vmem:[#allocation8 + $0x7f8] sm:$0xff] }
 0x262   :  { %v4633_v17 = vcombine.low %v655_v5, %v659_v6 }
 0x263   :  { %3953 = vmatpush1.bf16.msra.mxu0 %v4577_v35  ;;  %v4634_v35 = vcombine.high %v655_v5, %v659_v6  ;;  %v704_v5 = vld [vmem:[#allocation8 + $0x818] sm:$0xff] }
 0x264   :  { %4125 = vmatpush1.bf16.msra.mxu1 %v4579_v11  ;;  %3954 = vmatprep.subr.bf16.mxu0 %v4586_v12  ;;  %v4636_v11 = vcombine.high %v656_v7, %v660_v8  ;;  %v663_v12 = vld [vmem:[#allocation8 + $0x6d0] sm:$0xff]  ;;  %v708_v6 = vld [vmem:[#allocation8 + $0x838] sm:$0xff]  ;;  %v4675_v8 = vcombine.low %v696_v36, %v700_v38 }
 0x265   :  { %4126 = vmatprep.subr.bf16.mxu1 %v4588_v13  ;;  %v667_v13 = vld [vmem:[#allocation8 + $0x6f0] sm:$0xff] }
 0x266   :  { %v4641_v27 = vcombine.low %v663_v12, %v667_v13 }
 0x267   :  { %3955 = vmatpush1.bf16.msra.mxu0 %v4585_v19  ;;  %v4642_v19 = vcombine.high %v663_v12, %v667_v13  ;;  %v712_v13 = vld [vmem:[#allocation8 + $0x858] sm:$0xff] }
 0x268   :  { %4127 = vmatpush1.bf16.msra.mxu1 %v4587_v20  ;;  %3956 = vmatprep.subr.bf16.mxu0 %v4594_v22  ;;  %v4644_v20 = vcombine.high %v664_v14, %v668_v16  ;;  %v671_v22 = vld [vmem:[#allocation8 + $0x710] sm:$0xff]  ;;  %v716_v14 = vld [vmem:[#allocation8 + $0x878] sm:$0xff]  ;;  %v4683_v16 = vcombine.low %v704_v5, %v708_v6 }
 0x269   :  { %4128 = vmatprep.subr.bf16.mxu1 %v4596_v24  ;;  %v675_v24 = vld [vmem:[#allocation8 + $0x730] sm:$0xff] }
 0x26a   :  { %v4649_v43 = vcombine.low %v671_v22, %v675_v24 }
 0x26b   :  { %3957 = vmatpush1.bf16.msra.mxu0 %v4593_v23  ;;  %v4650_v23 = vcombine.high %v671_v22, %v675_v24  ;;  %v720_v22 = vld [vmem:[#allocation8 + $0x898] sm:$0xff] }
 0x26c   :  { %4129 = vmatpush1.bf16.msra.mxu1 %v4595_v30  ;;  %3958 = vmatprep.subr.bf16.mxu0 %v4602_v32  ;;  %v4652_v30 = vcombine.high %v672_v25, %v676_v26  ;;  %v679_v32 = vld [vmem:[#allocation8 + $0x750] sm:$0xff]  ;;  %v724_v24 = vld [vmem:[#allocation8 + $0x8b8] sm:$0xff]  ;;  %v4691_v26 = vcombine.low %v712_v13, %v716_v14 }
 0x26d   :  { %4130 = vmatprep.subr.bf16.mxu1 %v4604_v33  ;;  %v683_v33 = vld [vmem:[#allocation8 + $0x770] sm:$0xff] }
 0x26e   :  { %v4657_v60 = vcombine.low %v679_v32, %v683_v33 }
 0x26f   :  { %3959 = vmatpush1.bf16.msra.mxu0 %v4601_v51  ;;  %v4658_v51 = vcombine.high %v679_v32, %v683_v33  ;;  %v728_v32 = vld [vmem:[#allocation8 + $0x8d8] sm:$0xff] }
 0x270   :  { %4131 = vmatpush1.bf16.msra.mxu1 %v4603_v53  ;;  %3960 = vmatprep.subr.bf16.mxu0 %v4610_v54  ;;  %v4660_v53 = vcombine.high %v680_v34, %v684_v39  ;;  %v687_v54 = vld [vmem:[#allocation8 + $0x790] sm:$0xff]  ;;  %v732_v33 = vld [vmem:[#allocation8 + $0x8f8] sm:$0xff] }
 0x271   :  { %4132 = vmatprep.subr.bf16.mxu1 %v4612_v55  ;;  %v691_v55 = vld [vmem:[#allocation8 + $0x7b0] sm:$0xff] }
 0x272   :  { %v4665_v40 = vcombine.low %v687_v54, %v691_v55 }
 0x273   :  { %3961 = vmatpush1.bf16.msra.mxu0 %v4609_v62  ;;  %v4666_v62 = vcombine.high %v687_v54, %v691_v55  ;;  %v740_v54 = vld [vmem:[#allocation8 + $0x938] sm:$0xff]  ;;  %v4707_v55 = vcombine.low %v728_v32, %v732_v33 }
 0x274   :  { %4133 = vmatpush1.bf16.msra.mxu1 %v4611_v63  ;;  %3962 = vmatprep.subr.bf16.mxu0 %v4618_v0  ;;  %v4668_v63 = vcombine.high %v688_v58, %v692_v59  ;;  %v695_v0 = vld [vmem:[#allocation8 + $0x7d0] sm:$0xff] }
 0x275   :  { %4134 = vmatprep.subr.bf16.mxu1 %v4620_v1  ;;  %v699_v1 = vld [vmem:[#allocation8 + $0x7f0] sm:$0xff] }
 0x276   :  { %v4673_v7 = vcombine.low %v695_v0, %v699_v1 }
 0x277   :  { %3963 = vmatpush1.bf16.msra.mxu0 %v4617_v2  ;;  %v4674_v2 = vcombine.high %v695_v0, %v699_v1 }
 0x278   :  { %4135 = vmatpush1.bf16.msra.mxu1 %v4619_v3  ;;  %3964 = vmatprep.subr.bf16.mxu0 %v4626_v4  ;;  %v4676_v3 = vcombine.high %v696_v36, %v700_v38  ;;  %v703_v4 = vld [vmem:[#allocation8 + $0x810] sm:$0xff] }
 0x279   :  { %4136 = vmatprep.subr.bf16.mxu1 %v4628_v21  ;;  %v707_v21 = vld [vmem:[#allocation8 + $0x830] sm:$0xff] }
 0x27a   :  { %v4681_v12 = vcombine.low %v703_v4, %v707_v21 }
 0x27b   :  { %3965 = vmatpush1.bf16.msra.mxu0 %v4625_v9  ;;  %v4682_v9 = vcombine.high %v703_v4, %v707_v21 }
 0x27c   :  { %4137 = vmatpush1.bf16.msra.mxu1 %v4627_v10  ;;  %3966 = vmatprep.subr.bf16.mxu0 %v4634_v35  ;;  %v4684_v10 = vcombine.high %v704_v5, %v708_v6  ;;  %v711_v35 = vld [vmem:[#allocation8 + $0x850] sm:$0xff] }
 0x27d   :  { %4138 = vmatprep.subr.bf16.mxu1 %v4636_v11  ;;  %v715_v11 = vld [vmem:[#allocation8 + $0x870] sm:$0xff] }
 0x27e   :  { %v4689_v25 = vcombine.low %v711_v35, %v715_v11 }
 0x27f   :  { %3967 = vmatpush1.bf16.msra.mxu0 %v4633_v17  ;;  %v4690_v17 = vcombine.high %v711_v35, %v715_v11 }
 0x280   :  { %4139 = vmatpush1.bf16.msra.mxu1 %v4635_v18  ;;  %3968 = vmatprep.subr.bf16.mxu0 %v4642_v19  ;;  %v719_v18 = vld [vmem:[#allocation8 + $0x890] sm:$0xff] }
 0x281   :  { %4140 = vmatprep.subr.bf16.mxu1 %v4644_v20  ;;  %v723_v19 = vld [vmem:[#allocation8 + $0x8b0] sm:$0xff]  ;;  %v4692_v20 = vcombine.high %v712_v13, %v716_v14 }
 0x282   :  { %v4697_v34 = vcombine.low %v719_v18, %v723_v19  ;;  %v767_v14 = vld [vmem:[#allocation8 + $0xa10] sm:$0xff] }
 0x283   :  { %3969 = vmatpush1.bf16.msra.mxu0 %v4641_v27  ;;  %v4698_v27 = vcombine.high %v719_v18, %v723_v19  ;;  %v772_v18 = vld [vmem:[#allocation8 + $0xa38] sm:$0xff] }
 0x284   :  { %4141 = vmatpush1.bf16.msra.mxu1 %v4643_v28  ;;  %3970 = vmatprep.subr.bf16.mxu0 %v4650_v23  ;;  %v4700_v28 = vcombine.high %v720_v22, %v724_v24  ;;  %v727_v23 = vld [vmem:[#allocation8 + $0x8d0] sm:$0xff] }
 0x285   :  { %4142 = vmatprep.subr.bf16.mxu1 %v4652_v30  ;;  %v731_v30 = vld [vmem:[#allocation8 + $0x8f0] sm:$0xff] }
 0x286   :  { %v4706_v39 = vcombine.high %v727_v23, %v731_v30 }
 0x287   :  { %3971 = vmatpush1.bf16.msra.mxu0 %v4649_v43  ;;  %v4708_v43 = vcombine.high %v728_v32, %v732_v33 }
 0x288   :  { %4143 = vmatpush1.bf16.msra.mxu1 %v4651_v44  ;;  %3972 = vmatprep.subr.bf16.mxu0 %v4658_v51  ;;  %v735_v44 = vld [vmem:[#allocation8 + $0x910] sm:$0xff] }
 0x289   :  { %4144 = vmatprep.subr.bf16.mxu1 %v4660_v53  ;;  %v739_v51 = vld [vmem:[#allocation8 + $0x930] sm:$0xff]  ;;  %v736_v53 = vld [vmem:[#allocation8 + $0x918] sm:$0xff] }
 0x28a   :  { %v4714_v58 = vcombine.high %v735_v44, %v739_v51  ;;  %v4716_v59 = vcombine.high %v736_v53, %v740_v54  ;;  %v4713_v0 = vcombine.low %v735_v44, %v739_v51  ;;  %v4715_v1 = vcombine.low %v736_v53, %v740_v54 }
 0x28b   :  { %3973 = vmatpush1.bf16.msra.mxu0 %v4657_v60  ;;  %v743_v60 = vld [vmem:[#allocation8 + $0x950] sm:$0xff] }
 0x28c   :  { %4145 = vmatpush1.bf16.msra.mxu1 %v4659_v61  ;;  %3974 = vmatprep.subr.bf16.mxu0 %v4666_v62  ;;  %v747_v61 = vld [vmem:[#allocation8 + $0x970] sm:$0xff]  ;;  %v744_v62 = vld [vmem:[#allocation8 + $0x958] sm:$0xff] }
 0x28d   :  { %4146 = vmatprep.subr.bf16.mxu1 %v4668_v63  ;;  %v748_v63 = vld [vmem:[#allocation8 + $0x978] sm:$0xff]  ;;  %v4722_v36 = vcombine.high %v743_v60, %v747_v61  ;;  %v4721_v4 = vcombine.low %v743_v60, %v747_v61 }
 0x28e   :  { %v4724_v38 = vcombine.high %v744_v62, %v748_v63  ;;  %v4723_v21 = vcombine.low %v744_v62, %v748_v63 }
 0x28f   :  { %3975 = vmatpush1.bf16.msra.mxu0 %v4665_v40  ;;  %v751_v40 = vld [vmem:[#allocation8 + $0x990] sm:$0xff] }
 0x290   :  { %4147 = vmatpush1.bf16.msra.mxu1 %v4667_v42  ;;  %3976 = vmatprep.subr.bf16.mxu0 %v4674_v2  ;;  %v755_v42 = vld [vmem:[#allocation8 + $0x9b0] sm:$0xff]  ;;  %v752_v2 = vld [vmem:[#allocation8 + $0x998] sm:$0xff] }
 0x291   :  { %4148 = vmatprep.subr.bf16.mxu1 %v4676_v3  ;;  %v756_v3 = vld [vmem:[#allocation8 + $0x9b8] sm:$0xff]  ;;  %v4730_v5 = vcombine.high %v751_v40, %v755_v42  ;;  %v4729_v35 = vcombine.low %v751_v40, %v755_v42 }
 0x292   :  { %v4732_v6 = vcombine.high %v752_v2, %v756_v3  ;;  %v4731_v11 = vcombine.low %v752_v2, %v756_v3 }
 0x293   :  { %3977 = vmatpush1.bf16.msra.mxu0 %v4673_v7  ;;  %v759_v7 = vld [vmem:[#allocation8 + $0x9d0] sm:$0xff] }
 0x294   :  { %4149 = vmatpush1.bf16.msra.mxu1 %v4675_v8  ;;  %3989 = vmatprep.subr.bf16.mxu0 %v4682_v9  ;;  %v763_v8 = vld [vmem:[#allocation8 + $0x9f0] sm:$0xff]  ;;  %v760_v9 = vld [vmem:[#allocation8 + $0x9d8] sm:$0xff] }
 0x295   :  { %4161 = vmatprep.subr.bf16.mxu1 %v4684_v10  ;;  %v764_v10 = vld [vmem:[#allocation8 + $0x9f8] sm:$0xff]  ;;  %v4737_v19 = vcombine.low %v759_v7, %v763_v8 }
 0x296   :  { %3979 = vmatmul.mubr.bf16.vlgmr.msra.gmra.mrb[12].mxu0 %v5336_v29  ;;  %v4740_v13 = vcombine.high %v760_v9, %v764_v10 }
 0x297   :  { %4151 = vmatmul.mubr.bf16.vlgmr.msra.gmra.mrb[12].mxu1 %v5336_v29  ;;  %3990 = vmatpush1.bf16.msra.mxu0 %v4681_v12  ;;  %v4699_v29 = vcombine.low %v720_v22, %v724_v24  ;;  %v4738_v12 = vcombine.high %v759_v7, %v763_v8 }
 0x298   :  { %4021 = vmatprep.mubr.bf16.mxu0 %v5354_v41  ;;  %4162 = vmatpush1.bf16.msra.mxu1 %v4683_v16  ;;  %v771_v16 = vld [vmem:[#allocation8 + $0xa30] sm:$0xff] }
 0x299   :  { %4193 = vmatprep.mubr.bf16.mxu1 %v5354_v41  ;;  %3991 = vmatprep.subr.bf16.mxu0 %v4690_v17  ;;  %v4705_v41 = vcombine.low %v727_v23, %v731_v30  ;;  %v768_v17 = vld [vmem:[#allocation8 + $0xa18] sm:$0xff]  ;;  %v4746_v22 = vcombine.high %v767_v14, %v771_v16  ;;  %v4745_v23 = vcombine.low %v767_v14, %v771_v16 }
 0x29a   :  { %4163 = vmatprep.subr.bf16.mxu1 %v4692_v20  ;;  %v4739_v20 = vcombine.low %v760_v9, %v764_v10  ;;  %v4748_v24 = vcombine.high %v768_v17, %v772_v18  ;;  %v4747_v30 = vcombine.low %v768_v17, %v772_v18 }
 0x29b   :  { %3992 = vmatpush1.bf16.msra.mxu0 %v4689_v25  ;;  %v775_v25 = vld [vmem:[#allocation8 + $0xa50] sm:$0xff] }
 0x29c   :  { %4164 = vmatpush1.bf16.msra.mxu1 %v4691_v26  ;;  %3993 = vmatprep.subr.bf16.mxu0 %v4698_v27  ;;  %v779_v26 = vld [vmem:[#allocation8 + $0xa70] sm:$0xff]  ;;  %v776_v27 = vld [vmem:[#allocation8 + $0xa58] sm:$0xff] }
 0x29d   :  { %4165 = vmatprep.subr.bf16.mxu1 %v4700_v28  ;;  %v780_v28 = vld [vmem:[#allocation8 + $0xa78] sm:$0xff]  ;;  %v4754_v32 = vcombine.high %v775_v25, %v779_v26  ;;  %v4753_v44 = vcombine.low %v775_v25, %v779_v26 }
 0x29e   :  { %v4756_v33 = vcombine.high %v776_v27, %v780_v28  ;;  %v4755_v51 = vcombine.low %v776_v27, %v780_v28 }
 0x29f   :  { %3994 = vmatpush1.bf16.msra.mxu0 %v4697_v34  ;;  %v783_v34 = vld [vmem:[#allocation8 + $0xa90] sm:$0xff] }
 0x2a0   :  { %4166 = vmatpush1.bf16.msra.mxu1 %v4699_v29  ;;  %3995 = vmatprep.subr.bf16.mxu0 %v4706_v39  ;;  %v787_v29 = vld [vmem:[#allocation8 + $0xab0] sm:$0xff]  ;;  %v784_v39 = vld [vmem:[#allocation8 + $0xa98] sm:$0xff] }
 0x2a1   :  { %4167 = vmatprep.subr.bf16.mxu1 %v4708_v43  ;;  %v788_v43 = vld [vmem:[#allocation8 + $0xab8] sm:$0xff]  ;;  %v4762_v53 = vcombine.high %v783_v34, %v787_v29  ;;  %v4761_v60 = vcombine.low %v783_v34, %v787_v29 }
 0x2a2   :  { %v4764_v54 = vcombine.high %v784_v39, %v788_v43  ;;  %v4763_v61 = vcombine.low %v784_v39, %v788_v43 }
 0x2a3   :  { %3996 = vmatpush1.bf16.msra.mxu0 %v4705_v41  ;;  %v791_v41 = vld [vmem:[#allocation8 + $0xad0] sm:$0xff] }
 0x2a4   :  { %4168 = vmatpush1.bf16.msra.mxu1 %v4707_v55  ;;  %3997 = vmatprep.subr.bf16.mxu0 %v4714_v58  ;;  %v795_v55 = vld [vmem:[#allocation8 + $0xaf0] sm:$0xff]  ;;  %v792_v58 = vld [vmem:[#allocation8 + $0xad8] sm:$0xff] }
 0x2a5   :  { %4169 = vmatprep.subr.bf16.mxu1 %v4716_v59  ;;  %v796_v59 = vld [vmem:[#allocation8 + $0xaf8] sm:$0xff]  ;;  %v4770_v62 = vcombine.high %v791_v41, %v795_v55  ;;  %v4769_v40 = vcombine.low %v791_v41, %v795_v55 }
 0x2a6   :  { %v4772_v63 = vcombine.high %v792_v58, %v796_v59  ;;  %v4771_v42 = vcombine.low %v792_v58, %v796_v59  ;;  %v844_v41 = vld [vmem:[#allocation8 + $0xc78] sm:$0xff]  ;;  %v847_v59 = vld [vmem:[#allocation8 + $0xc90] sm:$0xff] }
 0x2a7   :  { %3998 = vmatpush1.bf16.msra.mxu0 %v4713_v0  ;;  %v799_v0 = vld [vmem:[#allocation8 + $0xb10] sm:$0xff] }
 0x2a8   :  { %4170 = vmatpush1.bf16.msra.mxu1 %v4715_v1  ;;  %3999 = vmatprep.subr.bf16.mxu0 %v4722_v36  ;;  %v803_v1 = vld [vmem:[#allocation8 + $0xb30] sm:$0xff]  ;;  %v800_v36 = vld [vmem:[#allocation8 + $0xb18] sm:$0xff] }
 0x2a9   :  { %4171 = vmatprep.subr.bf16.mxu1 %v4724_v38  ;;  %v804_v38 = vld [vmem:[#allocation8 + $0xb38] sm:$0xff]  ;;  %v4778_v2 = vcombine.high %v799_v0, %v803_v1  ;;  %v4777_v7 = vcombine.low %v799_v0, %v803_v1 }
 0x2aa   :  { %v4780_v3 = vcombine.high %v800_v36, %v804_v38  ;;  %v4779_v8 = vcombine.low %v800_v36, %v804_v38 }
 0x2ab   :  { %4000 = vmatpush1.bf16.msra.mxu0 %v4721_v4  ;;  %v807_v4 = vld [vmem:[#allocation8 + $0xb50] sm:$0xff] }
 0x2ac   :  { %4172 = vmatpush1.bf16.msra.mxu1 %v4723_v21  ;;  %4001 = vmatprep.subr.bf16.mxu0 %v4730_v5  ;;  %v811_v21 = vld [vmem:[#allocation8 + $0xb70] sm:$0xff]  ;;  %v808_v5 = vld [vmem:[#allocation8 + $0xb58] sm:$0xff] }
 0x2ad   :  { %4173 = vmatprep.subr.bf16.mxu1 %v4732_v6  ;;  %v812_v6 = vld [vmem:[#allocation8 + $0xb78] sm:$0xff]  ;;  %v4786_v9 = vcombine.high %v807_v4, %v811_v21  ;;  %v4785_v14 = vcombine.low %v807_v4, %v811_v21 }
 0x2ae   :  { %v4788_v10 = vcombine.high %v808_v5, %v812_v6  ;;  %v4787_v16 = vcombine.low %v808_v5, %v812_v6  ;;  %v863_v6 = vld [vmem:[#allocation8 + $0xd10] sm:$0xff] }
 0x2af   :  { %4002 = vmatpush1.bf16.msra.mxu0 %v4729_v35  ;;  %v815_v35 = vld [vmem:[#allocation8 + $0xb90] sm:$0xff] }
 0x2b0   :  { %4174 = vmatpush1.bf16.msra.mxu1 %v4731_v11  ;;  %4003 = vmatprep.subr.bf16.mxu0 %v4738_v12  ;;  %v819_v11 = vld [vmem:[#allocation8 + $0xbb0] sm:$0xff]  ;;  %v816_v12 = vld [vmem:[#allocation8 + $0xb98] sm:$0xff] }
 0x2b1   :  { %4175 = vmatprep.subr.bf16.mxu1 %v4740_v13  ;;  %v820_v13 = vld [vmem:[#allocation8 + $0xbb8] sm:$0xff]  ;;  %v4794_v17 = vcombine.high %v815_v35, %v819_v11  ;;  %v4793_v25 = vcombine.low %v815_v35, %v819_v11 }
 0x2b2   :  { %v4796_v18 = vcombine.high %v816_v12, %v820_v13  ;;  %v4795_v26 = vcombine.low %v816_v12, %v820_v13 }
 0x2b3   :  { %4004 = vmatpush1.bf16.msra.mxu0 %v4737_v19  ;;  %v823_v19 = vld [vmem:[#allocation8 + $0xbd0] sm:$0xff] }
 0x2b4   :  { %4176 = vmatpush1.bf16.msra.mxu1 %v4739_v20  ;;  %4005 = vmatprep.subr.bf16.mxu0 %v4746_v22  ;;  %v827_v20 = vld [vmem:[#allocation8 + $0xbf0] sm:$0xff]  ;;  %v824_v22 = vld [vmem:[#allocation8 + $0xbd8] sm:$0xff] }
 0x2b5   :  { %4177 = vmatprep.subr.bf16.mxu1 %v4748_v24  ;;  %v828_v24 = vld [vmem:[#allocation8 + $0xbf8] sm:$0xff]  ;;  %v4802_v27 = vcombine.high %v823_v19, %v827_v20  ;;  %v4801_v34 = vcombine.low %v823_v19, %v827_v20  ;;  %v5396_v20 = vld [vmem:[#allocation10] sm:$0xff] }
 0x2b6   :  { %v4804_v28 = vcombine.high %v824_v22, %v828_v24  ;;  %v4803_v29 = vcombine.low %v824_v22, %v828_v24 }
 0x2b7   :  { %4006 = vmatpush1.bf16.msra.mxu0 %v4745_v23  ;;  %v831_v23 = vld [vmem:[#allocation8 + $0xc10] sm:$0xff] }
 0x2b8   :  { %4178 = vmatpush1.bf16.msra.mxu1 %v4747_v30  ;;  %4007 = vmatprep.subr.bf16.mxu0 %v4754_v32  ;;  %v835_v30 = vld [vmem:[#allocation8 + $0xc30] sm:$0xff]  ;;  %v832_v32 = vld [vmem:[#allocation8 + $0xc18] sm:$0xff] }
 0x2b9   :  { %4179 = vmatprep.subr.bf16.mxu1 %v4756_v33  ;;  %v836_v33 = vld [vmem:[#allocation8 + $0xc38] sm:$0xff]  ;;  %v4810_v39 = vcombine.high %v831_v23, %v835_v30 }
 0x2ba   :  { %v4812_v43 = vcombine.high %v832_v32, %v836_v33  ;;  %v4811_v55 = vcombine.low %v832_v32, %v836_v33  ;;  %v962_v32 = vrot.slane %v5396_v20, %v5304_v46  ;;  %v970_v33 = vrot.slane %v5396_v20, %v5310_v49 }
 0x2bb   :  { %4008 = vmatpush1.bf16.msra.mxu0 %v4753_v44  ;;  %v839_v44 = vld [vmem:[#allocation8 + $0xc50] sm:$0xff] }
 0x2bc   :  { %4180 = vmatpush1.bf16.msra.mxu1 %v4755_v51  ;;  %4009 = vmatprep.subr.bf16.mxu0 %v4762_v53  ;;  %v843_v51 = vld [vmem:[#allocation8 + $0xc70] sm:$0xff]  ;;  %v4809_v53 = vcombine.low %v831_v23, %v835_v30 }
 0x2bd   :  { %4181 = vmatprep.subr.bf16.mxu1 %v4764_v54  ;;  %v840_v54 = vld [vmem:[#allocation8 + $0xc58] sm:$0xff]  ;;  %v4818_v58 = vcombine.high %v839_v44, %v843_v51  ;;  %v4817_v0 = vcombine.low %v839_v44, %v843_v51  ;;  %v5401_v23 = vld [vmem:[#allocation8 + $0xd90] sm:$0xff]  ;;  %v974_v44 = vrot.slane %v5396_v20, %v139_v50 }
 0x2be   :  { %v4819_v1 = vcombine.low %v840_v54, %v844_v41  ;;  %v5403_v30 = vld [vmem:[#allocation8 + $0xdb0] sm:$0xff] }
 0x2bf   :  { %4010 = vmatpush1.bf16.msra.mxu0 %v4761_v60  ;;  %v851_v60 = vld [vmem:[#allocation8 + $0xcb0] sm:$0xff] }
 0x2c0   :  { %4182 = vmatpush1.bf16.msra.mxu1 %v4763_v61  ;;  %4011 = vmatprep.subr.bf16.mxu0 %v4770_v62  ;;  %v4820_v61 = vcombine.high %v840_v54, %v844_v41  ;;  %v848_v62 = vld [vmem:[#allocation8 + $0xc98] sm:$0xff]  ;;  %v4826_v36 = vcombine.high %v847_v59, %v851_v60  ;;  %v4825_v4 = vcombine.low %v847_v59, %v851_v60  ;;  %v5418_v41 = vld [vmem:[#allocation8 + $0xdd0] sm:$0xff] }
 0x2c1   :  { %4183 = vmatprep.subr.bf16.mxu1 %v4772_v63  ;;  %v852_v63 = vld [vmem:[#allocation8 + $0xcb8] sm:$0xff]  ;;  %v4858_v54 = vcombine.high %v5401_v23, %v5403_v30 }
 0x2c2   :  { %v4828_v38 = vcombine.high %v848_v62, %v852_v63 }
 0x2c3   :  { %4012 = vmatpush1.bf16.msra.mxu0 %v4769_v40  ;;  %v855_v40 = vld [vmem:[#allocation8 + $0xcd0] sm:$0xff] }
 0x2c4   :  { %4184 = vmatpush1.bf16.msra.mxu1 %v4771_v42  ;;  %4013 = vmatprep.subr.bf16.mxu0 %v4778_v2  ;;  %v859_v42 = vld [vmem:[#allocation8 + $0xcf0] sm:$0xff]  ;;  %v856_v2 = vld [vmem:[#allocation8 + $0xcd8] sm:$0xff] }
 0x2c5   :  { %4185 = vmatprep.subr.bf16.mxu1 %v4780_v3  ;;  %v860_v3 = vld [vmem:[#allocation8 + $0xcf8] sm:$0xff]  ;;  %v4834_v21 = vcombine.high %v855_v40, %v859_v42 }
 0x2c6   :  { %v4836_v5 = vcombine.high %v856_v2, %v860_v3  ;;  %v4835_v35 = vcombine.low %v856_v2, %v860_v3 }
 0x2c7   :  { %4014 = vmatpush1.bf16.msra.mxu0 %v4777_v7  ;;  %v867_v7 = vld [vmem:[#allocation8 + $0xd30] sm:$0xff] }
 0x2c8   :  { %4186 = vmatpush1.bf16.msra.mxu1 %v4779_v8  ;;  %4015 = vmatprep.subr.bf16.mxu0 %v4786_v9  ;;  %v864_v8 = vld [vmem:[#allocation8 + $0xd18] sm:$0xff]  ;;  %v4842_v11 = vcombine.high %v863_v6, %v867_v7  ;;  %v4841_v19 = vcombine.low %v863_v6, %v867_v7 }
 0x2c9   :  { %4187 = vmatprep.subr.bf16.mxu1 %v4788_v10  ;;  %v868_v9 = vld [vmem:[#allocation8 + $0xd38] sm:$0xff]  ;;  %v4833_v10 = vcombine.low %v855_v40, %v859_v42  ;;  %v4857_v42 = vcombine.low %v5401_v23, %v5403_v30 }
 0x2ca   :  { %v4844_v12 = vcombine.high %v864_v8, %v868_v9  ;;  %v4843_v22 = vcombine.low %v864_v8, %v868_v9 }
 0x2cb   :  { %4016 = vmatpush1.bf16.msra.mxu0 %v4785_v14  ;;  %v871_v14 = vld [vmem:[#allocation8 + $0xd50] sm:$0xff] }
 0x2cc   :  { %4188 = vmatpush1.bf16.msra.mxu1 %v4787_v16  ;;  %4017 = vmatprep.subr.bf16.mxu0 %v4794_v17  ;;  %v875_v16 = vld [vmem:[#allocation8 + $0xd70] sm:$0xff]  ;;  %v872_v17 = vld [vmem:[#allocation8 + $0xd58] sm:$0xff] }
 0x2cd   :  { %4189 = vmatprep.subr.bf16.mxu1 %v4796_v18  ;;  %v876_v18 = vld [vmem:[#allocation8 + $0xd78] sm:$0xff]  ;;  %v4850_v24 = vcombine.high %v871_v14, %v875_v16  ;;  %v4849_v51 = vcombine.low %v871_v14, %v875_v16 }
 0x2cf   :  { %4018 = vmatpush1.bf16.msra.mxu0 %v4793_v25 }
 0x2d0   :  { %4190 = vmatpush1.bf16.msra.mxu1 %v4795_v26  ;;  %4019 = vmatprep.subr.bf16.mxu0 %v4802_v27 }
 0x2d1   :  { %4191 = vmatprep.subr.bf16.mxu1 %v4804_v28  ;;  %v4852_v28 = vcombine.high %v872_v17, %v876_v18 }
 0x2d3   :  { %4020 = vmatpush1.bf16.msra.mxu0 %v4801_v34 }
 0x2d4   :  { %4192 = vmatpush1.bf16.msra.mxu1 %v4803_v29  ;;  %4032 = vmatprep.subr.bf16.mxu0 %v4810_v39  ;;  %v880_v29 = vld [vmem:[#allocation8 + $0xd98] sm:$0xff] }
 0x2d5   :  { %4204 = vmatprep.subr.bf16.mxu1 %v4812_v43  ;;  %v884_v39 = vld [vmem:[#allocation8 + $0xdb8] sm:$0xff]  ;;  %v966_v43 = vrot.slane %v5396_v20, %v131_v48 }
 0x2d6   :  { %4022 = vmatmul.mubr.bf16.vlgmr.msra.gmra.mrb[12].mxu0 %v5352_v37  ;;  %v4860_v50 = vcombine.high %v880_v29, %v884_v39 }
 0x2d7   :  { %4194 = vmatmul.mubr.bf16.vlgmr.msra.gmra.mrb[12].mxu1 %v5352_v37  ;;  %4033 = vmatpush1.bf16.msra.mxu0 %v4809_v53  ;;  %v4827_v37 = vcombine.low %v848_v62, %v852_v63  ;;  %v4851_v53 = vcombine.low %v872_v17, %v876_v18  ;;  %v888_v62 = vld [vmem:[#allocation8 + $0xdd8] sm:$0xff]  ;;  %v899_v17 = vld [vmem:[#allocation8 + $0xe30] sm:$0xff] }
 0x2d8   :  { %4064 = vmatprep.mubr.bf16.mxu0 %v5367_v15  ;;  %4205 = vmatpush1.bf16.msra.mxu1 %v4811_v55  ;;  %v5420_v55 = vld [vmem:[#allocation8 + $0xdf0] sm:$0xff]  ;;  %v892_v63 = vld [vmem:[#allocation8 + $0xdf8] sm:$0xff] }
 0x2d9   :  { %4236 = vmatprep.mubr.bf16.mxu1 %v5367_v15  ;;  %4034 = vmatprep.subr.bf16.mxu0 %v4818_v58  ;;  %v5393_v15 = vld [vmem:[#allocation11] sm:$0xff]  ;;  %v896_v18 = vld [vmem:[#allocation8 + $0xe18] sm:$0xff] }
 0x2da   :  { %4206 = vmatprep.subr.bf16.mxu1 %v4820_v61  ;;  %v4264_v13 = vunpack.c.l.bf16 %v5393_v15 }
 0x2db   :  { %4035 = vmatpush1.bf16.msra.mxu0 %v4817_v0 }
 0x2dc   :  { %4207 = vmatpush1.bf16.msra.mxu1 %v4819_v1  ;;  %4036 = vmatprep.subr.bf16.mxu0 %v4826_v36  ;;  %v4271_v25 = vrot.slane %v4264_v13, %v5304_v46  ;;  %v4279_v26 = vrot.slane %v4264_v13, %v5324_v56  ;;  %v4275_v27 = vrot.slane %v4264_v13, %v5310_v49 }
 0x2dd   :  { %4208 = vmatprep.subr.bf16.mxu1 %v4828_v38  ;;  %v4283_v34 = vrot.slane %v4264_v13, %v5357_v31 }
 0x2de   :  { %v4311_v59 = vrot.slane %v4271_v25, %v5304_v46  ;;  %v4319_v48 = vrot.slane %v4279_v26, %v5304_v46  ;;  %v4315_v61 = vrot.slane %v4275_v27, %v5304_v46  ;;  %v4865_v25 = vcombine.low %v5418_v41, %v5420_v55 }
 0x2df   :  { %4037 = vmatpush1.bf16.msra.mxu0 %v4825_v4  ;;  %v4323_v40 = vrot.slane %v4283_v34, %v5304_v46  ;;  %v4867_v26 = vcombine.low %v888_v62, %v892_v63 }
 0x2e0   :  { %4209 = vmatpush1.bf16.msra.mxu1 %v4827_v37  ;;  %4038 = vmatprep.subr.bf16.mxu0 %v4834_v21  ;;  %v4859_v21 = vcombine.low %v880_v29, %v884_v39 }
 0x2e1   :  { %4210 = vmatprep.subr.bf16.mxu1 %v4836_v5  ;;  %v4866_v5 = vcombine.high %v5418_v41, %v5420_v55  ;;  %v904_v41 = vld [vmem:[#allocation8 + $0xe58] sm:$0xff] }
 0x2e2   :  { %v908_v55 = vld [vmem:[#allocation8 + $0xe78] sm:$0xff] }
 0x2e3   :  { %4039 = vmatpush1.bf16.msra.mxu0 %v4833_v10 }
 0x2e4   :  { %4211 = vmatpush1.bf16.msra.mxu1 %v4835_v35  ;;  %4040 = vmatprep.subr.bf16.mxu0 %v4842_v11  ;;  %v4868_v35 = vcombine.high %v888_v62, %v892_v63  ;;  %v895_v11 = vld [vmem:[#allocation8 + $0xe10] sm:$0xff] }
 0x2e5   :  { %4212 = vmatprep.subr.bf16.mxu1 %v4844_v12 }
 0x2e7   :  { %4041 = vmatpush1.bf16.msra.mxu0 %v4841_v19  ;;  %v900_v19 = vld [vmem:[#allocation8 + $0xe38] sm:$0xff] }
 0x2e8   :  { %4213 = vmatpush1.bf16.msra.mxu1 %v4843_v22  ;;  %4042 = vmatprep.subr.bf16.mxu0 %v4850_v24  ;;  %v4876_v34 = vcombine.high %v896_v18, %v900_v19 }
 0x2e9   :  { %v3722_v58 = vpop.f32.mrb[8].mxu0  ;;  %v3894_v60 = vpop.f32.mrb[8].mxu1  ;;  %4214 = vmatprep.subr.bf16.mxu1 %v4852_v28 }
 0x2ea   :  { %v4935_v0 = vadd.f32 %v3722_v58, %v962_v32  ;;  %v4939_v1 = vadd.f32 %v3894_v60, %v970_v33  ;;  %v3724_v36 = vpop.f32.mrb[9].mxu0  ;;  %v3896_v38 = vpop.f32.mrb[9].mxu1 }
 0x2eb   :  { %v4936_v2 = vadd.f32 %v3724_v36, %v966_v43  ;;  %v4940_v3 = vadd.f32 %v3896_v38, %v974_v44  ;;  %v3726_v4 = vpop.f32.mrb[10].mxu0  ;;  %v3898_v37 = vpop.f32.mrb[10].mxu1  ;;  %4043 = vmatpush1.bf16.msra.mxu0 %v4849_v51  ;;  %v903_v51 = vld [vmem:[#allocation8 + $0xe50] sm:$0xff]  ;;  %v4884_v36 = vcombine.high %v904_v41, %v908_v55 }
 0x2ec   :  { %v4247_v6 = vmax.f32 %v4935_v0, 0.0  ;;  %v4937_v7 = vadd.f32 %v3726_v4, %v962_v32  ;;  %v4941_v8 = vadd.f32 %v3898_v37, %v970_v33  ;;  %4215 = vmatpush1.bf16.msra.mxu1 %v4851_v53  ;;  %v3728_v9 = vpop.f32.mrb[11].mxu0  ;;  %v3900_v10 = vpop.f32.mrb[11].mxu1  ;;  %4044 = vmatprep.subr.bf16.mxu0 %v4858_v54  ;;  %v4249_v12 = vmax.f32 %v4939_v1, 0.0  ;;  %v907_v53 = vld [vmem:[#allocation8 + $0xe70] sm:$0xff] }
 0x2ed   :  { %v4248_v13 = vmax.f32 %v4936_v2, 0.0  ;;  %v4938_v14 = vadd.f32 %v3728_v9, %v966_v43  ;;  %v4942_v16 = vadd.f32 %v3900_v10, %v974_v44  ;;  %4216 = vmatprep.subr.bf16.mxu1 %v4860_v50  ;;  %v4250_v28 = vmax.f32 %v4940_v3, 0.0  ;;  %v911_v38 = vld [vmem:[#allocation8 + $0xe90] sm:$0xff]  ;;  %v912_v2 = vld [vmem:[#allocation8 + $0xe98] sm:$0xff] }
 0x2ee   :  { %v4340_v22 = vmul.f32 %v4311_v59, %v4247_v6  ;;  %v4255_v24 = vmax.f32 %v4937_v7, 0.0  ;;  %v4257_v23 = vmax.f32 %v4941_v8, 0.0  ;;  %v4874_v33 = vcombine.high %v895_v11, %v899_v17  ;;  %v916_v3 = vld [vmem:[#allocation8 + $0xeb8] sm:$0xff]  ;;  %v919_v6 = vld [vmem:[#allocation8 + $0xed0] sm:$0xff] }
 0x2ef   :  { %v4341_v27 = vmul.f32 %v4315_v61, %v4248_v13  ;;  %v4256_v30 = vmax.f32 %v4938_v14, 0.0  ;;  %4045 = vmatpush1.bf16.msra.mxu0 %v4857_v42  ;;  %v4342_v29 = vmul.f32 %v4319_v48, %v4249_v12  ;;  %v4258_v44 = vmax.f32 %v4942_v16, 0.0  ;;  %v915_v42 = vld [vmem:[#allocation8 + $0xeb0] sm:$0xff]  ;;  %v924_v8 = vld [vmem:[#allocation8 + $0xef8] sm:$0xff] }
 0x2f0   :  { %v4348_v32 = vmul.f32 %v4311_v59, %v4255_v24  ;;  %4217 = vmatpush1.bf16.msra.mxu1 %v4859_v21  ;;  %4046 = vmatprep.subr.bf16.mxu0 %v4866_v5  ;;  %v4873_v54 = vcombine.low %v895_v11, %v899_v17  ;;  %v4343_v58 = vmul.f32 %v4323_v40, %v4250_v28  ;;  %v923_v7 = vld [vmem:[#allocation8 + $0xef0] sm:$0xff]  ;;  %v928_v14 = vld [vmem:[#allocation8 + $0xf18] sm:$0xff] }
 0x2f1   :  { %v4356_v39 = vadd.f32 %v4341_v27, %v4340_v22  ;;  %v4349_v43 = vmul.f32 %v4315_v61, %v4256_v30  ;;  %4218 = vmatprep.subr.bf16.mxu1 %v4868_v35  ;;  %v4350_v50 = vmul.f32 %v4319_v48, %v4257_v23  ;;  %v4875_v59 = vcombine.low %v896_v18, %v900_v19  ;;  %v927_v12 = vld [vmem:[#allocation8 + $0xf10] sm:$0xff]  ;;  %v932_v16 = vld [vmem:[#allocation8 + $0xf38] sm:$0xff] }
 0x2f2   :  { %v4882_v63 = vcombine.high %v903_v51, %v907_v53  ;;  %v4351_v1 = vmul.f32 %v4323_v40, %v4258_v44  ;;  %v4881_v48 = vcombine.low %v903_v51, %v907_v53  ;;  %v4883_v37 = vcombine.low %v904_v41, %v908_v55  ;;  %v920_v40 = vld [vmem:[#allocation8 + $0xed8] sm:$0xff]  ;;  %v931_v13 = vld [vmem:[#allocation8 + $0xf30] sm:$0xff] }
 0x2f3   :  { %v4357_v60 = vadd.f32 %v4356_v39, %v4342_v29  ;;  %v4365_v62 = vadd.f32 %v4349_v43, %v4348_v32  ;;  %4047 = vmatpush1.bf16.msra.mxu0 %v4865_v25  ;;  %v4890_v21 = vcombine.high %v911_v38, %v915_v42  ;;  %v4892_v5 = vcombine.high %v912_v2, %v916_v3  ;;  %v935_v24 = vld [vmem:[#allocation8 + $0xf50] sm:$0xff]  ;;  %v940_v27 = vld [vmem:[#allocation8 + $0xf78] sm:$0xff] }
 0x2f4   :  { %4219 = vmatpush1.bf16.msra.mxu1 %v4867_v26  ;;  %4048 = vmatprep.subr.bf16.mxu0 %v4874_v33  ;;  %v4889_v9 = vcombine.low %v911_v38, %v915_v42  ;;  %v4891_v10 = vcombine.low %v912_v2, %v916_v3  ;;  %v4898_v35 = vcombine.high %v919_v6, %v923_v7  ;;  %v939_v25 = vld [vmem:[#allocation8 + $0xf70] sm:$0xff]  ;;  %v936_v26 = vld [vmem:[#allocation8 + $0xf58] sm:$0xff] }
 0x2f5   :  { %v5432_v0 = vadd.f32 %v4357_v60, %v4343_v58  ;;  %v4366_v61 = vadd.f32 %v4365_v62, %v4350_v50  ;;  %4220 = vmatprep.subr.bf16.mxu1 %v4876_v34  ;;  %v4900_v11 = vcombine.high %v920_v40, %v924_v8  ;;  %v4897_v17 = vcombine.low %v919_v6, %v923_v7  ;;  %v943_v33 = vld [vmem:[#allocation8 + $0xf90] sm:$0xff]  ;;  %v944_v29 = vld [vmem:[#allocation8 + $0xf98] sm:$0xff] }
 0x2f6   :  { %v4899_v18 = vcombine.low %v920_v40, %v924_v8  ;;  %v4906_v19 = vcombine.high %v927_v12, %v931_v13  ;;  %v4908_v22 = vcombine.high %v928_v14, %v932_v16  ;;  %v4905_v28 = vcombine.low %v927_v12, %v931_v13  ;;  %v947_v34 = vld [vmem:[#allocation8 + $0xfb0] sm:$0xff]  ;;  %v948_v39 = vld [vmem:[#allocation8 + $0xfb8] sm:$0xff] }
 0x2f7   :  { %v5434_v4 = vadd.f32 %v4366_v61, %v4351_v1  ;;  %4049 = vmatpush1.bf16.msra.mxu0 %v4873_v54  ;;  %v4907_v23 = vcombine.low %v928_v14, %v932_v16  ;;  %v4914_v30 = vcombine.high %v935_v24, %v939_v25  ;;  %v4916_v32 = vcombine.high %v936_v26, %v940_v27  ;;  %v951_v54 = vld [vmem:[#allocation8 + $0xfd0] sm:$0xff]  ;;  %v952_v55 = vld [vmem:[#allocation8 + $0xfd8] sm:$0xff] }
 0x2f8   :  { %4221 = vmatpush1.bf16.msra.mxu1 %v4875_v59  ;;  %4050 = vmatprep.subr.bf16.mxu0 %v4882_v63  ;;  %v4913_v43 = vcombine.low %v935_v24, %v939_v25  ;;  %v4915_v44 = vcombine.low %v936_v26, %v940_v27  ;;  %v4922_v51 = vcombine.high %v943_v33, %v947_v34  ;;  %v955_v41 = vld [vmem:[#allocation8 + $0xff0] sm:$0xff]  ;;  %v956_v58 = vld [vmem:[#allocation8 + $0xff8] sm:$0xff]  ;;  %v4265_v61 = vunpack.c.h.bf16 %v5393_v15 }
 0x2f9   :  { %4222 = vmatprep.subr.bf16.mxu1 %v4884_v36  ;;  %v4924_v53 = vcombine.high %v944_v29, %v948_v39  ;;  %v4921_v60 = vcombine.low %v943_v33, %v947_v34  ;;  %v4923_v50 = vcombine.low %v944_v29, %v948_v39  ;;  %v4930_v62 = vcombine.high %v951_v54, %v955_v41 }
 0x2fa   :  { %v4932_v59 = vcombine.high %v952_v55, %v956_v58  ;;  %v4929_v63 = vcombine.low %v951_v54, %v955_v41  ;;  %v4931_v1 = vcombine.low %v952_v55, %v956_v58  ;;  %v978_v36 = vrot.slane %v5396_v20, %v5324_v56 }
 0x2fb   :  { %4051 = vmatpush1.bf16.msra.mxu0 %v4881_v48  ;;  %v4287_v38 = vrot.slane %v4265_v61, %v5304_v46  ;;  %v986_v42 = vrot.slane %v5396_v20, %v5357_v31  ;;  %v982_v2 = vrot.slane %v5396_v20, %v147_v57  ;;  %v4291_v3 = vrot.slane %v4265_v61, %v5310_v49 }
 0x2fc   :  { %4223 = vmatpush1.bf16.msra.mxu1 %v4883_v37  ;;  %4052 = vmatprep.subr.bf16.mxu0 %v4890_v21  ;;  %v4295_v15 = vrot.slane %v4265_v61, %v5324_v56  ;;  %v4299_v49 = vrot.slane %v4265_v61, %v5357_v31 }
 0x2fd   :  { %4224 = vmatprep.subr.bf16.mxu1 %v4892_v5  ;;  %v4327_v21 = vrot.slane %v4287_v38, %v5304_v46  ;;  %v4331_v8 = vrot.slane %v4291_v3, %v5304_v46 }
 0x2fe   :  { %v4335_v56 = vrot.slane %v4295_v15, %v5304_v46  ;;  %v4339_v25 = vrot.slane %v4299_v49, %v5304_v46 }
 0x2ff   :  { %4053 = vmatpush1.bf16.msra.mxu0 %v4889_v9 }
 0x300   :  { %4225 = vmatpush1.bf16.msra.mxu1 %v4891_v10  ;;  %4054 = vmatprep.subr.bf16.mxu0 %v4898_v35 }
 0x301   :  { %4226 = vmatprep.subr.bf16.mxu1 %v4900_v11 }
 0x303   :  { %4055 = vmatpush1.bf16.msra.mxu0 %v4897_v17 }
 0x304   :  { %4227 = vmatpush1.bf16.msra.mxu1 %v4899_v18  ;;  %4056 = vmatprep.subr.bf16.mxu0 %v4906_v19 }
 0x305   :  { %4228 = vmatprep.subr.bf16.mxu1 %v4908_v22 }
 0x307   :  { %4057 = vmatpush1.bf16.msra.mxu0 %v4905_v28 }
 0x308   :  { %4229 = vmatpush1.bf16.msra.mxu1 %v4907_v23  ;;  %4058 = vmatprep.subr.bf16.mxu0 %v4914_v30 }
 0x309   :  { %4230 = vmatprep.subr.bf16.mxu1 %v4916_v32 }
 0x30b   :  { %4059 = vmatpush1.bf16.msra.mxu0 %v4913_v43 }
 0x30c   :  { %4231 = vmatpush1.bf16.msra.mxu1 %v4915_v44  ;;  %4060 = vmatprep.subr.bf16.mxu0 %v4922_v51 }
 0x30d   :  { %4232 = vmatprep.subr.bf16.mxu1 %v4924_v53 }
 0x30f   :  { %4061 = vmatpush1.bf16.msra.mxu0 %v4921_v60 }
 0x310   :  { %4233 = vmatpush1.bf16.msra.mxu1 %v4923_v50  ;;  %4062 = vmatprep.subr.bf16.mxu0 %v4930_v62 }
 0x311   :  { %4234 = vmatprep.subr.bf16.mxu1 %v4932_v59 }
 0x313   :  { %4063 = vmatpush1.bf16.msra.mxu0 %v4929_v63 }
 0x314   :  { %4235 = vmatpush1.bf16.msra.mxu1 %v4931_v1 }
 0x316   :  { %4065 = vmatmul.mubr.bf16.vlgmr.msra.gmra.mrb[12].mxu0 %v5365_v47 }
 0x317   :  { %4237 = vmatmul.mubr.bf16.vlgmr.msra.gmra.mrb[12].mxu1 %v5365_v47  ;;  %v990_v47 = vrot.slane %v5396_v20, %v155_v52 }
 0x3e9   :  { %v4066_v48 = vpop.f32.mrb[12].mxu0 }
 0x3ea   :  { %v4943_v37 = vadd.f32 %v4066_v48, %v978_v36  ;;  %v4238_v5 = vpop.f32.mrb[12].mxu1  ;;  %v4068_v6 = vpop.f32.mrb[13].mxu0 }
 0x3eb   :  { %v4947_v7 = vadd.f32 %v4238_v5, %v986_v42  ;;  %v4944_v40 = vadd.f32 %v4068_v6, %v982_v2  ;;  %v4240_v9 = vpop.f32.mrb[13].mxu1  ;;  %v4070_v57 = vpop.f32.mrb[14].mxu0 }
 0x3ec   :  { %v4251_v10 = vmax.f32 %v4943_v37, 0.0  ;;  %v4948_v45 = vadd.f32 %v4240_v9, %v990_v47  ;;  %v4945_v35 = vadd.f32 %v4070_v57, %v978_v36  ;;  %v4242_v52 = vpop.f32.mrb[14].mxu1  ;;  %v4072_v20 = vpop.f32.mrb[15].mxu0 }
 0x3ed   :  { %v4252_v11 = vmax.f32 %v4944_v40, 0.0  ;;  %v4949_v12 = vadd.f32 %v4242_v52, %v986_v42  ;;  %v4946_v13 = vadd.f32 %v4072_v20, %v982_v2  ;;  %v4244_v14 = vpop.f32.mrb[15].mxu1  ;;  %v4253_v17 = vmax.f32 %v4947_v7, 0.0 }
 0x3ee   :  { %v4344_v16 = vmul.f32 %v4327_v21, %v4251_v10  ;;  %v4259_v18 = vmax.f32 %v4945_v35, 0.0  ;;  %v4950_v19 = vadd.f32 %v4244_v14, %v990_v47  ;;  %v4254_v26 = vmax.f32 %v4948_v45, 0.0 }
 0x3ef   :  { %v4345_v22 = vmul.f32 %v4331_v8, %v4252_v11  ;;  %v4260_v24 = vmax.f32 %v4946_v13, 0.0  ;;  %v4261_v28 = vmax.f32 %v4949_v12, 0.0  ;;  %v4346_v30 = vmul.f32 %v4335_v56, %v4253_v17 }
 0x3f0   :  { %v4359_v31 = vadd.f32 %v5432_v0, %v4344_v16  ;;  %v4352_v27 = vmul.f32 %v4327_v21, %v4259_v18  ;;  %v4262_v33 = vmax.f32 %v4950_v19, 0.0  ;;  %v4347_v43 = vmul.f32 %v4339_v25, %v4254_v26 }
 0x3f1   :  { %v4353_v23 = vmul.f32 %v4331_v8, %v4260_v24  ;;  %v4354_v29 = vmul.f32 %v4335_v56, %v4261_v28  ;;  %v4375_v0 = vstv %s5474_s6 }
 0x3f2   :  { %v4368_v32 = vadd.f32 %v5434_v4, %v4352_v27  ;;  %v4360_v34 = vadd.f32 %v4359_v31, %v4345_v22  ;;  %v4355_v51 = vmul.f32 %v4339_v25, %v4262_v33 }
 0x3f4   :  { %v4369_v39 = vadd.f32 %v4368_v32, %v4353_v23  ;;  %v4361_v44 = vadd.f32 %v4360_v34, %v4346_v30 }
 0x3f6   :  { %v4362_v53 = vadd.f32 %v4361_v44, %v4347_v43  ;;  %v4370_v54 = vadd.f32 %v4369_v39, %v4354_v29 }
 0x3f8   :  { %4363 = vadd.xlane.f32.xlu0 %v4362_v53  ;;  %v4371_v46 = vadd.f32 %v4370_v54, %v4355_v51 }
 0x3fc   :  { %4372 = vadd.xlane.f32.xlu0 %v4371_v46 }
 0x485   :  { %v4364_v41 = vpop.xlane.xlu0 %4363 }
 0x486   :  { %v4376_v55 = vadd.f32 %v4375_v0, %v4364_v41 }
 0x488   :  { %v4933_v58 = vmul.f32 -1.442695, %v4376_v55 }
 0x489   :  { %v4373_v4 = vpop.xlane.xlu0 %4372 }
 0x48a   :  { %5010 = vpow2.f32 %v4933_v58  ;;  %v4377_v60 = vadd.f32 %v4375_v0, %v4373_v4 }
 0x48c   :  { %v4934_v50 = vmul.f32 -1.442695, %v4377_v60 }
 0x48e   :  { %5012 = vpow2.f32 %v4934_v50 }
 0x494   :  { %v5011_v62 = vpop.eup %5010 }
 0x495   :  { %v4384_v59 = vadd.f32 1.0, %v5011_v62 }
 0x497   :  { %5014 = vrcp.f32 %v4384_v59 }
 0x498   :  { %v5013_v63 = vpop.eup %5012 }
 0x499   :  { %v4385_v1 = vadd.f32 1.0, %v5013_v63 }
 0x49b   :  { %5016 = vrcp.f32 %v4385_v1 }
 0x4a1   :  { %v5015_v61 = vpop.eup %5014 }
 0x4a2   :  { %4391 = vst.msk [vmem:[%s5475_s7] sm:$0xff] %vm4390_vm1, %v5015_v61 }
 0x4a5   :  { %v5017_v36 = vpop.eup %5016 }
 0x4a6   :  { %4392 = vst.msk [vmem:[%s5475_s7 + $0x8] sm:$0xff] %vm4390_vm1, %v5017_v36 }
 0x4a7   :  { %4397 = vsyncpa [#allocation4], 1 }
 0x4a8   :  { %4398 = vsyncpa [#allocation6], 1 }
 0x4a9   :  { %4399 = vsyncpa [#allocation9], 1 }
 0x4aa   :  { %4400 = vsyncpa [#allocation12], 1 }

// kernel: tpu_custom_call.1
= control target key start
LH: loop header
LB: loop body
LE: loop exit
PB: predicated region body
PF: predicated region fallthrough
CT: control target
= control target key end

     0   :  { %13 = vsyncpa [#allocation4], 0  ;;  %s5468_s0 = inlined_call_operand.hbm [shape: f32[16,32], index: 0, kind: input, shape index: {}]   ;;  %s5469_s1 = inlined_call_operand.hbm [shape: bf16[32,1024], index: 1, kind: input, shape index: {}]   ;;  %s5470_s2 = inlined_call_operand.hbm [shape: f32[1,1024], index: 2, kind: input, shape index: {}]   ;;  %s5471_s3 = inlined_call_operand.hbm [shape: bf16[1024,1024], index: 3, kind: input, shape index: {}]   ;;  %s5472_s4 = inlined_call_operand.hbm [shape: f32[1,1024], index: 4, kind: input, shape index: {}]   ;;  %s5473_s5 = inlined_call_operand.hbm [shape: bf16[1,1024], index: 5, kind: input, shape index: {}]   ;;  %s5474_s6 = inlined_call_operand.<no memory space> [shape: f32[1,1], index: 6, kind: input, shape index: {}]   ;;  %s5475_s7 = inlined_call_operand.vmem [shape: f32[16,1], index: 7, kind: output, shape index: {}]  }
   0x1   :  { %14 = vsyncpa [#allocation6], 0 }
   0x2   :  { %15 = vsyncpa [#allocation9], 0 }
   0x3   :  { %16 = vsyncpa [#allocation12], 0  ;;  %s5158_s24 = smov [#allocation5]   ;;  %s5018_s28 = scalar_lea.hbm %s5469_s1, 2048 }
   0x4   :  { %s34_s25 = sshll.u32 %s5158_s24, 4  ;;  %p5019_p0 = scmp.ne.s32.totalorder %s5469_s1, %s5018_s28  ;;  %s35_s25 = int_to_ptr.vmem [resolvable:$true] %s34_s25 }
   0x5   :  { %p5022_p1 = scmp.lt.u32.totalorder %s5018_s28, %s5469_s1 }
   0x7   :  { %p5024_p2 = pnand %p5022_p1, %p5019_p0 }
   0x9   :  { %5027 = shalt.err (!%p5024_p2)
}
   0xa   :  { %s5028_s10 = scalar_lea.vmem %s35_s25, 2048  ;;  %p5033_p4 = scmp.lt.s32.totalorder %s35_s25, %s35_s25 }
   0xb   :  { %p5029_p3 = scmp.ne.s32.totalorder %s35_s25, %s5028_s10  ;;  %p5034_p5 = scmp.lt.s32.totalorder %s5028_s10, %s5028_s10 }
   0xd   :  { %p5035_p6 = por %p5034_p5, %p5033_p4 }
   0xf   :  { %p5036_p7 = pnand %p5035_p6, %p5029_p3 }
  0x11   :  { %5039 = shalt.err (!%p5036_p7)
}
  0x12   :  { %s5159_s11 = smov 512   ;;  %s5160_s12 = smov 32  }
  0x13   :  { %40 = dma.hbm_to_vmem [thread:$0]  %s5469_s1, 2048, %s35_s25, [#allocation6], %s5159_s11, %s5159_s11, %s5160_s12  }
  0x14   :  { %s5161_s15 = smov [#allocation8]   ;;  %s5162_s17 = smov [#allocation3]  }
  0x15   :  { %s56_s16 = sshll.u32 %s5161_s15, 4  ;;  %s22_s18 = sshll.u32 %s5162_s17, 4  ;;  %s57_s16 = int_to_ptr.vmem [resolvable:$true] %s56_s16  ;;  %s23_s18 = int_to_ptr.vmem [resolvable:$true] %s22_s18 }
  0x16   :  { %s5040_s21 = scalar_lea.hbm %s5471_s3, 65536 }
  0x17   :  { %p5041_p8 = scmp.ne.s32.totalorder %s5471_s3, %s5040_s21  ;;  %p5044_p9 = scmp.lt.u32.totalorder %s5040_s21, %s5471_s3 }
  0x19   :  { %p5046_p10 = pnand %p5044_p9, %p5041_p8 }
  0x1b   :  { %5049 = shalt.err (!%p5046_p10)
}
  0x1c   :  { %s5050_s1 = scalar_lea.vmem %s57_s16, 65536  ;;  %p5055_p12 = scmp.lt.s32.totalorder %s57_s16, %s57_s16 }
  0x1d   :  { %p5051_p11 = scmp.ne.s32.totalorder %s57_s16, %s5050_s1  ;;  %p5056_p13 = scmp.lt.s32.totalorder %s5050_s1, %s5050_s1 }
  0x1f   :  { %p5057_p0 = por %p5056_p13, %p5055_p12 }
  0x21   :  { %p5058_p1 = pnand %p5057_p0, %p5051_p11 }
  0x23   :  { %5061 = shalt.err (!%p5058_p1)
}
  0x24   :  { %62 = dma.hbm_to_vmem [thread:$0]  %s5471_s3, 65536, %s57_s16, [#allocation9], %s5159_s11, %s5159_s11, %s5160_s12  }
  0x25   :  { %s5062_s30 = scalar_lea.hbm %s5468_s0, 256 }
  0x26   :  { %p5063_p2 = scmp.ne.s32.totalorder %s5468_s0, %s5062_s30  ;;  %p5066_p3 = scmp.lt.u32.totalorder %s5062_s30, %s5468_s0 }
  0x28   :  { %p5068_p4 = pnand %p5066_p3, %p5063_p2 }
  0x2a   :  { %5071 = shalt.err (!%p5068_p4)
}
  0x2b   :  { %s5072_s14 = scalar_lea.vmem %s23_s18, 256  ;;  %p5077_p6 = scmp.lt.s32.totalorder %s23_s18, %s23_s18 }
  0x2c   :  { %p5073_p5 = scmp.ne.s32.totalorder %s23_s18, %s5072_s14  ;;  %p5078_p7 = scmp.lt.s32.totalorder %s5072_s14, %s5072_s14 }
  0x2e   :  { %p5079_p8 = por %p5078_p7, %p5077_p6 }
  0x30   :  { %p5080_p9 = pnand %p5079_p8, %p5073_p5 }
  0x32   :  { %5083 = shalt.err (!%p5080_p9)
}
  0x33   :  { %s5163_s3 = smov 128   ;;  %s5164_s11 = smov 8  }
  0x34   :  { %28 = dma.hbm_to_vmem [thread:$0]  %s5468_s0, 256, %s23_s18, [#allocation4], %s5163_s3, %s5163_s3, %s5164_s11  }
  0x35   :  { %s5165_s16 = smov [#allocation7]   ;;  %s5166_s19 = smov [#allocation10]  }
  0x36   :  { %s47_s17 = sshll.u32 %s5165_s16, 4  ;;  %s69_s20 = sshll.u32 %s5166_s19, 4  ;;  %s48_s17 = int_to_ptr.vmem [resolvable:$true] %s47_s17  ;;  %s70_s20 = int_to_ptr.vmem [resolvable:$true] %s69_s20 }
  0x37   :  { %s5084_s23 = scalar_lea.hbm %s5470_s2, 128 }
  0x38   :  { %p5085_p10 = scmp.ne.s32.totalorder %s5470_s2, %s5084_s23  ;;  %p5088_p11 = scmp.lt.u32.totalorder %s5084_s23, %s5470_s2 }
  0x3a   :  { %p5090_p12 = pnand %p5088_p11, %p5085_p10 }
  0x3c   :  { %5093 = shalt.err (!%p5090_p12)
}
  0x3d   :  { %s5094_s0 = scalar_lea.vmem %s48_s17, 128  ;;  %p5099_p0 = scmp.lt.s32.totalorder %s48_s17, %s48_s17 }
  0x3e   :  { %p5095_p13 = scmp.ne.s32.totalorder %s48_s17, %s5094_s0  ;;  %p5100_p1 = scmp.lt.s32.totalorder %s5094_s0, %s5094_s0 }
  0x40   :  { %p5101_p2 = por %p5100_p1, %p5099_p0 }
  0x42   :  { %p5102_p3 = pnand %p5101_p2, %p5095_p13 }
  0x44   :  { %5105 = shalt.err (!%p5102_p3)
}
  0x45   :  { %50 = dma.hbm_to_vmem [thread:$0]  %s5470_s2, 128, %s48_s17, [#allocation6]  }
  0x46   :  { %s5106_s30 = scalar_lea.hbm %s5472_s4, 128 }
  0x47   :  { %p5107_p4 = scmp.ne.s32.totalorder %s5472_s4, %s5106_s30  ;;  %p5110_p5 = scmp.lt.u32.totalorder %s5106_s30, %s5472_s4 }
  0x49   :  { %p5112_p6 = pnand %p5110_p5, %p5107_p4 }
  0x4b   :  { %5115 = shalt.err (!%p5112_p6)
}
  0x4c   :  { %s5116_s14 = scalar_lea.vmem %s70_s20, 128  ;;  %p5121_p8 = scmp.lt.s32.totalorder %s70_s20, %s70_s20 }
  0x4d   :  { %p5117_p7 = scmp.ne.s32.totalorder %s70_s20, %s5116_s14  ;;  %p5122_p9 = scmp.lt.s32.totalorder %s5116_s14, %s5116_s14 }
  0x4f   :  { %p5123_p10 = por %p5122_p9, %p5121_p8 }
  0x51   :  { %p5124_p11 = pnand %p5123_p10, %p5117_p7 }
  0x53   :  { %5127 = shalt.err (!%p5124_p11)
}
  0x54   :  { %72 = dma.hbm_to_vmem [thread:$0]  %s5472_s4, 128, %s70_s20, [#allocation9]  }
  0x55   :  { %s5167_s11 = smov [#allocation11]   ;;  %s5128_s17 = scalar_lea.hbm %s5473_s5, 128 }
  0x56   :  { %s79_s12 = sshll.u32 %s5167_s11, 4  ;;  %p5129_p12 = scmp.ne.s32.totalorder %s5473_s5, %s5128_s17  ;;  %s80_s12 = int_to_ptr.vmem [resolvable:$true] %s79_s12 }
  0x57   :  { %p5132_p13 = scmp.lt.u32.totalorder %s5128_s17, %s5473_s5 }
  0x59   :  { %p5134_p0 = pnand %p5132_p13, %p5129_p12 }
  0x5b   :  { %5137 = shalt.err (!%p5134_p0)
}
  0x5c   :  { %s5138_s24 = scalar_lea.vmem %s80_s12, 128  ;;  %p5143_p2 = scmp.lt.s32.totalorder %s80_s12, %s80_s12 }
  0x5d   :  { %p5139_p1 = scmp.ne.s32.totalorder %s80_s12, %s5138_s24  ;;  %p5144_p3 = scmp.lt.s32.totalorder %s5138_s24, %s5138_s24 }
  0x5f   :  { %p5145_p4 = por %p5144_p3, %p5143_p2 }
  0x61   :  { %p5146_p5 = pnand %p5145_p4, %p5139_p1 }
  0x63   :  { %5149 = shalt.err (!%p5146_p5)
}
  0x64   :  { %82 = dma.hbm_to_vmem [thread:$0]  %s5473_s5, 128, %s80_s12, [#allocation12]  }
  0x65   :  { %5150 = dma.done.wait [#allocation4], 256  }
  0x66   :  { %5151 = vsyncadd [#allocation4], 4294967040 }
  0x67   :  { %5152 = dma.done.wait [#allocation6], 2176  }
  0x68   :  { %5153 = vsyncadd [#allocation6], 4294965120 }
  0x69   :  { %5154 = dma.done.wait [#allocation9], 65664  }
  0x6a   :  { %5155 = vsyncadd [#allocation9], 4294901632 }
  0x6b   :  { %5156 = dma.done.wait [#allocation12], 128  }
  0x6c   :  { %5157 = vsyncadd [#allocation12], 4294967168  ;;  %v5168_v0 = vmov 0   ;;  %v107_v1 = vld [vmem:[#allocation5] sm:$0xff]  ;;  %v108_v8 = vld [vmem:[#allocation5 + $0x8] sm:$0xff]  ;;  %vm245_vm0 = vcmask 261120  }
  0x6d   :  { %281 = vmatprep.mubr.bf16.mxu0 %v5168_v0  ;;  %324 = vmatprep.mubr.bf16.mxu1 %v5168_v0  ;;  %v111_v2 = vld [vmem:[#allocation5 + $0x20] sm:$0xff]  ;;  %v112_v9 = vld [vmem:[#allocation5 + $0x28] sm:$0xff]  ;;  %v109_v14 = vld [vmem:[#allocation5 + $0x10] sm:$0xff]  ;;  %vm4390_vm1 = vcmask 7168  }
  0x6e   :  { %v115_v3 = vld [vmem:[#allocation5 + $0x40] sm:$0xff]  ;;  %v4402_v4 = vcombine.high %v107_v1, %v111_v2  ;;  %v4401_v5 = vcombine.low %v107_v1, %v111_v2  ;;  %v116_v10 = vld [vmem:[#allocation5 + $0x48] sm:$0xff]  ;;  %v4404_v11 = vcombine.high %v108_v8, %v112_v9  ;;  %v4403_v12 = vcombine.low %v108_v8, %v112_v9  ;;  %v113_v15 = vld [vmem:[#allocation5 + $0x30] sm:$0xff] }
  0x6f   :  { %v119_v6 = vld [vmem:[#allocation5 + $0x60] sm:$0xff]  ;;  %v120_v13 = vld [vmem:[#allocation5 + $0x68] sm:$0xff]  ;;  %v104_v17 = vld [vmem:[#allocation3] sm:$0xff]  ;;  %v4406_v21 = vcombine.high %v109_v14, %v113_v15  ;;  %v4405_v28 = vcombine.low %v109_v14, %v113_v15 }
  0x70   :  { %v4410_v7 = vcombine.high %v115_v3, %v119_v6  ;;  %249 = vmatprep.subr.bf16.mxu0 %v4402_v4  ;;  %v4409_v16 = vcombine.low %v115_v3, %v119_v6  ;;  %v105_v18 = vld [vmem:[#allocation3 + $0x8] sm:$0xff]  ;;  %v4412_v19 = vcombine.high %v116_v10, %v120_v13  ;;  %292 = vmatprep.subr.bf16.mxu1 %v4404_v11  ;;  %v117_v24 = vld [vmem:[#allocation5 + $0x50] sm:$0xff]  ;;  %v445_v33 = vld [vmem:[#allocation8] sm:$0xff] }
  0x71   :  { %250 = vmatpush1.bf16.msra.mxu0 %v4401_v5  ;;  %v110_v20 = vld [vmem:[#allocation5 + $0x18] sm:$0xff]  ;;  %293 = vmatpush1.bf16.msra.mxu1 %v4403_v12  ;;  %v4411_v23 = vcombine.low %v116_v10, %v120_v13  ;;  %v121_v25 = vld [vmem:[#allocation5 + $0x70] sm:$0xff]  ;;  %v106_v26 = vpack.c.bf16 %v105_v18, %v104_v17  ;;  %v449_v34 = vld [vmem:[#allocation8 + $0x20] sm:$0xff] }
  0x72   :  { %251 = vmatprep.subr.bf16.mxu0 %v4410_v7  ;;  %v114_v22 = vld [vmem:[#allocation5 + $0x38] sm:$0xff]  ;;  %294 = vmatprep.subr.bf16.mxu1 %v4412_v19  ;;  %v4414_v31 = vcombine.high %v117_v24, %v121_v25  ;;  %v4413_v36 = vcombine.low %v117_v24, %v121_v25  ;;  %v446_v37 = vld [vmem:[#allocation8 + $0x8] sm:$0xff]  ;;  %v4422_v39 = vcombine.high %v445_v33, %v449_v34  ;;  %v453_v41 = vld [vmem:[#allocation8 + $0x40] sm:$0xff] }
  0x73   :  { %v4408_v27 = vcombine.high %v110_v20, %v114_v22  ;;  %v118_v29 = vld [vmem:[#allocation5 + $0x58] sm:$0xff]  ;;  %v4407_v32 = vcombine.low %v110_v20, %v114_v22  ;;  %v450_v38 = vld [vmem:[#allocation8 + $0x28] sm:$0xff]  ;;  %v457_v42 = vld [vmem:[#allocation8 + $0x60] sm:$0xff]  ;;  %v4421_v44 = vcombine.low %v445_v33, %v449_v34 }
  0x74   :  { %v122_v30 = vld [vmem:[#allocation5 + $0x78] sm:$0xff]  ;;  %v4424_v43 = vcombine.high %v446_v37, %v450_v38  ;;  %v454_v45 = vld [vmem:[#allocation8 + $0x48] sm:$0xff]  ;;  %v4430_v47 = vcombine.high %v453_v41, %v457_v42  ;;  %v4423_v48 = vcombine.low %v446_v37, %v450_v38  ;;  %v461_v49 = vld [vmem:[#allocation8 + $0x80] sm:$0xff]  ;;  %v4429_v52 = vcombine.low %v453_v41, %v457_v42 }
  0x75   :  { %252 = vmatpush1.bf16.msra.mxu0 %v4409_v16  ;;  %295 = vmatpush1.bf16.msra.mxu1 %v4411_v23  ;;  %v4416_v35 = vcombine.high %v118_v29, %v122_v30  ;;  %v4415_v40 = vcombine.low %v118_v29, %v122_v30  ;;  %v458_v46 = vld [vmem:[#allocation8 + $0x68] sm:$0xff]  ;;  %v465_v50 = vld [vmem:[#allocation8 + $0xa0] sm:$0xff] }
  0x76   :  { %335 = vmatprep.subr.bf16.mxu0 %v4406_v21  ;;  %378 = vmatprep.subr.bf16.mxu1 %v4408_v27  ;;  %v4432_v51 = vcombine.high %v454_v45, %v458_v46  ;;  %v462_v53 = vld [vmem:[#allocation8 + $0x88] sm:$0xff]  ;;  %v4438_v55 = vcombine.high %v461_v49, %v465_v50  ;;  %v4431_v56 = vcombine.low %v454_v45, %v458_v46  ;;  %v469_v57 = vld [vmem:[#allocation8 + $0xc0] sm:$0xff] }
  0x77   :  { %v466_v54 = vld [vmem:[#allocation8 + $0xa8] sm:$0xff]  ;;  %v473_v58 = vld [vmem:[#allocation8 + $0xe0] sm:$0xff]  ;;  %v4437_v60 = vcombine.low %v461_v49, %v465_v50 }
  0x78   :  { %4417 = vmatmul.mubr.msk.bf16.vlgmr.msra.gmra.mrb[0].mxu0 %vm245_vm0, %v106_v26  ;;  %4418 = vmatmul.mubr.msk.bf16.vlgmr.msra.gmra.mrb[0].mxu1 %vm245_vm0, %v106_v26  ;;  %v4440_v59 = vcombine.high %v462_v53, %v466_v54  ;;  %v470_v61 = vld [vmem:[#allocation8 + $0xc8] sm:$0xff]  ;;  %v4446_v63 = vcombine.high %v469_v57, %v473_v58  ;;  %v477_v1 = vld [vmem:[#allocation8 + $0x100] sm:$0xff]  ;;  %v4445_v4 = vcombine.low %v469_v57, %v473_v58 }
  0x79   :  { %336 = vmatpush1.bf16.msra.mxu0 %v4405_v28  ;;  %367 = vmatprep.mubr.bf16.mxu0 %v5168_v0  ;;  %v474_v62 = vld [vmem:[#allocation8 + $0xe8] sm:$0xff]  ;;  %v481_v2 = vld [vmem:[#allocation8 + $0x120] sm:$0xff] }
  0x7a   :  { %337 = vmatprep.subr.bf16.mxu0 %v4414_v31  ;;  %379 = vmatpush1.bf16.msra.mxu1 %v4407_v32  ;;  %v4448_v3 = vcombine.high %v470_v61, %v474_v62  ;;  %v478_v5 = vld [vmem:[#allocation8 + $0x108] sm:$0xff]  ;;  %v4454_v7 = vcombine.high %v477_v1, %v481_v2  ;;  %v4447_v8 = vcombine.low %v470_v61, %v474_v62  ;;  %v485_v9 = vld [vmem:[#allocation8 + $0x140] sm:$0xff] }
  0x7b   :  { %410 = vmatprep.mubr.bf16.mxu1 %v5168_v0  ;;  %380 = vmatprep.subr.bf16.mxu1 %v4416_v35  ;;  %v4439_v0 = vcombine.low %v462_v53, %v466_v54  ;;  %v482_v6 = vld [vmem:[#allocation8 + $0x128] sm:$0xff]  ;;  %v489_v10 = vld [vmem:[#allocation8 + $0x160] sm:$0xff]  ;;  %v4453_v12 = vcombine.low %v477_v1, %v481_v2 }
  0x7c   :  { %v4456_v11 = vcombine.high %v478_v5, %v482_v6  ;;  %v486_v13 = vld [vmem:[#allocation8 + $0x148] sm:$0xff]  ;;  %v4462_v15 = vcombine.high %v485_v9, %v489_v10  ;;  %v4455_v16 = vcombine.low %v478_v5, %v482_v6  ;;  %v493_v17 = vld [vmem:[#allocation8 + $0x180] sm:$0xff]  ;;  %v4461_v20 = vcombine.low %v485_v9, %v489_v10 }
  0x7d   :  { %338 = vmatpush1.bf16.msra.mxu0 %v4413_v36  ;;  %v490_v14 = vld [vmem:[#allocation8 + $0x168] sm:$0xff]  ;;  %v497_v18 = vld [vmem:[#allocation8 + $0x1a0] sm:$0xff] }
  0x7e   :  { %3559 = vmatprep.subr.bf16.mxu0 %v4422_v39  ;;  %381 = vmatpush1.bf16.msra.mxu1 %v4415_v40  ;;  %v4464_v19 = vcombine.high %v486_v13, %v490_v14  ;;  %v494_v21 = vld [vmem:[#allocation8 + $0x188] sm:$0xff]  ;;  %v4470_v23 = vcombine.high %v493_v17, %v497_v18  ;;  %v4463_v24 = vcombine.low %v486_v13, %v490_v14  ;;  %v501_v25 = vld [vmem:[#allocation8 + $0x1c0] sm:$0xff] }
  0x7f   :  { %3731 = vmatprep.subr.bf16.mxu1 %v4424_v43  ;;  %v498_v22 = vld [vmem:[#allocation8 + $0x1a8] sm:$0xff]  ;;  %v4469_v28 = vcombine.low %v493_v17, %v497_v18  ;;  %v509_v33 = vld [vmem:[#allocation8 + $0x200] sm:$0xff] }
  0x80   :  { %4419 = vmatmul.mubr.msk.bf16.vlgmr.msra.gmra.mrb[4].mxu0 %vm245_vm0, %v106_v26  ;;  %v4472_v27 = vcombine.high %v494_v21, %v498_v22  ;;  %v502_v29 = vld [vmem:[#allocation8 + $0x1c8] sm:$0xff]  ;;  %v4471_v32 = vcombine.low %v494_v21, %v498_v22  ;;  %v513_v34 = vld [vmem:[#allocation8 + $0x220] sm:$0xff] }
  0x81   :  { %3560 = vmatpush1.bf16.msra.mxu0 %v4421_v44  ;;  %4420 = vmatmul.mubr.msk.bf16.vlgmr.msra.gmra.mrb[4].mxu1 %vm245_vm0, %v106_v26  ;;  %v505_v26 = vld [vmem:[#allocation8 + $0x1e0] sm:$0xff]  ;;  %v506_v30 = vld [vmem:[#allocation8 + $0x1e8] sm:$0xff]  ;;  %v4486_v39 = vcombine.high %v509_v33, %v513_v34  ;;  %v4485_v44 = vcombine.low %v509_v33, %v513_v34 }
  0x82   :  { %3561 = vmatprep.subr.bf16.mxu0 %v4430_v47  ;;  %3732 = vmatpush1.bf16.msra.mxu1 %v4423_v48  ;;  %v4478_v31 = vcombine.high %v501_v25, %v505_v26  ;;  %v4480_v35 = vcombine.high %v502_v29, %v506_v30  ;;  %v4477_v36 = vcombine.low %v501_v25, %v505_v26  ;;  %v510_v37 = vld [vmem:[#allocation8 + $0x208] sm:$0xff]  ;;  %v517_v41 = vld [vmem:[#allocation8 + $0x240] sm:$0xff] }
  0x83   :  { %3733 = vmatprep.subr.bf16.mxu1 %v4432_v51  ;;  %v514_v38 = vld [vmem:[#allocation8 + $0x228] sm:$0xff]  ;;  %v4479_v40 = vcombine.low %v502_v29, %v506_v30  ;;  %v521_v42 = vld [vmem:[#allocation8 + $0x260] sm:$0xff] }
  0x84   :  { %v4488_v43 = vcombine.high %v510_v37, %v514_v38  ;;  %v518_v45 = vld [vmem:[#allocation8 + $0x248] sm:$0xff]  ;;  %v4494_v47 = vcombine.high %v517_v41, %v521_v42  ;;  %v4487_v48 = vcombine.low %v510_v37, %v514_v38  ;;  %v525_v49 = vld [vmem:[#allocation8 + $0x280] sm:$0xff] }
  0x85   :  { %3562 = vmatpush1.bf16.msra.mxu0 %v4429_v52  ;;  %v522_v46 = vld [vmem:[#allocation8 + $0x268] sm:$0xff]  ;;  %v529_v50 = vld [vmem:[#allocation8 + $0x2a0] sm:$0xff]  ;;  %v4493_v52 = vcombine.low %v517_v41, %v521_v42 }
  0x86   :  { %3563 = vmatprep.subr.bf16.mxu0 %v4438_v55  ;;  %3734 = vmatpush1.bf16.msra.mxu1 %v4431_v56  ;;  %v4496_v51 = vcombine.high %v518_v45, %v522_v46  ;;  %v526_v53 = vld [vmem:[#allocation8 + $0x288] sm:$0xff]  ;;  %v4502_v55 = vcombine.high %v525_v49, %v529_v50  ;;  %v4495_v56 = vcombine.low %v518_v45, %v522_v46  ;;  %v533_v57 = vld [vmem:[#allocation8 + $0x2c0] sm:$0xff] }
  0x87   :  { %3735 = vmatprep.subr.bf16.mxu1 %v4440_v59  ;;  %v530_v54 = vld [vmem:[#allocation8 + $0x2a8] sm:$0xff]  ;;  %v537_v58 = vld [vmem:[#allocation8 + $0x2e0] sm:$0xff] }
  0x88   :  { %v4504_v59 = vcombine.high %v526_v53, %v530_v54  ;;  %v534_v61 = vld [vmem:[#allocation8 + $0x2c8] sm:$0xff]  ;;  %v541_v1 = vld [vmem:[#allocation8 + $0x300] sm:$0xff] }
  0x89   :  { %3564 = vmatpush1.bf16.msra.mxu0 %v4437_v60  ;;  %v4501_v60 = vcombine.low %v525_v49, %v529_v50  ;;  %v538_v62 = vld [vmem:[#allocation8 + $0x2e8] sm:$0xff]  ;;  %v545_v2 = vld [vmem:[#allocation8 + $0x320] sm:$0xff] }
  0x8a   :  { %3565 = vmatprep.subr.bf16.mxu0 %v4446_v63  ;;  %3736 = vmatpush1.bf16.msra.mxu1 %v4439_v0  ;;  %v4510_v63 = vcombine.high %v533_v57, %v537_v58  ;;  %v4503_v0 = vcombine.low %v526_v53, %v530_v54  ;;  %v542_v5 = vld [vmem:[#allocation8 + $0x308] sm:$0xff]  ;;  %v549_v9 = vld [vmem:[#allocation8 + $0x340] sm:$0xff] }
  0x8b   :  { %3737 = vmatprep.subr.bf16.mxu1 %v4448_v3  ;;  %v4512_v3 = vcombine.high %v534_v61, %v538_v62  ;;  %v546_v6 = vld [vmem:[#allocation8 + $0x328] sm:$0xff]  ;;  %v553_v10 = vld [vmem:[#allocation8 + $0x360] sm:$0xff] }
  0x8c   :  { %v550_v13 = vld [vmem:[#allocation8 + $0x348] sm:$0xff]  ;;  %v4525_v18 = vcombine.low %v549_v9, %v553_v10  ;;  %v561_v21 = vld [vmem:[#allocation8 + $0x3a0] sm:$0xff] }
  0x8d   :  { %3566 = vmatpush1.bf16.msra.mxu0 %v4445_v4  ;;  %v4509_v4 = vcombine.low %v533_v57, %v537_v58  ;;  %v554_v14 = vld [vmem:[#allocation8 + $0x368] sm:$0xff]  ;;  %v569_v29 = vld [vmem:[#allocation8 + $0x3e0] sm:$0xff] }
  0x8e   :  { %3567 = vmatprep.subr.bf16.mxu0 %v4454_v7  ;;  %3738 = vmatpush1.bf16.msra.mxu1 %v4447_v8  ;;  %v4518_v7 = vcombine.high %v541_v1, %v545_v2  ;;  %v4511_v8 = vcombine.low %v534_v61, %v538_v62  ;;  %v4528_v17 = vcombine.high %v550_v13, %v554_v14  ;;  %v558_v22 = vld [vmem:[#allocation8 + $0x388] sm:$0xff]  ;;  %v5287_v37 = vld [vmem:[#allocation8 + $0x420] sm:$0xff] }
  0x8f   :  { %3739 = vmatprep.subr.bf16.mxu1 %v4456_v11  ;;  %v4520_v11 = vcombine.high %v542_v5, %v546_v6  ;;  %v566_v30 = vld [vmem:[#allocation8 + $0x3c8] sm:$0xff] }
  0x90   :  { %v5289_v38 = vld [vmem:[#allocation8 + $0x408] sm:$0xff] }
  0x91   :  { %3568 = vmatpush1.bf16.msra.mxu0 %v4453_v12  ;;  %v4517_v12 = vcombine.low %v541_v1, %v545_v2 }
  0x92   :  { %3569 = vmatprep.subr.bf16.mxu0 %v4462_v15  ;;  %3740 = vmatpush1.bf16.msra.mxu1 %v4455_v16  ;;  %v4526_v15 = vcombine.high %v549_v9, %v553_v10  ;;  %v4519_v16 = vcombine.low %v542_v5, %v546_v6  ;;  %v581_v10 = vld [vmem:[#allocation8 + $0x440] sm:$0xff] }
  0x93   :  { %3741 = vmatprep.subr.bf16.mxu1 %v4464_v19  ;;  %v4527_v19 = vcombine.low %v550_v13, %v554_v14 }
  0x95   :  { %3570 = vmatpush1.bf16.msra.mxu0 %v4461_v20  ;;  %v557_v20 = vld [vmem:[#allocation8 + $0x380] sm:$0xff] }
  0x96   :  { %3571 = vmatprep.subr.bf16.mxu0 %v4470_v23  ;;  %3742 = vmatpush1.bf16.msra.mxu1 %v4463_v24  ;;  %v4534_v23 = vcombine.high %v557_v20, %v561_v21  ;;  %v562_v24 = vld [vmem:[#allocation8 + $0x3a8] sm:$0xff]  ;;  %v4533_v25 = vcombine.low %v557_v20, %v561_v21 }
  0x97   :  { %3743 = vmatprep.subr.bf16.mxu1 %v4472_v27  ;;  %v4535_v26 = vcombine.low %v558_v22, %v562_v24  ;;  %v4536_v27 = vcombine.high %v558_v22, %v562_v24 }
  0x99   :  { %3572 = vmatpush1.bf16.msra.mxu0 %v4469_v28  ;;  %v565_v28 = vld [vmem:[#allocation8 + $0x3c0] sm:$0xff] }
  0x9a   :  { %3573 = vmatprep.subr.bf16.mxu0 %v4478_v31  ;;  %3744 = vmatpush1.bf16.msra.mxu1 %v4471_v32  ;;  %v4542_v31 = vcombine.high %v565_v28, %v569_v29  ;;  %v570_v32 = vld [vmem:[#allocation8 + $0x3e8] sm:$0xff]  ;;  %v4541_v33 = vcombine.low %v565_v28, %v569_v29  ;;  %v589_v28 = vld [vmem:[#allocation8 + $0x480] sm:$0xff] }
  0x9b   :  { %3745 = vmatprep.subr.bf16.mxu1 %v4480_v35  ;;  %v4543_v34 = vcombine.low %v566_v30, %v570_v32  ;;  %v4544_v35 = vcombine.high %v566_v30, %v570_v32  ;;  %v593_v32 = vld [vmem:[#allocation8 + $0x4a0] sm:$0xff] }
  0x9d   :  { %3574 = vmatpush1.bf16.msra.mxu0 %v4477_v36  ;;  %v5285_v36 = vld [vmem:[#allocation8 + $0x400] sm:$0xff] }
  0x9e   :  { %3575 = vmatprep.subr.bf16.mxu0 %v4486_v39  ;;  %3746 = vmatpush1.bf16.msra.mxu1 %v4479_v40  ;;  %v4550_v39 = vcombine.high %v5285_v36, %v5287_v37  ;;  %v5293_v40 = vld [vmem:[#allocation8 + $0x428] sm:$0xff]  ;;  %v4549_v41 = vcombine.low %v5285_v36, %v5287_v37 }
  0x9f   :  { %3747 = vmatprep.subr.bf16.mxu1 %v4488_v43  ;;  %v4551_v42 = vcombine.low %v5289_v38, %v5293_v40  ;;  %v4552_v43 = vcombine.high %v5289_v38, %v5293_v40  ;;  %v4565_v38 = vcombine.low %v589_v28, %v593_v32 }
  0xa1   :  { %3576 = vmatpush1.bf16.msra.mxu0 %v4485_v44  ;;  %v125_v44 = vlaneseq }
  0xa2   :  { %3577 = vmatprep.subr.bf16.mxu0 %v4494_v47  ;;  %3748 = vmatpush1.bf16.msra.mxu1 %v4487_v48  ;;  %v5306_v47 = vld [vmem:[#allocation7] sm:$0xff] }
  0xa3   :  { %3749 = vmatprep.subr.bf16.mxu1 %v4496_v51  ;;  %v5301_v45 = vshrl.u32 %v125_v44, 7 }
  0xa5   :  { %3578 = vmatpush1.bf16.msra.mxu0 %v4493_v52  ;;  %v5304_v46 = vsub.s32 0, %v5301_v45  ;;  %v131_v48 = vsub.s32 1, %v5301_v45  ;;  %v5310_v49 = vsub.s32 2, %v5301_v45  ;;  %v139_v50 = vsub.s32 3, %v5301_v45 }
  0xa6   :  { %3579 = vmatprep.subr.bf16.mxu0 %v4502_v55  ;;  %3750 = vmatpush1.bf16.msra.mxu1 %v4495_v56  ;;  %v5324_v56 = vsub.s32 4, %v5301_v45  ;;  %v147_v57 = vsub.s32 5, %v5301_v45 }
  0xa7   :  { %3751 = vmatprep.subr.bf16.mxu1 %v4504_v59  ;;  %v128_v51 = vrot.slane %v5306_v47, %v5304_v46  ;;  %v132_v52 = vrot.slane %v5306_v47, %v131_v48  ;;  %v136_v53 = vrot.slane %v5306_v47, %v5310_v49  ;;  %v140_v55 = vrot.slane %v5306_v47, %v139_v50 }
  0xa8   :  { %v144_v6 = vrot.slane %v5306_v47, %v5324_v56 }
  0xa9   :  { %3580 = vmatpush1.bf16.msra.mxu0 %v4501_v60 }
  0xaa   :  { %3581 = vmatprep.subr.bf16.mxu0 %v4510_v63  ;;  %3752 = vmatpush1.bf16.msra.mxu1 %v4503_v0 }
  0xab   :  { %3753 = vmatprep.subr.bf16.mxu1 %v4512_v3 }
  0xad   :  { %3582 = vmatpush1.bf16.msra.mxu0 %v4509_v4 }
  0xae   :  { %3583 = vmatprep.subr.bf16.mxu0 %v4518_v7  ;;  %3754 = vmatpush1.bf16.msra.mxu1 %v4511_v8  ;;  %v148_v7 = vrot.slane %v5306_v47, %v147_v57 }
  0xaf   :  { %3755 = vmatprep.subr.bf16.mxu1 %v4520_v11 }
  0xb1   :  { %3584 = vmatpush1.bf16.msra.mxu0 %v4517_v12 }
  0xb2   :  { %3585 = vmatprep.subr.bf16.mxu0 %v4526_v15  ;;  %3756 = vmatpush1.bf16.msra.mxu1 %v4519_v16  ;;  %v585_v16 = vld [vmem:[#allocation8 + $0x460] sm:$0xff] }
  0xb3   :  { %3757 = vmatprep.subr.bf16.mxu1 %v4528_v17  ;;  %v582_v17 = vld [vmem:[#allocation8 + $0x448] sm:$0xff] }
  0xb5   :  { %3586 = vmatpush1.bf16.msra.mxu0 %v4525_v18  ;;  %v586_v18 = vld [vmem:[#allocation8 + $0x468] sm:$0xff] }
  0xb6   :  { %3758 = vmatpush1.bf16.msra.mxu1 %v4527_v19  ;;  %3587 = vmatprep.subr.bf16.mxu0 %v4534_v23 }
  0xb7   :  { %3759 = vmatprep.subr.bf16.mxu1 %v4536_v27  ;;  %v4560_v27 = vcombine.high %v582_v17, %v586_v18 }
  0xb9   :  { %3588 = vmatpush1.bf16.msra.mxu0 %v4533_v25 }
  0xba   :  { %3760 = vmatpush1.bf16.msra.mxu1 %v4535_v26  ;;  %3589 = vmatprep.subr.bf16.mxu0 %v4542_v31  ;;  %v4558_v26 = vcombine.high %v581_v10, %v585_v16 }
  0xbb   :  { %3761 = vmatprep.subr.bf16.mxu1 %v4544_v35 }
  0xbd   :  { %3590 = vmatpush1.bf16.msra.mxu0 %v4541_v33  ;;  %v590_v33 = vld [vmem:[#allocation8 + $0x488] sm:$0xff] }
  0xbe   :  { %3762 = vmatpush1.bf16.msra.mxu1 %v4543_v34  ;;  %3602 = vmatprep.subr.bf16.mxu0 %v4550_v39  ;;  %v594_v34 = vld [vmem:[#allocation8 + $0x4a8] sm:$0xff] }
  0xbf   :  { %3774 = vmatprep.subr.bf16.mxu1 %v4552_v43  ;;  %v4567_v40 = vcombine.low %v590_v33, %v594_v34 }
 0x14b   :  { %v283_v54 = vpop.f32.mrb[0].mxu0  ;;  %v326_v62 = vpop.f32.mrb[0].mxu1 }
 0x14c   :  { %v284_v58 = vadd.f32 %v283_v54, %v128_v51  ;;  %v285_v59 = vpop.f32.mrb[1].mxu0  ;;  %v327_v1 = vadd.f32 %v326_v62, %v136_v53  ;;  %v328_v2 = vpop.f32.mrb[1].mxu1  ;;  %v4559_v54 = vcombine.low %v582_v17, %v586_v18 }
 0x14d   :  { %v286_v60 = vadd.f32 %v285_v59, %v132_v52  ;;  %v287_v61 = vpop.f32.mrb[2].mxu0  ;;  %v329_v4 = vadd.f32 %v328_v2, %v140_v55  ;;  %v330_v5 = vpop.f32.mrb[2].mxu1  ;;  %v4566_v59 = vcombine.high %v589_v28, %v593_v32 }
 0x14e   :  { %v288_v63 = vadd.f32 %v287_v61, %v128_v51  ;;  %v289_v0 = vpop.f32.mrb[3].mxu0  ;;  %v421_v8 = vmax.f32 %v284_v58, 0.0  ;;  %v423_v11 = vmax.f32 %v327_v1, 0.0  ;;  %v331_v12 = vadd.f32 %v330_v5, %v136_v53  ;;  %v332_v13 = vpop.f32.mrb[3].mxu1  ;;  %v597_v61 = vld [vmem:[#allocation8 + $0x4c0] sm:$0xff]  ;;  %v602_v1 = vld [vmem:[#allocation8 + $0x4e8] sm:$0xff] }
 0x14f   :  { %v290_v3 = vadd.f32 %v289_v0, %v132_v52  ;;  %v422_v14 = vmax.f32 %v286_v60, 0.0  ;;  %v424_v19 = vmax.f32 %v329_v4, 0.0  ;;  %v333_v20 = vadd.f32 %v332_v13, %v140_v55  ;;  %v598_v0 = vld [vmem:[#allocation8 + $0x4c8] sm:$0xff]  ;;  %v609_v4 = vld [vmem:[#allocation8 + $0x520] sm:$0xff] }
 0x150   :  { %v429_v9 = vmax.f32 %v288_v63, 0.0  ;;  %v431_v22 = vmax.f32 %v331_v12, 0.0  ;;  %v4557_v53 = vcombine.low %v581_v10, %v585_v16  ;;  %v4568_v60 = vcombine.high %v590_v33, %v594_v34  ;;  %v601_v63 = vld [vmem:[#allocation8 + $0x4e0] sm:$0xff]  ;;  %v606_v5 = vld [vmem:[#allocation8 + $0x508] sm:$0xff] }
 0x151   :  { %v430_v15 = vmax.f32 %v290_v3, 0.0  ;;  %v432_v24 = vmax.f32 %v333_v20, 0.0  ;;  %v4576_v2 = vcombine.high %v598_v0, %v602_v1  ;;  %v605_v3 = vld [vmem:[#allocation8 + $0x500] sm:$0xff]  ;;  %v614_v13 = vld [vmem:[#allocation8 + $0x548] sm:$0xff] }
 0x152   :  { %v5332_v21 = vpack.c.bf16 %v429_v9, %v421_v8  ;;  %v5336_v29 = vpack.c.bf16 %v431_v22, %v423_v11  ;;  %v4575_v8 = vcombine.low %v598_v0, %v602_v1  ;;  %v4582_v9 = vcombine.high %v605_v3, %v609_v4  ;;  %v613_v11 = vld [vmem:[#allocation8 + $0x540] sm:$0xff]  ;;  %v622_v22 = vld [vmem:[#allocation8 + $0x588] sm:$0xff] }
 0x153   :  { %v5334_v23 = vpack.c.bf16 %v430_v15, %v422_v14  ;;  %v369_v25 = vpop.f32.mrb[4].mxu0  ;;  %v5340_v35 = vpack.c.bf16 %v432_v24, %v424_v19  ;;  %v617_v12 = vld [vmem:[#allocation8 + $0x560] sm:$0xff]  ;;  %v618_v14 = vld [vmem:[#allocation8 + $0x568] sm:$0xff]  ;;  %v4581_v15 = vcombine.low %v605_v3, %v609_v4 }
 0x154   :  { %v370_v30 = vadd.f32 %v369_v25, %v144_v6  ;;  %v371_v31 = vpop.f32.mrb[5].mxu0  ;;  %v4590_v17 = vcombine.high %v613_v11, %v617_v12  ;;  %v4592_v18 = vcombine.high %v614_v13, %v618_v14  ;;  %v621_v19 = vld [vmem:[#allocation8 + $0x580] sm:$0xff]  ;;  %v626_v24 = vld [vmem:[#allocation8 + $0x5a8] sm:$0xff]  ;;  %v4589_v25 = vcombine.low %v613_v11, %v617_v12  ;;  %v412_v32 = vpop.f32.mrb[4].mxu1 }
 0x155   :  { %3591 = vmatprep.mubr.bf16.mxu0 %v5334_v23  ;;  %3763 = vmatprep.mubr.bf16.mxu1 %v5334_v23  ;;  %v372_v39 = vadd.f32 %v371_v31, %v148_v7  ;;  %v373_v43 = vpop.f32.mrb[6].mxu0  ;;  %v625_v20 = vld [vmem:[#allocation8 + $0x5a0] sm:$0xff]  ;;  %v4600_v28 = vcombine.high %v622_v22, %v626_v24  ;;  %v5357_v31 = vsub.s32 6, %v5301_v45  ;;  %v630_v34 = vld [vmem:[#allocation8 + $0x5c8] sm:$0xff] }
 0x156   :  { %3592 = vmatmul.mubr.bf16.vlgmr.msra.gmra.mrb[8].mxu0 %v5332_v21  ;;  %3764 = vmatmul.mubr.bf16.vlgmr.msra.gmra.mrb[8].mxu1 %v5332_v21  ;;  %v425_v44 = vmax.f32 %v370_v30, 0.0  ;;  %v374_v51 = vadd.f32 %v373_v43, %v144_v6  ;;  %v375_v52 = vpop.f32.mrb[7].mxu0  ;;  %v610_v6 = vld [vmem:[#allocation8 + $0x528] sm:$0xff]  ;;  %v629_v30 = vld [vmem:[#allocation8 + $0x5c0] sm:$0xff] }
 0x157   :  { %3603 = vmatpush1.bf16.msra.mxu0 %v4549_v41  ;;  %3775 = vmatpush1.bf16.msra.mxu1 %v4551_v42  ;;  %v426_v55 = vmax.f32 %v372_v39, 0.0  ;;  %v376_v58 = vadd.f32 %v375_v52, %v148_v7  ;;  %v4574_v42 = vcombine.high %v597_v61, %v601_v63  ;;  %v4573_v7 = vcombine.low %v597_v61, %v601_v63  ;;  %v633_v33 = vld [vmem:[#allocation8 + $0x5e0] sm:$0xff]  ;;  %v634_v39 = vld [vmem:[#allocation8 + $0x5e8] sm:$0xff] }
 0x158   :  { %3604 = vmatprep.subr.bf16.mxu0 %v4558_v26  ;;  %3776 = vmatprep.subr.bf16.mxu1 %v4560_v27  ;;  %v433_v62 = vmax.f32 %v374_v51, 0.0  ;;  %v4584_v10 = vcombine.high %v606_v5, %v610_v6  ;;  %v4583_v16 = vcombine.low %v606_v5, %v610_v6  ;;  %v4591_v26 = vcombine.low %v614_v13, %v618_v14  ;;  %v641_v61 = vld [vmem:[#allocation8 + $0x620] sm:$0xff]  ;;  %v642_v63 = vld [vmem:[#allocation8 + $0x628] sm:$0xff] }
 0x159   :  { %3634 = vmatprep.mubr.bf16.mxu0 %v5340_v35  ;;  %3806 = vmatprep.mubr.bf16.mxu1 %v5340_v35  ;;  %v434_v36 = vmax.f32 %v376_v58, 0.0  ;;  %v4598_v27 = vcombine.high %v621_v19, %v625_v20  ;;  %v152_v43 = vrot.slane %v5306_v47, %v5357_v31  ;;  %v4599_v51 = vcombine.low %v622_v22, %v626_v24  ;;  %v637_v58 = vld [vmem:[#allocation8 + $0x600] sm:$0xff]  ;;  %v658_v22 = vld [vmem:[#allocation8 + $0x6a8] sm:$0xff] }
 0x15a   :  { %v5352_v37 = vpack.c.bf16 %v433_v62, %v425_v44  ;;  %v4597_v44 = vcombine.low %v621_v19, %v625_v20  ;;  %v155_v52 = vsub.s32 7, %v5301_v45  ;;  %v638_v62 = vld [vmem:[#allocation8 + $0x608] sm:$0xff]  ;;  %v4614_v5 = vcombine.high %v637_v58, %v641_v61  ;;  %v657_v19 = vld [vmem:[#allocation8 + $0x6a0] sm:$0xff] }
 0x15b   :  { %3605 = vmatpush1.bf16.msra.mxu0 %v4557_v53  ;;  %3777 = vmatpush1.bf16.msra.mxu1 %v4559_v54  ;;  %v5354_v41 = vpack.c.bf16 %v434_v36, %v426_v55  ;;  %v414_v53 = vpop.f32.mrb[5].mxu1  ;;  %v4606_v54 = vcombine.high %v629_v30, %v633_v33  ;;  %v4608_v55 = vcombine.high %v630_v34, %v634_v39  ;;  %v654_v20 = vld [vmem:[#allocation8 + $0x688] sm:$0xff] }
 0x15c   :  { %3606 = vmatprep.subr.bf16.mxu0 %v4566_v59  ;;  %3778 = vmatprep.subr.bf16.mxu1 %v4568_v60  ;;  %v413_v59 = vadd.f32 %v412_v32, %v152_v43  ;;  %v416_v60 = vpop.f32.mrb[6].mxu1  ;;  %v156_v0 = vrot.slane %v5306_v47, %v155_v52  ;;  %v4616_v6 = vcombine.high %v638_v62, %v642_v63  ;;  %v662_v32 = vld [vmem:[#allocation8 + $0x6c8] sm:$0xff] }
 0x15d   :  { %v417_v1 = vadd.f32 %v416_v60, %v152_v43  ;;  %v418_v36 = vpop.f32.mrb[7].mxu1  ;;  %v4613_v13 = vcombine.low %v637_v58, %v641_v61  ;;  %v4615_v14 = vcombine.low %v638_v62, %v642_v63  ;;  %v677_v62 = vld [vmem:[#allocation8 + $0x740] sm:$0xff] }
 0x15e   :  { %v419_v4 = vadd.f32 %v418_v36, %v156_v0  ;;  %v681_v63 = vld [vmem:[#allocation8 + $0x760] sm:$0xff] }
 0x15f   :  { %3607 = vmatpush1.bf16.msra.mxu0 %v4565_v38  ;;  %3779 = vmatpush1.bf16.msra.mxu1 %v4567_v40  ;;  %v4605_v38 = vcombine.low %v629_v30, %v633_v33  ;;  %v427_v40 = vmax.f32 %v413_v59, 0.0  ;;  %v435_v3 = vmax.f32 %v417_v1, 0.0  ;;  %v665_v30 = vld [vmem:[#allocation8 + $0x6e0] sm:$0xff]  ;;  %v666_v33 = vld [vmem:[#allocation8 + $0x6e8] sm:$0xff] }
 0x160   :  { %3608 = vmatprep.subr.bf16.mxu0 %v4574_v42  ;;  %3780 = vmatprep.subr.bf16.mxu1 %v4576_v2  ;;  %v4607_v42 = vcombine.low %v630_v34, %v634_v39  ;;  %v415_v2 = vadd.f32 %v414_v53, %v156_v0  ;;  %v436_v12 = vmax.f32 %v419_v4, 0.0  ;;  %v4631_v39 = vcombine.low %v654_v20, %v658_v22  ;;  %v673_v53 = vld [vmem:[#allocation8 + $0x720] sm:$0xff]  ;;  %v678_v0 = vld [vmem:[#allocation8 + $0x748] sm:$0xff] }
 0x161   :  { %v5365_v47 = vpack.c.bf16 %v435_v3, %v427_v40  ;;  %v4639_v59 = vcombine.low %v662_v32, %v666_v33  ;;  %v682_v1 = vld [vmem:[#allocation8 + $0x768] sm:$0xff]  ;;  %v4654_v40 = vcombine.high %v677_v62, %v681_v63  ;;  %v689_v3 = vld [vmem:[#allocation8 + $0x7a0] sm:$0xff] }
 0x162   :  { %v428_v11 = vmax.f32 %v415_v2, 0.0  ;;  %v685_v2 = vld [vmem:[#allocation8 + $0x780] sm:$0xff]  ;;  %v686_v4 = vld [vmem:[#allocation8 + $0x788] sm:$0xff] }
 0x163   :  { %3609 = vmatpush1.bf16.msra.mxu0 %v4573_v7  ;;  %3781 = vmatpush1.bf16.msra.mxu1 %v4575_v8  ;;  %v645_v7 = vld [vmem:[#allocation8 + $0x640] sm:$0xff] }
 0x164   :  { %3610 = vmatprep.subr.bf16.mxu0 %v4582_v9  ;;  %3782 = vmatprep.subr.bf16.mxu1 %v4584_v10  ;;  %v649_v8 = vld [vmem:[#allocation8 + $0x660] sm:$0xff]  ;;  %v646_v9 = vld [vmem:[#allocation8 + $0x648] sm:$0xff] }
 0x165   :  { %v650_v10 = vld [vmem:[#allocation8 + $0x668] sm:$0xff]  ;;  %v4621_v24 = vcombine.low %v645_v7, %v649_v8 }
 0x167   :  { %3611 = vmatpush1.bf16.msra.mxu0 %v4581_v15  ;;  %3783 = vmatpush1.bf16.msra.mxu1 %v4583_v16  ;;  %v5367_v15 = vpack.c.bf16 %v436_v12, %v428_v11  ;;  %v4622_v16 = vcombine.high %v645_v7, %v649_v8  ;;  %v4655_v7 = vcombine.low %v678_v0, %v682_v1  ;;  %v697_v11 = vld [vmem:[#allocation8 + $0x7e0] sm:$0xff]  ;;  %v694_v12 = vld [vmem:[#allocation8 + $0x7c8] sm:$0xff] }
 0x168   :  { %3612 = vmatprep.subr.bf16.mxu0 %v4590_v17  ;;  %3784 = vmatprep.subr.bf16.mxu1 %v4592_v18  ;;  %v4624_v17 = vcombine.high %v646_v9, %v650_v10  ;;  %v653_v18 = vld [vmem:[#allocation8 + $0x680] sm:$0xff]  ;;  %v4662_v8 = vcombine.high %v685_v2, %v689_v3 }
 0x169   :  { %v4629_v34 = vcombine.low %v653_v18, %v657_v19 }
 0x16b   :  { %3613 = vmatpush1.bf16.msra.mxu0 %v4589_v25  ;;  %3785 = vmatpush1.bf16.msra.mxu1 %v4591_v26  ;;  %v4623_v25 = vcombine.low %v646_v9, %v650_v10  ;;  %v4630_v26 = vcombine.high %v653_v18, %v657_v19  ;;  %v693_v10 = vld [vmem:[#allocation8 + $0x7c0] sm:$0xff] }
 0x16c   :  { %3614 = vmatprep.subr.bf16.mxu0 %v4598_v27  ;;  %3786 = vmatprep.subr.bf16.mxu1 %v4600_v28  ;;  %v4632_v27 = vcombine.high %v654_v20, %v658_v22  ;;  %v661_v28 = vld [vmem:[#allocation8 + $0x6c0] sm:$0xff]  ;;  %v702_v22 = vld [vmem:[#allocation8 + $0x808] sm:$0xff] }
 0x16d   :  { %v4638_v43 = vcombine.high %v661_v28, %v665_v30  ;;  %v4637_v58 = vcombine.low %v661_v28, %v665_v30  ;;  %v701_v19 = vld [vmem:[#allocation8 + $0x800] sm:$0xff] }
 0x16e   :  { %v705_v20 = vld [vmem:[#allocation8 + $0x820] sm:$0xff] }
 0x16f   :  { %3615 = vmatpush1.bf16.msra.mxu0 %v4597_v44  ;;  %3787 = vmatpush1.bf16.msra.mxu1 %v4599_v51  ;;  %v4640_v44 = vcombine.high %v662_v32, %v666_v33  ;;  %v669_v51 = vld [vmem:[#allocation8 + $0x700] sm:$0xff]  ;;  %v710_v33 = vld [vmem:[#allocation8 + $0x848] sm:$0xff] }
 0x170   :  { %3616 = vmatprep.subr.bf16.mxu0 %v4606_v54  ;;  %3788 = vmatprep.subr.bf16.mxu1 %v4608_v55  ;;  %v670_v54 = vld [vmem:[#allocation8 + $0x708] sm:$0xff]  ;;  %v4646_v60 = vcombine.high %v669_v51, %v673_v53  ;;  %v4645_v36 = vcombine.low %v669_v51, %v673_v53  ;;  %v709_v30 = vld [vmem:[#allocation8 + $0x840] sm:$0xff] }
 0x171   :  { %v674_v55 = vld [vmem:[#allocation8 + $0x728] sm:$0xff]  ;;  %v713_v32 = vld [vmem:[#allocation8 + $0x860] sm:$0xff] }
 0x172   :  { %v4648_v61 = vcombine.high %v670_v54, %v674_v55  ;;  %v717_v53 = vld [vmem:[#allocation8 + $0x880] sm:$0xff] }
 0x173   :  { %3617 = vmatpush1.bf16.msra.mxu0 %v4605_v38  ;;  %3789 = vmatpush1.bf16.msra.mxu1 %v4607_v42  ;;  %v4647_v38 = vcombine.low %v670_v54, %v674_v55  ;;  %v4656_v42 = vcombine.high %v678_v0, %v682_v1  ;;  %v721_v54 = vld [vmem:[#allocation8 + $0x8a0] sm:$0xff]  ;;  %v718_v55 = vld [vmem:[#allocation8 + $0x888] sm:$0xff] }
 0x174   :  { %3618 = vmatprep.subr.bf16.mxu0 %v4614_v5  ;;  %3790 = vmatprep.subr.bf16.mxu1 %v4616_v6  ;;  %v690_v5 = vld [vmem:[#allocation8 + $0x7a8] sm:$0xff]  ;;  %v4653_v6 = vcombine.low %v677_v62, %v681_v63  ;;  %v725_v63 = vld [vmem:[#allocation8 + $0x8c0] sm:$0xff] }
 0x175   :  { %v4664_v9 = vcombine.high %v686_v4, %v690_v5  ;;  %v729_v0 = vld [vmem:[#allocation8 + $0x8e0] sm:$0xff]  ;;  %v726_v1 = vld [vmem:[#allocation8 + $0x8c8] sm:$0xff] }
 0x177   :  { %3619 = vmatpush1.bf16.msra.mxu0 %v4613_v13  ;;  %3791 = vmatpush1.bf16.msra.mxu1 %v4615_v14  ;;  %v698_v13 = vld [vmem:[#allocation8 + $0x7e8] sm:$0xff]  ;;  %v4661_v14 = vcombine.low %v685_v2, %v689_v3  ;;  %v733_v3 = vld [vmem:[#allocation8 + $0x900] sm:$0xff] }
 0x178   :  { %3620 = vmatprep.subr.bf16.mxu0 %v4622_v16  ;;  %3792 = vmatprep.subr.bf16.mxu1 %v4624_v17  ;;  %v4663_v16 = vcombine.low %v686_v4, %v690_v5  ;;  %v4670_v17 = vcombine.high %v693_v10, %v697_v11  ;;  %v4672_v18 = vcombine.high %v694_v12, %v698_v13  ;;  %v737_v4 = vld [vmem:[#allocation8 + $0x920] sm:$0xff]  ;;  %v734_v5 = vld [vmem:[#allocation8 + $0x908] sm:$0xff] }
 0x17b   :  { %3621 = vmatpush1.bf16.msra.mxu0 %v4621_v24  ;;  %3793 = vmatpush1.bf16.msra.mxu1 %v4623_v25  ;;  %v706_v24 = vld [vmem:[#allocation8 + $0x828] sm:$0xff]  ;;  %v4669_v25 = vcombine.low %v693_v10, %v697_v11  ;;  %v741_v11 = vld [vmem:[#allocation8 + $0x940] sm:$0xff] }
 0x17c   :  { %3622 = vmatprep.subr.bf16.mxu0 %v4630_v26  ;;  %3794 = vmatprep.subr.bf16.mxu1 %v4632_v27  ;;  %v4671_v26 = vcombine.low %v694_v12, %v698_v13  ;;  %v4678_v27 = vcombine.high %v701_v19, %v705_v20  ;;  %v4680_v28 = vcombine.high %v702_v22, %v706_v24  ;;  %v745_v12 = vld [vmem:[#allocation8 + $0x960] sm:$0xff]  ;;  %v742_v13 = vld [vmem:[#allocation8 + $0x948] sm:$0xff] }
 0x17f   :  { %3623 = vmatpush1.bf16.msra.mxu0 %v4629_v34  ;;  %3795 = vmatpush1.bf16.msra.mxu1 %v4631_v39  ;;  %v714_v34 = vld [vmem:[#allocation8 + $0x868] sm:$0xff]  ;;  %v4677_v39 = vcombine.low %v701_v19, %v705_v20  ;;  %v749_v20 = vld [vmem:[#allocation8 + $0x980] sm:$0xff] }
 0x180   :  { %3624 = vmatprep.subr.bf16.mxu0 %v4638_v43  ;;  %3796 = vmatprep.subr.bf16.mxu1 %v4640_v44  ;;  %v4679_v43 = vcombine.low %v702_v22, %v706_v24  ;;  %v4686_v44 = vcombine.high %v709_v30, %v713_v32  ;;  %v4688_v51 = vcombine.high %v710_v33, %v714_v34  ;;  %v753_v22 = vld [vmem:[#allocation8 + $0x9a0] sm:$0xff]  ;;  %v750_v24 = vld [vmem:[#allocation8 + $0x988] sm:$0xff] }
 0x183   :  { %3625 = vmatpush1.bf16.msra.mxu0 %v4637_v58  ;;  %3797 = vmatpush1.bf16.msra.mxu1 %v4639_v59  ;;  %v722_v58 = vld [vmem:[#allocation8 + $0x8a8] sm:$0xff]  ;;  %v4685_v59 = vcombine.low %v709_v30, %v713_v32  ;;  %v757_v32 = vld [vmem:[#allocation8 + $0x9c0] sm:$0xff] }
 0x184   :  { %3626 = vmatprep.subr.bf16.mxu0 %v4646_v60  ;;  %3798 = vmatprep.subr.bf16.mxu1 %v4648_v61  ;;  %v4687_v60 = vcombine.low %v710_v33, %v714_v34  ;;  %v4694_v61 = vcombine.high %v717_v53, %v721_v54  ;;  %v4696_v62 = vcombine.high %v718_v55, %v722_v58  ;;  %v761_v33 = vld [vmem:[#allocation8 + $0x9e0] sm:$0xff]  ;;  %v758_v34 = vld [vmem:[#allocation8 + $0x9c8] sm:$0xff] }
 0x187   :  { %3627 = vmatpush1.bf16.msra.mxu0 %v4645_v36  ;;  %3799 = vmatpush1.bf16.msra.mxu1 %v4647_v38  ;;  %v730_v36 = vld [vmem:[#allocation8 + $0x8e8] sm:$0xff]  ;;  %v4693_v38 = vcombine.low %v717_v53, %v721_v54  ;;  %v765_v54 = vld [vmem:[#allocation8 + $0xa00] sm:$0xff] }
 0x188   :  { %3628 = vmatprep.subr.bf16.mxu0 %v4654_v40  ;;  %3800 = vmatprep.subr.bf16.mxu1 %v4656_v42  ;;  %v4695_v40 = vcombine.low %v718_v55, %v722_v58  ;;  %v4702_v42 = vcombine.high %v725_v63, %v729_v0  ;;  %v4704_v2 = vcombine.high %v726_v1, %v730_v36  ;;  %v769_v55 = vld [vmem:[#allocation8 + $0xa20] sm:$0xff]  ;;  %v766_v58 = vld [vmem:[#allocation8 + $0xa08] sm:$0xff] }
 0x18b   :  { %3629 = vmatpush1.bf16.msra.mxu0 %v4653_v6  ;;  %3801 = vmatpush1.bf16.msra.mxu1 %v4655_v7  ;;  %v738_v6 = vld [vmem:[#allocation8 + $0x928] sm:$0xff]  ;;  %v4701_v7 = vcombine.low %v725_v63, %v729_v0  ;;  %v773_v0 = vld [vmem:[#allocation8 + $0xa40] sm:$0xff] }
 0x18c   :  { %3630 = vmatprep.subr.bf16.mxu0 %v4662_v8  ;;  %3802 = vmatprep.subr.bf16.mxu1 %v4664_v9  ;;  %v4703_v8 = vcombine.low %v726_v1, %v730_v36  ;;  %v4710_v9 = vcombine.high %v733_v3, %v737_v4  ;;  %v4712_v10 = vcombine.high %v734_v5, %v738_v6  ;;  %v777_v1 = vld [vmem:[#allocation8 + $0xa60] sm:$0xff]  ;;  %v774_v36 = vld [vmem:[#allocation8 + $0xa48] sm:$0xff] }
 0x18f   :  { %3631 = vmatpush1.bf16.msra.mxu0 %v4661_v14  ;;  %3803 = vmatpush1.bf16.msra.mxu1 %v4663_v16  ;;  %v746_v14 = vld [vmem:[#allocation8 + $0x968] sm:$0xff]  ;;  %v4709_v16 = vcombine.low %v733_v3, %v737_v4  ;;  %v781_v4 = vld [vmem:[#allocation8 + $0xa80] sm:$0xff] }
 0x190   :  { %3632 = vmatprep.subr.bf16.mxu0 %v4670_v17  ;;  %3804 = vmatprep.subr.bf16.mxu1 %v4672_v18  ;;  %v4711_v17 = vcombine.low %v734_v5, %v738_v6  ;;  %v4718_v18 = vcombine.high %v741_v11, %v745_v12  ;;  %v4720_v19 = vcombine.high %v742_v13, %v746_v14  ;;  %v785_v5 = vld [vmem:[#allocation8 + $0xaa0] sm:$0xff]  ;;  %v782_v6 = vld [vmem:[#allocation8 + $0xa88] sm:$0xff] }
 0x193   :  { %3633 = vmatpush1.bf16.msra.mxu0 %v4669_v25  ;;  %3805 = vmatpush1.bf16.msra.mxu1 %v4671_v26  ;;  %v754_v25 = vld [vmem:[#allocation8 + $0x9a8] sm:$0xff]  ;;  %v4717_v26 = vcombine.low %v741_v11, %v745_v12  ;;  %v789_v12 = vld [vmem:[#allocation8 + $0xac0] sm:$0xff] }
 0x194   :  { %3645 = vmatprep.subr.bf16.mxu0 %v4678_v27  ;;  %3817 = vmatprep.subr.bf16.mxu1 %v4680_v28  ;;  %v4719_v27 = vcombine.low %v742_v13, %v746_v14  ;;  %v4726_v28 = vcombine.high %v749_v20, %v753_v22  ;;  %v4728_v30 = vcombine.high %v750_v24, %v754_v25  ;;  %v793_v13 = vld [vmem:[#allocation8 + $0xae0] sm:$0xff]  ;;  %v790_v14 = vld [vmem:[#allocation8 + $0xac8] sm:$0xff] }
 0x196   :  { %3635 = vmatmul.mubr.bf16.vlgmr.msra.gmra.mrb[8].mxu0 %v5336_v29  ;;  %3807 = vmatmul.mubr.bf16.vlgmr.msra.gmra.mrb[8].mxu1 %v5336_v29 }
 0x197   :  { %3646 = vmatpush1.bf16.msra.mxu0 %v4677_v39  ;;  %3818 = vmatpush1.bf16.msra.mxu1 %v4679_v43  ;;  %v762_v39 = vld [vmem:[#allocation8 + $0x9e8] sm:$0xff]  ;;  %v4725_v43 = vcombine.low %v749_v20, %v753_v22  ;;  %v797_v22 = vld [vmem:[#allocation8 + $0xb00] sm:$0xff] }
 0x198   :  { %3647 = vmatprep.subr.bf16.mxu0 %v4686_v44  ;;  %3819 = vmatprep.subr.bf16.mxu1 %v4688_v51  ;;  %v4727_v44 = vcombine.low %v750_v24, %v754_v25  ;;  %v4734_v51 = vcombine.high %v757_v32, %v761_v33  ;;  %v4736_v53 = vcombine.high %v758_v34, %v762_v39  ;;  %v801_v24 = vld [vmem:[#allocation8 + $0xb20] sm:$0xff]  ;;  %v798_v25 = vld [vmem:[#allocation8 + $0xb08] sm:$0xff] }
 0x199   :  { %3677 = vmatprep.mubr.bf16.mxu0 %v5354_v41  ;;  %3849 = vmatprep.mubr.bf16.mxu1 %v5354_v41 }
 0x19b   :  { %3648 = vmatpush1.bf16.msra.mxu0 %v4685_v59  ;;  %3820 = vmatpush1.bf16.msra.mxu1 %v4687_v60  ;;  %v770_v59 = vld [vmem:[#allocation8 + $0xa28] sm:$0xff]  ;;  %v4733_v60 = vcombine.low %v757_v32, %v761_v33  ;;  %v805_v33 = vld [vmem:[#allocation8 + $0xb40] sm:$0xff] }
 0x19c   :  { %3649 = vmatprep.subr.bf16.mxu0 %v4694_v61  ;;  %3821 = vmatprep.subr.bf16.mxu1 %v4696_v62  ;;  %v4735_v61 = vcombine.low %v758_v34, %v762_v39  ;;  %v4742_v62 = vcombine.high %v765_v54, %v769_v55  ;;  %v4744_v63 = vcombine.high %v766_v58, %v770_v59  ;;  %v809_v34 = vld [vmem:[#allocation8 + $0xb60] sm:$0xff]  ;;  %v806_v39 = vld [vmem:[#allocation8 + $0xb48] sm:$0xff] }
 0x19f   :  { %3650 = vmatpush1.bf16.msra.mxu0 %v4693_v38  ;;  %3822 = vmatpush1.bf16.msra.mxu1 %v4695_v40  ;;  %v778_v38 = vld [vmem:[#allocation8 + $0xa68] sm:$0xff]  ;;  %v4741_v40 = vcombine.low %v765_v54, %v769_v55  ;;  %v813_v55 = vld [vmem:[#allocation8 + $0xb80] sm:$0xff] }
 0x1a0   :  { %3651 = vmatprep.subr.bf16.mxu0 %v4702_v42  ;;  %3823 = vmatprep.subr.bf16.mxu1 %v4704_v2  ;;  %v4743_v42 = vcombine.low %v766_v58, %v770_v59  ;;  %v4750_v2 = vcombine.high %v773_v0, %v777_v1  ;;  %v4752_v3 = vcombine.high %v774_v36, %v778_v38  ;;  %v817_v58 = vld [vmem:[#allocation8 + $0xba0] sm:$0xff]  ;;  %v814_v59 = vld [vmem:[#allocation8 + $0xb88] sm:$0xff] }
 0x1a3   :  { %3652 = vmatpush1.bf16.msra.mxu0 %v4701_v7  ;;  %3824 = vmatpush1.bf16.msra.mxu1 %v4703_v8  ;;  %v786_v7 = vld [vmem:[#allocation8 + $0xaa8] sm:$0xff]  ;;  %v4749_v8 = vcombine.low %v773_v0, %v777_v1  ;;  %v821_v1 = vld [vmem:[#allocation8 + $0xbc0] sm:$0xff] }
 0x1a4   :  { %3653 = vmatprep.subr.bf16.mxu0 %v4710_v9  ;;  %3825 = vmatprep.subr.bf16.mxu1 %v4712_v10  ;;  %v4751_v9 = vcombine.low %v774_v36, %v778_v38  ;;  %v4758_v10 = vcombine.high %v781_v4, %v785_v5  ;;  %v4760_v11 = vcombine.high %v782_v6, %v786_v7  ;;  %v825_v36 = vld [vmem:[#allocation8 + $0xbe0] sm:$0xff]  ;;  %v822_v38 = vld [vmem:[#allocation8 + $0xbc8] sm:$0xff] }
 0x1a7   :  { %3654 = vmatpush1.bf16.msra.mxu0 %v4709_v16  ;;  %3826 = vmatpush1.bf16.msra.mxu1 %v4711_v17  ;;  %v794_v16 = vld [vmem:[#allocation8 + $0xae8] sm:$0xff]  ;;  %v4757_v17 = vcombine.low %v781_v4, %v785_v5  ;;  %v829_v5 = vld [vmem:[#allocation8 + $0xc00] sm:$0xff] }
 0x1a8   :  { %3655 = vmatprep.subr.bf16.mxu0 %v4718_v18  ;;  %3827 = vmatprep.subr.bf16.mxu1 %v4720_v19  ;;  %v4759_v18 = vcombine.low %v782_v6, %v786_v7  ;;  %v4766_v19 = vcombine.high %v789_v12, %v793_v13  ;;  %v4768_v20 = vcombine.high %v790_v14, %v794_v16  ;;  %v833_v6 = vld [vmem:[#allocation8 + $0xc20] sm:$0xff]  ;;  %v830_v7 = vld [vmem:[#allocation8 + $0xc08] sm:$0xff] }
 0x1ab   :  { %3656 = vmatpush1.bf16.msra.mxu0 %v4717_v26  ;;  %3828 = vmatpush1.bf16.msra.mxu1 %v4719_v27  ;;  %v802_v26 = vld [vmem:[#allocation8 + $0xb28] sm:$0xff]  ;;  %v4765_v27 = vcombine.low %v789_v12, %v793_v13  ;;  %v837_v13 = vld [vmem:[#allocation8 + $0xc40] sm:$0xff] }
 0x1ac   :  { %3657 = vmatprep.subr.bf16.mxu0 %v4726_v28  ;;  %3829 = vmatprep.subr.bf16.mxu1 %v4728_v30  ;;  %v4767_v28 = vcombine.low %v790_v14, %v794_v16  ;;  %v4774_v30 = vcombine.high %v797_v22, %v801_v24  ;;  %v4776_v32 = vcombine.high %v798_v25, %v802_v26  ;;  %v841_v14 = vld [vmem:[#allocation8 + $0xc60] sm:$0xff]  ;;  %v838_v16 = vld [vmem:[#allocation8 + $0xc48] sm:$0xff] }
 0x1af   :  { %3658 = vmatpush1.bf16.msra.mxu0 %v4725_v43  ;;  %3830 = vmatpush1.bf16.msra.mxu1 %v4727_v44  ;;  %v810_v43 = vld [vmem:[#allocation8 + $0xb68] sm:$0xff]  ;;  %v4773_v44 = vcombine.low %v797_v22, %v801_v24  ;;  %v845_v24 = vld [vmem:[#allocation8 + $0xc80] sm:$0xff] }
 0x1b0   :  { %3659 = vmatprep.subr.bf16.mxu0 %v4734_v51  ;;  %3831 = vmatprep.subr.bf16.mxu1 %v4736_v53  ;;  %v4775_v51 = vcombine.low %v798_v25, %v802_v26  ;;  %v4782_v53 = vcombine.high %v805_v33, %v809_v34  ;;  %v4784_v54 = vcombine.high %v806_v39, %v810_v43  ;;  %v849_v25 = vld [vmem:[#allocation8 + $0xca0] sm:$0xff]  ;;  %v846_v26 = vld [vmem:[#allocation8 + $0xc88] sm:$0xff] }
 0x1b3   :  { %3660 = vmatpush1.bf16.msra.mxu0 %v4733_v60  ;;  %3832 = vmatpush1.bf16.msra.mxu1 %v4735_v61  ;;  %v818_v60 = vld [vmem:[#allocation8 + $0xba8] sm:$0xff]  ;;  %v4781_v61 = vcombine.low %v805_v33, %v809_v34  ;;  %v853_v34 = vld [vmem:[#allocation8 + $0xcc0] sm:$0xff] }
 0x1b4   :  { %3661 = vmatprep.subr.bf16.mxu0 %v4742_v62  ;;  %3833 = vmatprep.subr.bf16.mxu1 %v4744_v63  ;;  %v4783_v62 = vcombine.low %v806_v39, %v810_v43  ;;  %v4790_v63 = vcombine.high %v813_v55, %v817_v58  ;;  %v4792_v0 = vcombine.high %v814_v59, %v818_v60  ;;  %v857_v39 = vld [vmem:[#allocation8 + $0xce0] sm:$0xff]  ;;  %v854_v43 = vld [vmem:[#allocation8 + $0xcc8] sm:$0xff] }
 0x1b7   :  { %3662 = vmatpush1.bf16.msra.mxu0 %v4741_v40  ;;  %3834 = vmatpush1.bf16.msra.mxu1 %v4743_v42  ;;  %v826_v40 = vld [vmem:[#allocation8 + $0xbe8] sm:$0xff]  ;;  %v4789_v42 = vcombine.low %v813_v55, %v817_v58  ;;  %v861_v58 = vld [vmem:[#allocation8 + $0xd00] sm:$0xff] }
 0x1b8   :  { %3663 = vmatprep.subr.bf16.mxu0 %v4750_v2  ;;  %3835 = vmatprep.subr.bf16.mxu1 %v4752_v3  ;;  %v4791_v2 = vcombine.low %v814_v59, %v818_v60  ;;  %v4798_v3 = vcombine.high %v821_v1, %v825_v36  ;;  %v4800_v4 = vcombine.high %v822_v38, %v826_v40  ;;  %v865_v59 = vld [vmem:[#allocation8 + $0xd20] sm:$0xff]  ;;  %v862_v60 = vld [vmem:[#allocation8 + $0xd08] sm:$0xff] }
 0x1bb   :  { %3664 = vmatpush1.bf16.msra.mxu0 %v4749_v8  ;;  %3836 = vmatpush1.bf16.msra.mxu1 %v4751_v9  ;;  %v834_v8 = vld [vmem:[#allocation8 + $0xc28] sm:$0xff]  ;;  %v4797_v9 = vcombine.low %v821_v1, %v825_v36  ;;  %v869_v36 = vld [vmem:[#allocation8 + $0xd40] sm:$0xff] }
 0x1bc   :  { %3665 = vmatprep.subr.bf16.mxu0 %v4758_v10  ;;  %3837 = vmatprep.subr.bf16.mxu1 %v4760_v11  ;;  %v4799_v10 = vcombine.low %v822_v38, %v826_v40  ;;  %v4806_v11 = vcombine.high %v829_v5, %v833_v6  ;;  %v4808_v12 = vcombine.high %v830_v7, %v834_v8  ;;  %v873_v38 = vld [vmem:[#allocation8 + $0xd60] sm:$0xff]  ;;  %v870_v40 = vld [vmem:[#allocation8 + $0xd48] sm:$0xff] }
 0x1bf   :  { %3666 = vmatpush1.bf16.msra.mxu0 %v4757_v17  ;;  %3838 = vmatpush1.bf16.msra.mxu1 %v4759_v18  ;;  %v842_v17 = vld [vmem:[#allocation8 + $0xc68] sm:$0xff]  ;;  %v4805_v18 = vcombine.low %v829_v5, %v833_v6  ;;  %v877_v6 = vld [vmem:[#allocation8 + $0xd80] sm:$0xff] }
 0x1c0   :  { %3667 = vmatprep.subr.bf16.mxu0 %v4766_v19  ;;  %3839 = vmatprep.subr.bf16.mxu1 %v4768_v20  ;;  %v4807_v19 = vcombine.low %v830_v7, %v834_v8  ;;  %v4814_v20 = vcombine.high %v837_v13, %v841_v14  ;;  %v4816_v22 = vcombine.high %v838_v16, %v842_v17  ;;  %v881_v7 = vld [vmem:[#allocation8 + $0xda0] sm:$0xff]  ;;  %v878_v8 = vld [vmem:[#allocation8 + $0xd88] sm:$0xff] }
 0x1c3   :  { %3668 = vmatpush1.bf16.msra.mxu0 %v4765_v27  ;;  %3840 = vmatpush1.bf16.msra.mxu1 %v4767_v28  ;;  %v850_v27 = vld [vmem:[#allocation8 + $0xca8] sm:$0xff]  ;;  %v4813_v28 = vcombine.low %v837_v13, %v841_v14  ;;  %v885_v14 = vld [vmem:[#allocation8 + $0xdc0] sm:$0xff] }
 0x1c4   :  { %3669 = vmatprep.subr.bf16.mxu0 %v4774_v30  ;;  %3841 = vmatprep.subr.bf16.mxu1 %v4776_v32  ;;  %v4815_v30 = vcombine.low %v838_v16, %v842_v17  ;;  %v4822_v32 = vcombine.high %v845_v24, %v849_v25  ;;  %v4824_v33 = vcombine.high %v846_v26, %v850_v27  ;;  %v889_v16 = vld [vmem:[#allocation8 + $0xde0] sm:$0xff]  ;;  %v886_v17 = vld [vmem:[#allocation8 + $0xdc8] sm:$0xff] }
 0x1c7   :  { %3670 = vmatpush1.bf16.msra.mxu0 %v4773_v44  ;;  %3842 = vmatpush1.bf16.msra.mxu1 %v4775_v51  ;;  %v858_v44 = vld [vmem:[#allocation8 + $0xce8] sm:$0xff]  ;;  %v4821_v51 = vcombine.low %v845_v24, %v849_v25  ;;  %v893_v25 = vld [vmem:[#allocation8 + $0xe00] sm:$0xff] }
 0x1c8   :  { %3671 = vmatprep.subr.bf16.mxu0 %v4782_v53  ;;  %3843 = vmatprep.subr.bf16.mxu1 %v4784_v54  ;;  %v4823_v53 = vcombine.low %v846_v26, %v850_v27  ;;  %v4830_v54 = vcombine.high %v853_v34, %v857_v39  ;;  %v4832_v55 = vcombine.high %v854_v43, %v858_v44  ;;  %v897_v26 = vld [vmem:[#allocation8 + $0xe20] sm:$0xff]  ;;  %v894_v27 = vld [vmem:[#allocation8 + $0xe08] sm:$0xff] }
 0x1cb   :  { %3672 = vmatpush1.bf16.msra.mxu0 %v4781_v61  ;;  %3844 = vmatpush1.bf16.msra.mxu1 %v4783_v62  ;;  %v866_v61 = vld [vmem:[#allocation8 + $0xd28] sm:$0xff]  ;;  %v4829_v62 = vcombine.low %v853_v34, %v857_v39  ;;  %v901_v39 = vld [vmem:[#allocation8 + $0xe40] sm:$0xff] }
 0x1cc   :  { %3673 = vmatprep.subr.bf16.mxu0 %v4790_v63  ;;  %3845 = vmatprep.subr.bf16.mxu1 %v4792_v0  ;;  %v4831_v63 = vcombine.low %v854_v43, %v858_v44  ;;  %v4838_v0 = vcombine.high %v861_v58, %v865_v59  ;;  %v4840_v1 = vcombine.high %v862_v60, %v866_v61  ;;  %v905_v43 = vld [vmem:[#allocation8 + $0xe60] sm:$0xff]  ;;  %v902_v44 = vld [vmem:[#allocation8 + $0xe48] sm:$0xff] }
 0x1cf   :  { %3674 = vmatpush1.bf16.msra.mxu0 %v4789_v42  ;;  %3846 = vmatpush1.bf16.msra.mxu1 %v4791_v2  ;;  %v874_v42 = vld [vmem:[#allocation8 + $0xd68] sm:$0xff]  ;;  %v4837_v2 = vcombine.low %v861_v58, %v865_v59  ;;  %v909_v59 = vld [vmem:[#allocation8 + $0xe80] sm:$0xff] }
 0x1d0   :  { %3675 = vmatprep.subr.bf16.mxu0 %v4798_v3  ;;  %3847 = vmatprep.subr.bf16.mxu1 %v4800_v4  ;;  %v4839_v3 = vcombine.low %v862_v60, %v866_v61  ;;  %v4846_v4 = vcombine.high %v869_v36, %v873_v38  ;;  %v4848_v5 = vcombine.high %v870_v40, %v874_v42  ;;  %v913_v60 = vld [vmem:[#allocation8 + $0xea0] sm:$0xff]  ;;  %v910_v61 = vld [vmem:[#allocation8 + $0xe88] sm:$0xff] }
 0x1d3   :  { %3676 = vmatpush1.bf16.msra.mxu0 %v4797_v9  ;;  %3848 = vmatpush1.bf16.msra.mxu1 %v4799_v10  ;;  %v882_v9 = vld [vmem:[#allocation8 + $0xda8] sm:$0xff]  ;;  %v4845_v10 = vcombine.low %v869_v36, %v873_v38  ;;  %v917_v38 = vld [vmem:[#allocation8 + $0xec0] sm:$0xff] }
 0x1d4   :  { %3688 = vmatprep.subr.bf16.mxu0 %v4806_v11  ;;  %3860 = vmatprep.subr.bf16.mxu1 %v4808_v12  ;;  %v4847_v11 = vcombine.low %v870_v40, %v874_v42  ;;  %v4854_v12 = vcombine.high %v877_v6, %v881_v7  ;;  %v4856_v13 = vcombine.high %v878_v8, %v882_v9  ;;  %v921_v40 = vld [vmem:[#allocation8 + $0xee0] sm:$0xff]  ;;  %v918_v42 = vld [vmem:[#allocation8 + $0xec8] sm:$0xff] }
 0x1d6   :  { %3678 = vmatmul.mubr.bf16.vlgmr.msra.gmra.mrb[8].mxu0 %v5352_v37  ;;  %3850 = vmatmul.mubr.bf16.vlgmr.msra.gmra.mrb[8].mxu1 %v5352_v37 }
 0x1d7   :  { %3689 = vmatpush1.bf16.msra.mxu0 %v4805_v18  ;;  %3861 = vmatpush1.bf16.msra.mxu1 %v4807_v19  ;;  %v890_v18 = vld [vmem:[#allocation8 + $0xde8] sm:$0xff]  ;;  %v4853_v19 = vcombine.low %v877_v6, %v881_v7  ;;  %v925_v7 = vld [vmem:[#allocation8 + $0xf00] sm:$0xff] }
 0x1d8   :  { %3690 = vmatprep.subr.bf16.mxu0 %v4814_v20  ;;  %3862 = vmatprep.subr.bf16.mxu1 %v4816_v22  ;;  %v4855_v20 = vcombine.low %v878_v8, %v882_v9  ;;  %v4862_v22 = vcombine.high %v885_v14, %v889_v16  ;;  %v4864_v24 = vcombine.high %v886_v17, %v890_v18  ;;  %v929_v8 = vld [vmem:[#allocation8 + $0xf20] sm:$0xff]  ;;  %v926_v9 = vld [vmem:[#allocation8 + $0xf08] sm:$0xff] }
 0x1d9   :  { %3720 = vmatprep.mubr.bf16.mxu0 %v5367_v15  ;;  %3892 = vmatprep.mubr.bf16.mxu1 %v5367_v15 }
 0x1db   :  { %3691 = vmatpush1.bf16.msra.mxu0 %v4813_v28  ;;  %3863 = vmatpush1.bf16.msra.mxu1 %v4815_v30  ;;  %v898_v28 = vld [vmem:[#allocation8 + $0xe28] sm:$0xff]  ;;  %v4861_v30 = vcombine.low %v885_v14, %v889_v16  ;;  %v933_v16 = vld [vmem:[#allocation8 + $0xf40] sm:$0xff] }
 0x1dc   :  { %3692 = vmatprep.subr.bf16.mxu0 %v4822_v32  ;;  %3864 = vmatprep.subr.bf16.mxu1 %v4824_v33  ;;  %v4863_v32 = vcombine.low %v886_v17, %v890_v18  ;;  %v4870_v33 = vcombine.high %v893_v25, %v897_v26  ;;  %v4872_v34 = vcombine.high %v894_v27, %v898_v28  ;;  %v937_v17 = vld [vmem:[#allocation8 + $0xf60] sm:$0xff]  ;;  %v934_v18 = vld [vmem:[#allocation8 + $0xf48] sm:$0xff] }
 0x1df   :  { %3693 = vmatpush1.bf16.msra.mxu0 %v4821_v51  ;;  %3865 = vmatpush1.bf16.msra.mxu1 %v4823_v53  ;;  %v906_v51 = vld [vmem:[#allocation8 + $0xe68] sm:$0xff]  ;;  %v4869_v53 = vcombine.low %v893_v25, %v897_v26  ;;  %v941_v26 = vld [vmem:[#allocation8 + $0xf80] sm:$0xff] }
 0x1e0   :  { %3694 = vmatprep.subr.bf16.mxu0 %v4830_v54  ;;  %3866 = vmatprep.subr.bf16.mxu1 %v4832_v55  ;;  %v4871_v54 = vcombine.low %v894_v27, %v898_v28  ;;  %v4878_v55 = vcombine.high %v901_v39, %v905_v43  ;;  %v4880_v58 = vcombine.high %v902_v44, %v906_v51  ;;  %v945_v27 = vld [vmem:[#allocation8 + $0xfa0] sm:$0xff]  ;;  %v942_v28 = vld [vmem:[#allocation8 + $0xf88] sm:$0xff] }
 0x1e3   :  { %3695 = vmatpush1.bf16.msra.mxu0 %v4829_v62  ;;  %3867 = vmatpush1.bf16.msra.mxu1 %v4831_v63  ;;  %v914_v62 = vld [vmem:[#allocation8 + $0xea8] sm:$0xff]  ;;  %v4877_v63 = vcombine.low %v901_v39, %v905_v43  ;;  %v949_v43 = vld [vmem:[#allocation8 + $0xfc0] sm:$0xff] }
 0x1e4   :  { %3696 = vmatprep.subr.bf16.mxu0 %v4838_v0  ;;  %3868 = vmatprep.subr.bf16.mxu1 %v4840_v1  ;;  %v4879_v0 = vcombine.low %v902_v44, %v906_v51  ;;  %v4886_v1 = vcombine.high %v909_v59, %v913_v60  ;;  %v4888_v36 = vcombine.high %v910_v61, %v914_v62  ;;  %v953_v44 = vld [vmem:[#allocation8 + $0xfe0] sm:$0xff]  ;;  %v950_v51 = vld [vmem:[#allocation8 + $0xfc8] sm:$0xff] }
 0x1e7   :  { %3697 = vmatpush1.bf16.msra.mxu0 %v4837_v2  ;;  %3869 = vmatpush1.bf16.msra.mxu1 %v4839_v3  ;;  %v922_v2 = vld [vmem:[#allocation8 + $0xee8] sm:$0xff]  ;;  %v4885_v3 = vcombine.low %v909_v59, %v913_v60  ;;  %v447_v60 = vld [vmem:[#allocation8 + $0x10] sm:$0xff] }
 0x1e8   :  { %3698 = vmatprep.subr.bf16.mxu0 %v4846_v4  ;;  %3870 = vmatprep.subr.bf16.mxu1 %v4848_v5  ;;  %v4887_v4 = vcombine.low %v910_v61, %v914_v62  ;;  %v4894_v5 = vcombine.high %v917_v38, %v921_v40  ;;  %v4896_v6 = vcombine.high %v918_v42, %v922_v2  ;;  %v451_v61 = vld [vmem:[#allocation8 + $0x30] sm:$0xff]  ;;  %v448_v62 = vld [vmem:[#allocation8 + $0x18] sm:$0xff] }
 0x1eb   :  { %3699 = vmatpush1.bf16.msra.mxu0 %v4845_v10  ;;  %3871 = vmatpush1.bf16.msra.mxu1 %v4847_v11  ;;  %v930_v10 = vld [vmem:[#allocation8 + $0xf28] sm:$0xff]  ;;  %v4893_v11 = vcombine.low %v917_v38, %v921_v40  ;;  %v455_v40 = vld [vmem:[#allocation8 + $0x50] sm:$0xff] }
 0x1ec   :  { %3700 = vmatprep.subr.bf16.mxu0 %v4854_v12  ;;  %3872 = vmatprep.subr.bf16.mxu1 %v4856_v13  ;;  %v4895_v12 = vcombine.low %v918_v42, %v922_v2  ;;  %v4902_v13 = vcombine.high %v925_v7, %v929_v8  ;;  %v4904_v14 = vcombine.high %v926_v9, %v930_v10  ;;  %v459_v42 = vld [vmem:[#allocation8 + $0x70] sm:$0xff]  ;;  %v456_v2 = vld [vmem:[#allocation8 + $0x58] sm:$0xff] }
 0x1ef   :  { %3701 = vmatpush1.bf16.msra.mxu0 %v4853_v19  ;;  %3873 = vmatpush1.bf16.msra.mxu1 %v4855_v20  ;;  %v938_v19 = vld [vmem:[#allocation8 + $0xf68] sm:$0xff]  ;;  %v4901_v20 = vcombine.low %v925_v7, %v929_v8  ;;  %v463_v8 = vld [vmem:[#allocation8 + $0x90] sm:$0xff] }
 0x1f0   :  { %3702 = vmatprep.subr.bf16.mxu0 %v4862_v22  ;;  %3874 = vmatprep.subr.bf16.mxu1 %v4864_v24  ;;  %v4903_v22 = vcombine.low %v926_v9, %v930_v10  ;;  %v4910_v24 = vcombine.high %v933_v16, %v937_v17  ;;  %v4912_v25 = vcombine.high %v934_v18, %v938_v19  ;;  %v467_v9 = vld [vmem:[#allocation8 + $0xb0] sm:$0xff]  ;;  %v464_v10 = vld [vmem:[#allocation8 + $0x98] sm:$0xff] }
 0x1f3   :  { %3703 = vmatpush1.bf16.msra.mxu0 %v4861_v30  ;;  %3875 = vmatpush1.bf16.msra.mxu1 %v4863_v32  ;;  %v946_v30 = vld [vmem:[#allocation8 + $0xfa8] sm:$0xff]  ;;  %v4909_v32 = vcombine.low %v933_v16, %v937_v17  ;;  %v471_v17 = vld [vmem:[#allocation8 + $0xd0] sm:$0xff] }
 0x1f4   :  { %3704 = vmatprep.subr.bf16.mxu0 %v4870_v33  ;;  %3876 = vmatprep.subr.bf16.mxu1 %v4872_v34  ;;  %v4911_v33 = vcombine.low %v934_v18, %v938_v19  ;;  %v4918_v34 = vcombine.high %v941_v26, %v945_v27  ;;  %v4920_v39 = vcombine.high %v942_v28, %v946_v30  ;;  %v475_v18 = vld [vmem:[#allocation8 + $0xf0] sm:$0xff]  ;;  %v472_v19 = vld [vmem:[#allocation8 + $0xd8] sm:$0xff] }
 0x1f7   :  { %3705 = vmatpush1.bf16.msra.mxu0 %v4869_v53  ;;  %3877 = vmatpush1.bf16.msra.mxu1 %v4871_v54  ;;  %v954_v53 = vld [vmem:[#allocation8 + $0xfe8] sm:$0xff]  ;;  %v4917_v54 = vcombine.low %v941_v26, %v945_v27  ;;  %v479_v27 = vld [vmem:[#allocation8 + $0x110] sm:$0xff] }
 0x1f8   :  { %3706 = vmatprep.subr.bf16.mxu0 %v4878_v55  ;;  %3878 = vmatprep.subr.bf16.mxu1 %v4880_v58  ;;  %v4919_v55 = vcombine.low %v942_v28, %v946_v30  ;;  %v4926_v58 = vcombine.high %v949_v43, %v953_v44  ;;  %v4928_v59 = vcombine.high %v950_v51, %v954_v53  ;;  %v483_v28 = vld [vmem:[#allocation8 + $0x130] sm:$0xff]  ;;  %v484_v30 = vld [vmem:[#allocation8 + $0x138] sm:$0xff] }
 0x1fb   :  { %3707 = vmatpush1.bf16.msra.mxu0 %v4877_v63  ;;  %3879 = vmatpush1.bf16.msra.mxu1 %v4879_v0  ;;  %v452_v63 = vld [vmem:[#allocation8 + $0x38] sm:$0xff]  ;;  %v4925_v0 = vcombine.low %v949_v43, %v953_v44  ;;  %v487_v43 = vld [vmem:[#allocation8 + $0x150] sm:$0xff] }
 0x1fc   :  { %3708 = vmatprep.subr.bf16.mxu0 %v4886_v1  ;;  %3880 = vmatprep.subr.bf16.mxu1 %v4888_v36  ;;  %v4927_v1 = vcombine.low %v950_v51, %v954_v53  ;;  %v4426_v36 = vcombine.high %v447_v60, %v451_v61  ;;  %v4428_v38 = vcombine.high %v448_v62, %v452_v63  ;;  %v491_v44 = vld [vmem:[#allocation8 + $0x170] sm:$0xff]  ;;  %v488_v51 = vld [vmem:[#allocation8 + $0x158] sm:$0xff] }
 0x1fd   :  { %v492_v53 = vld [vmem:[#allocation8 + $0x178] sm:$0xff] }
 0x1ff   :  { %3709 = vmatpush1.bf16.msra.mxu0 %v4885_v3  ;;  %3881 = vmatpush1.bf16.msra.mxu1 %v4887_v4  ;;  %v460_v3 = vld [vmem:[#allocation8 + $0x78] sm:$0xff]  ;;  %v4425_v4 = vcombine.low %v447_v60, %v451_v61  ;;  %v495_v60 = vld [vmem:[#allocation8 + $0x190] sm:$0xff] }
 0x200   :  { %3710 = vmatprep.subr.bf16.mxu0 %v4894_v5  ;;  %3882 = vmatprep.subr.bf16.mxu1 %v4896_v6  ;;  %v4427_v5 = vcombine.low %v448_v62, %v452_v63  ;;  %v4434_v6 = vcombine.high %v455_v40, %v459_v42  ;;  %v4436_v7 = vcombine.high %v456_v2, %v460_v3  ;;  %v499_v61 = vld [vmem:[#allocation8 + $0x1b0] sm:$0xff]  ;;  %v496_v62 = vld [vmem:[#allocation8 + $0x198] sm:$0xff] }
 0x201   :  { %v500_v63 = vld [vmem:[#allocation8 + $0x1b8] sm:$0xff] }
 0x203   :  { %3711 = vmatpush1.bf16.msra.mxu0 %v4893_v11  ;;  %3883 = vmatpush1.bf16.msra.mxu1 %v4895_v12  ;;  %v468_v11 = vld [vmem:[#allocation8 + $0xb8] sm:$0xff]  ;;  %v4433_v12 = vcombine.low %v455_v40, %v459_v42  ;;  %v503_v40 = vld [vmem:[#allocation8 + $0x1d0] sm:$0xff] }
 0x204   :  { %3712 = vmatprep.subr.bf16.mxu0 %v4902_v13  ;;  %3884 = vmatprep.subr.bf16.mxu1 %v4904_v14  ;;  %v4435_v13 = vcombine.low %v456_v2, %v460_v3  ;;  %v4442_v14 = vcombine.high %v463_v8, %v467_v9  ;;  %v4444_v16 = vcombine.high %v464_v10, %v468_v11  ;;  %v507_v42 = vld [vmem:[#allocation8 + $0x1f0] sm:$0xff]  ;;  %v504_v2 = vld [vmem:[#allocation8 + $0x1d8] sm:$0xff] }
 0x205   :  { %v508_v3 = vld [vmem:[#allocation8 + $0x1f8] sm:$0xff] }
 0x207   :  { %3713 = vmatpush1.bf16.msra.mxu0 %v4901_v20  ;;  %3885 = vmatpush1.bf16.msra.mxu1 %v4903_v22  ;;  %v476_v20 = vld [vmem:[#allocation8 + $0xf8] sm:$0xff]  ;;  %v4441_v22 = vcombine.low %v463_v8, %v467_v9  ;;  %v511_v8 = vld [vmem:[#allocation8 + $0x210] sm:$0xff] }
 0x208   :  { %3714 = vmatprep.subr.bf16.mxu0 %v4910_v24  ;;  %3886 = vmatprep.subr.bf16.mxu1 %v4912_v25  ;;  %v4443_v24 = vcombine.low %v464_v10, %v468_v11  ;;  %v4450_v25 = vcombine.high %v471_v17, %v475_v18  ;;  %v4452_v26 = vcombine.high %v472_v19, %v476_v20  ;;  %v515_v9 = vld [vmem:[#allocation8 + $0x230] sm:$0xff]  ;;  %v512_v10 = vld [vmem:[#allocation8 + $0x218] sm:$0xff] }
 0x209   :  { %v516_v11 = vld [vmem:[#allocation8 + $0x238] sm:$0xff] }
 0x20b   :  { %3715 = vmatpush1.bf16.msra.mxu0 %v4909_v32  ;;  %3887 = vmatpush1.bf16.msra.mxu1 %v4911_v33  ;;  %v4449_v32 = vcombine.low %v471_v17, %v475_v18  ;;  %v4451_v33 = vcombine.low %v472_v19, %v476_v20  ;;  %v519_v17 = vld [vmem:[#allocation8 + $0x250] sm:$0xff]  ;;  %v520_v19 = vld [vmem:[#allocation8 + $0x258] sm:$0xff] }
 0x20c   :  { %3716 = vmatprep.subr.bf16.mxu0 %v4918_v34  ;;  %3888 = vmatprep.subr.bf16.mxu1 %v4920_v39  ;;  %v4458_v34 = vcombine.high %v479_v27, %v483_v28  ;;  %v523_v18 = vld [vmem:[#allocation8 + $0x270] sm:$0xff]  ;;  %v524_v20 = vld [vmem:[#allocation8 + $0x278] sm:$0xff] }
 0x20f   :  { %3717 = vmatpush1.bf16.msra.mxu0 %v4917_v54  ;;  %3889 = vmatpush1.bf16.msra.mxu1 %v4919_v55  ;;  %v4457_v54 = vcombine.low %v479_v27, %v483_v28  ;;  %v527_v27 = vld [vmem:[#allocation8 + $0x290] sm:$0xff] }
 0x210   :  { %3718 = vmatprep.subr.bf16.mxu0 %v4926_v58  ;;  %3890 = vmatprep.subr.bf16.mxu1 %v4928_v59  ;;  %v4466_v58 = vcombine.high %v487_v43, %v491_v44  ;;  %v4468_v59 = vcombine.high %v488_v51, %v492_v53  ;;  %v531_v28 = vld [vmem:[#allocation8 + $0x2b0] sm:$0xff] }
 0x213   :  { %3719 = vmatpush1.bf16.msra.mxu0 %v4925_v0  ;;  %3891 = vmatpush1.bf16.msra.mxu1 %v4927_v1  ;;  %v4465_v0 = vcombine.low %v487_v43, %v491_v44  ;;  %v4467_v1 = vcombine.low %v488_v51, %v492_v53  ;;  %v535_v43 = vld [vmem:[#allocation8 + $0x2d0] sm:$0xff]  ;;  %v536_v51 = vld [vmem:[#allocation8 + $0x2d8] sm:$0xff] }
 0x214   :  { %3903 = vmatprep.subr.bf16.mxu0 %v4426_v36  ;;  %4075 = vmatprep.subr.bf16.mxu1 %v4428_v38  ;;  %v4474_v36 = vcombine.high %v495_v60, %v499_v61  ;;  %v4476_v38 = vcombine.high %v496_v62, %v500_v63  ;;  %v539_v44 = vld [vmem:[#allocation8 + $0x2f0] sm:$0xff]  ;;  %v540_v53 = vld [vmem:[#allocation8 + $0x2f8] sm:$0xff] }
 0x216   :  { %3721 = vmatmul.mubr.bf16.vlgmr.msra.gmra.mrb[8].mxu0 %v5365_v47  ;;  %3893 = vmatmul.mubr.bf16.vlgmr.msra.gmra.mrb[8].mxu1 %v5365_v47 }
 0x217   :  { %3904 = vmatpush1.bf16.msra.mxu0 %v4425_v4  ;;  %3935 = vmatprep.mubr.bf16.mxu0 %v5334_v23  ;;  %v4473_v4 = vcombine.low %v495_v60, %v499_v61  ;;  %v543_v60 = vld [vmem:[#allocation8 + $0x310] sm:$0xff] }
 0x218   :  { %4076 = vmatpush1.bf16.msra.mxu1 %v4427_v5  ;;  %4107 = vmatprep.mubr.bf16.mxu1 %v5334_v23  ;;  %v480_v23 = vld [vmem:[#allocation8 + $0x118] sm:$0xff]  ;;  %v4475_v5 = vcombine.low %v496_v62, %v500_v63  ;;  %v547_v61 = vld [vmem:[#allocation8 + $0x330] sm:$0xff] }
 0x219   :  { %3905 = vmatprep.subr.bf16.mxu0 %v4434_v6  ;;  %4077 = vmatprep.subr.bf16.mxu1 %v4436_v7  ;;  %v4460_v39 = vcombine.high %v480_v23, %v484_v30  ;;  %v4459_v55 = vcombine.low %v480_v23, %v484_v30  ;;  %v4482_v6 = vcombine.high %v503_v40, %v507_v42  ;;  %v528_v23 = vld [vmem:[#allocation8 + $0x298] sm:$0xff] }
 0x21a   :  { %v4484_v7 = vcombine.high %v504_v2, %v508_v3  ;;  %v532_v30 = vld [vmem:[#allocation8 + $0x2b8] sm:$0xff] }
 0x21b   :  { %3906 = vmatpush1.bf16.msra.mxu0 %v4433_v12  ;;  %v4481_v12 = vcombine.low %v503_v40, %v507_v42  ;;  %v544_v62 = vld [vmem:[#allocation8 + $0x318] sm:$0xff]  ;;  %v551_v40 = vld [vmem:[#allocation8 + $0x350] sm:$0xff] }
 0x21c   :  { %4078 = vmatpush1.bf16.msra.mxu1 %v4435_v13  ;;  %3907 = vmatprep.subr.bf16.mxu0 %v4442_v14  ;;  %v4483_v13 = vcombine.low %v504_v2, %v508_v3  ;;  %v4490_v14 = vcombine.high %v511_v8, %v515_v9  ;;  %v548_v63 = vld [vmem:[#allocation8 + $0x338] sm:$0xff]  ;;  %v555_v42 = vld [vmem:[#allocation8 + $0x370] sm:$0xff] }
 0x21d   :  { %4079 = vmatprep.subr.bf16.mxu1 %v4444_v16  ;;  %v4492_v16 = vcombine.high %v512_v10, %v516_v11  ;;  %v552_v2 = vld [vmem:[#allocation8 + $0x358] sm:$0xff] }
 0x21e   :  { %v556_v3 = vld [vmem:[#allocation8 + $0x378] sm:$0xff] }
 0x21f   :  { %3908 = vmatpush1.bf16.msra.mxu0 %v4441_v22  ;;  %v4489_v22 = vcombine.low %v511_v8, %v515_v9  ;;  %v559_v8 = vld [vmem:[#allocation8 + $0x390] sm:$0xff] }
 0x220   :  { %4080 = vmatpush1.bf16.msra.mxu1 %v4443_v24  ;;  %3909 = vmatprep.subr.bf16.mxu0 %v4450_v25  ;;  %v4491_v24 = vcombine.low %v512_v10, %v516_v11  ;;  %v4498_v25 = vcombine.high %v519_v17, %v523_v18  ;;  %v563_v9 = vld [vmem:[#allocation8 + $0x3b0] sm:$0xff]  ;;  %v560_v10 = vld [vmem:[#allocation8 + $0x398] sm:$0xff] }
 0x221   :  { %4081 = vmatprep.subr.bf16.mxu1 %v4452_v26  ;;  %v4500_v26 = vcombine.high %v520_v19, %v524_v20  ;;  %v564_v11 = vld [vmem:[#allocation8 + $0x3b8] sm:$0xff] }
 0x223   :  { %3910 = vmatpush1.bf16.msra.mxu0 %v4449_v32  ;;  %v4497_v32 = vcombine.low %v519_v17, %v523_v18  ;;  %v567_v17 = vld [vmem:[#allocation8 + $0x3d0] sm:$0xff] }
 0x224   :  { %4082 = vmatpush1.bf16.msra.mxu1 %v4451_v33  ;;  %3911 = vmatprep.subr.bf16.mxu0 %v4458_v34  ;;  %v4499_v33 = vcombine.low %v520_v19, %v524_v20  ;;  %v4506_v34 = vcombine.high %v527_v27, %v531_v28  ;;  %v571_v18 = vld [vmem:[#allocation8 + $0x3f0] sm:$0xff]  ;;  %v568_v19 = vld [vmem:[#allocation8 + $0x3d8] sm:$0xff] }
 0x225   :  { %4083 = vmatprep.subr.bf16.mxu1 %v4460_v39  ;;  %v4508_v39 = vcombine.high %v528_v23, %v532_v30  ;;  %v572_v20 = vld [vmem:[#allocation8 + $0x3f8] sm:$0xff] }
 0x227   :  { %3912 = vmatpush1.bf16.msra.mxu0 %v4457_v54  ;;  %v4505_v54 = vcombine.low %v527_v27, %v531_v28  ;;  %v575_v27 = vld [vmem:[#allocation8 + $0x410] sm:$0xff] }
 0x228   :  { %4084 = vmatpush1.bf16.msra.mxu1 %v4459_v55  ;;  %3913 = vmatprep.subr.bf16.mxu0 %v4466_v58  ;;  %v4507_v55 = vcombine.low %v528_v23, %v532_v30  ;;  %v4514_v58 = vcombine.high %v535_v43, %v539_v44  ;;  %v579_v28 = vld [vmem:[#allocation8 + $0x430] sm:$0xff]  ;;  %v576_v23 = vld [vmem:[#allocation8 + $0x418] sm:$0xff] }
 0x229   :  { %4085 = vmatprep.subr.bf16.mxu1 %v4468_v59  ;;  %v4516_v59 = vcombine.high %v536_v51, %v540_v53  ;;  %v580_v30 = vld [vmem:[#allocation8 + $0x438] sm:$0xff] }
 0x22b   :  { %3914 = vmatpush1.bf16.msra.mxu0 %v4465_v0  ;;  %v4513_v0 = vcombine.low %v535_v43, %v539_v44  ;;  %v583_v43 = vld [vmem:[#allocation8 + $0x450] sm:$0xff] }
 0x22c   :  { %4086 = vmatpush1.bf16.msra.mxu1 %v4467_v1  ;;  %3915 = vmatprep.subr.bf16.mxu0 %v4474_v36  ;;  %v4515_v1 = vcombine.low %v536_v51, %v540_v53  ;;  %v4522_v36 = vcombine.high %v543_v60, %v547_v61  ;;  %v587_v44 = vld [vmem:[#allocation8 + $0x470] sm:$0xff]  ;;  %v4553_v51 = vcombine.low %v575_v27, %v579_v28  ;;  %v584_v53 = vld [vmem:[#allocation8 + $0x458] sm:$0xff] }
 0x22d   :  { %4087 = vmatprep.subr.bf16.mxu1 %v4476_v38  ;;  %v4524_v38 = vcombine.high %v544_v62, %v548_v63 }
 0x22f   :  { %3916 = vmatpush1.bf16.msra.mxu0 %v4473_v4  ;;  %v4521_v4 = vcombine.low %v543_v60, %v547_v61  ;;  %v595_v60 = vld [vmem:[#allocation8 + $0x4b0] sm:$0xff] }
 0x230   :  { %4088 = vmatpush1.bf16.msra.mxu1 %v4475_v5  ;;  %3917 = vmatprep.subr.bf16.mxu0 %v4482_v6  ;;  %v4523_v5 = vcombine.low %v544_v62, %v548_v63  ;;  %v4530_v6 = vcombine.high %v551_v40, %v555_v42  ;;  %v592_v62 = vld [vmem:[#allocation8 + $0x498] sm:$0xff] }
 0x231   :  { %4089 = vmatprep.subr.bf16.mxu1 %v4484_v7  ;;  %v4532_v7 = vcombine.high %v552_v2, %v556_v3  ;;  %v596_v63 = vld [vmem:[#allocation8 + $0x4b8] sm:$0xff] }
 0x233   :  { %3918 = vmatpush1.bf16.msra.mxu0 %v4481_v12  ;;  %v4529_v12 = vcombine.low %v551_v40, %v555_v42  ;;  %v599_v40 = vld [vmem:[#allocation8 + $0x4d0] sm:$0xff] }
 0x234   :  { %4090 = vmatpush1.bf16.msra.mxu1 %v4483_v13  ;;  %3919 = vmatprep.subr.bf16.mxu0 %v4490_v14  ;;  %v4531_v13 = vcombine.low %v552_v2, %v556_v3  ;;  %v4538_v14 = vcombine.high %v559_v8, %v563_v9  ;;  %v603_v42 = vld [vmem:[#allocation8 + $0x4f0] sm:$0xff]  ;;  %v600_v2 = vld [vmem:[#allocation8 + $0x4d8] sm:$0xff] }
 0x235   :  { %4091 = vmatprep.subr.bf16.mxu1 %v4492_v16  ;;  %v4540_v16 = vcombine.high %v560_v10, %v564_v11  ;;  %v604_v3 = vld [vmem:[#allocation8 + $0x4f8] sm:$0xff] }
 0x237   :  { %3920 = vmatpush1.bf16.msra.mxu0 %v4489_v22  ;;  %v4537_v22 = vcombine.low %v559_v8, %v563_v9  ;;  %v611_v8 = vld [vmem:[#allocation8 + $0x530] sm:$0xff]  ;;  %v608_v9 = vld [vmem:[#allocation8 + $0x518] sm:$0xff] }
 0x238   :  { %4092 = vmatpush1.bf16.msra.mxu1 %v4491_v24  ;;  %3921 = vmatprep.subr.bf16.mxu0 %v4498_v25  ;;  %v4539_v24 = vcombine.low %v560_v10, %v564_v11  ;;  %v4546_v25 = vcombine.high %v567_v17, %v571_v18  ;;  %v612_v10 = vld [vmem:[#allocation8 + $0x538] sm:$0xff]  ;;  %v4579_v11 = vcombine.low %v600_v2, %v604_v3 }
 0x239   :  { %4093 = vmatprep.subr.bf16.mxu1 %v4500_v26  ;;  %v4548_v26 = vcombine.high %v568_v19, %v572_v20 }
 0x23b   :  { %3922 = vmatpush1.bf16.msra.mxu0 %v4497_v32  ;;  %v4545_v32 = vcombine.low %v567_v17, %v571_v18  ;;  %v616_v17 = vld [vmem:[#allocation8 + $0x558] sm:$0xff] }
 0x23c   :  { %4094 = vmatpush1.bf16.msra.mxu1 %v4499_v33  ;;  %3923 = vmatprep.subr.bf16.mxu0 %v4506_v34  ;;  %v4547_v33 = vcombine.low %v568_v19, %v572_v20  ;;  %v4554_v34 = vcombine.high %v575_v27, %v579_v28  ;;  %v620_v18 = vld [vmem:[#allocation8 + $0x578] sm:$0xff]  ;;  %v4587_v20 = vcombine.low %v608_v9, %v612_v10 }
 0x23d   :  { %4095 = vmatprep.subr.bf16.mxu1 %v4508_v39  ;;  %v4556_v39 = vcombine.high %v576_v23, %v580_v30  ;;  %v624_v27 = vld [vmem:[#allocation8 + $0x598] sm:$0xff] }
 0x23e   :  { %v628_v28 = vld [vmem:[#allocation8 + $0x5b8] sm:$0xff] }
 0x23f   :  { %3924 = vmatpush1.bf16.msra.mxu0 %v4505_v54  ;;  %v588_v54 = vld [vmem:[#allocation8 + $0x478] sm:$0xff] }
 0x240   :  { %4096 = vmatpush1.bf16.msra.mxu1 %v4507_v55  ;;  %3925 = vmatprep.subr.bf16.mxu0 %v4514_v58  ;;  %v4555_v55 = vcombine.low %v576_v23, %v580_v30  ;;  %v4562_v58 = vcombine.high %v583_v43, %v587_v44  ;;  %v4564_v61 = vcombine.high %v584_v53, %v588_v54 }
 0x241   :  { %4097 = vmatprep.subr.bf16.mxu1 %v4516_v59  ;;  %v591_v59 = vld [vmem:[#allocation8 + $0x490] sm:$0xff]  ;;  %v4595_v30 = vcombine.low %v616_v17, %v620_v18 }
 0x243   :  { %3926 = vmatpush1.bf16.msra.mxu0 %v4513_v0  ;;  %v4561_v0 = vcombine.low %v583_v43, %v587_v44  ;;  %v632_v43 = vld [vmem:[#allocation8 + $0x5d8] sm:$0xff] }
 0x244   :  { %4098 = vmatpush1.bf16.msra.mxu1 %v4515_v1  ;;  %3927 = vmatprep.subr.bf16.mxu0 %v4522_v36  ;;  %v4563_v1 = vcombine.low %v584_v53, %v588_v54  ;;  %v4570_v36 = vcombine.high %v591_v59, %v595_v60  ;;  %v636_v44 = vld [vmem:[#allocation8 + $0x5f8] sm:$0xff]  ;;  %v4603_v53 = vcombine.low %v624_v27, %v628_v28 }
 0x245   :  { %4099 = vmatprep.subr.bf16.mxu1 %v4524_v38  ;;  %v4572_v38 = vcombine.high %v592_v62, %v596_v63 }
 0x247   :  { %3928 = vmatpush1.bf16.msra.mxu0 %v4521_v4  ;;  %v4569_v4 = vcombine.low %v591_v59, %v595_v60  ;;  %v643_v59 = vld [vmem:[#allocation8 + $0x630] sm:$0xff]  ;;  %v640_v60 = vld [vmem:[#allocation8 + $0x618] sm:$0xff] }
 0x248   :  { %4100 = vmatpush1.bf16.msra.mxu1 %v4523_v5  ;;  %3929 = vmatprep.subr.bf16.mxu0 %v4530_v6  ;;  %v4578_v5 = vcombine.high %v599_v40, %v603_v42  ;;  %v4580_v6 = vcombine.high %v600_v2, %v604_v3 }
 0x249   :  { %4101 = vmatprep.subr.bf16.mxu1 %v4532_v7  ;;  %v607_v7 = vld [vmem:[#allocation8 + $0x510] sm:$0xff] }
 0x24a   :  { %v4585_v19 = vcombine.low %v607_v7, %v611_v8 }
 0x24b   :  { %3930 = vmatpush1.bf16.msra.mxu0 %v4529_v12  ;;  %v4586_v12 = vcombine.high %v607_v7, %v611_v8  ;;  %v656_v7 = vld [vmem:[#allocation8 + $0x698] sm:$0xff] }
 0x24c   :  { %4102 = vmatpush1.bf16.msra.mxu1 %v4531_v13  ;;  %3931 = vmatprep.subr.bf16.mxu0 %v4538_v14  ;;  %v4588_v13 = vcombine.high %v608_v9, %v612_v10  ;;  %v615_v14 = vld [vmem:[#allocation8 + $0x550] sm:$0xff]  ;;  %v660_v8 = vld [vmem:[#allocation8 + $0x6b8] sm:$0xff] }
 0x24d   :  { %4103 = vmatprep.subr.bf16.mxu1 %v4540_v16  ;;  %v619_v16 = vld [vmem:[#allocation8 + $0x570] sm:$0xff] }
 0x24e   :  { %v4593_v23 = vcombine.low %v615_v14, %v619_v16 }
 0x24f   :  { %3932 = vmatpush1.bf16.msra.mxu0 %v4537_v22  ;;  %v4594_v22 = vcombine.high %v615_v14, %v619_v16  ;;  %v664_v14 = vld [vmem:[#allocation8 + $0x6d8] sm:$0xff] }
 0x250   :  { %4104 = vmatpush1.bf16.msra.mxu1 %v4539_v24  ;;  %3933 = vmatprep.subr.bf16.mxu0 %v4546_v25  ;;  %v4596_v24 = vcombine.high %v616_v17, %v620_v18  ;;  %v623_v25 = vld [vmem:[#allocation8 + $0x590] sm:$0xff]  ;;  %v668_v16 = vld [vmem:[#allocation8 + $0x6f8] sm:$0xff]  ;;  %v4635_v18 = vcombine.low %v656_v7, %v660_v8 }
 0x251   :  { %4105 = vmatprep.subr.bf16.mxu1 %v4548_v26  ;;  %v627_v26 = vld [vmem:[#allocation8 + $0x5b0] sm:$0xff] }
 0x253   :  { %3934 = vmatpush1.bf16.msra.mxu0 %v4545_v32  ;;  %v4602_v32 = vcombine.high %v623_v25, %v627_v26 }
 0x254   :  { %4106 = vmatpush1.bf16.msra.mxu1 %v4547_v33  ;;  %3946 = vmatprep.subr.bf16.mxu0 %v4554_v34  ;;  %v4604_v33 = vcombine.high %v624_v27, %v628_v28  ;;  %v631_v34 = vld [vmem:[#allocation8 + $0x5d0] sm:$0xff]  ;;  %v4643_v28 = vcombine.low %v664_v14, %v668_v16 }
 0x255   :  { %4118 = vmatprep.subr.bf16.mxu1 %v4556_v39  ;;  %v635_v39 = vld [vmem:[#allocation8 + $0x5f0] sm:$0xff] }
 0x256   :  { %3936 = vmatmul.mubr.bf16.vlgmr.msra.gmra.mrb[12].mxu0 %v5332_v21  ;;  %v4610_v54 = vcombine.high %v631_v34, %v635_v39 }
 0x257   :  { %4108 = vmatmul.mubr.bf16.vlgmr.msra.gmra.mrb[12].mxu1 %v5332_v21  ;;  %3947 = vmatpush1.bf16.msra.mxu0 %v4553_v51  ;;  %v4571_v21 = vcombine.low %v592_v62, %v596_v63  ;;  %v4601_v51 = vcombine.low %v623_v25, %v627_v26  ;;  %v4609_v62 = vcombine.low %v631_v34, %v635_v39  ;;  %v672_v25 = vld [vmem:[#allocation8 + $0x718] sm:$0xff] }
 0x258   :  { %3978 = vmatprep.mubr.bf16.mxu0 %v5340_v35  ;;  %4119 = vmatpush1.bf16.msra.mxu1 %v4555_v55  ;;  %v4612_v55 = vcombine.high %v632_v43, %v636_v44  ;;  %v4611_v63 = vcombine.low %v632_v43, %v636_v44  ;;  %v676_v26 = vld [vmem:[#allocation8 + $0x738] sm:$0xff] }
 0x259   :  { %4150 = vmatprep.mubr.bf16.mxu1 %v5340_v35  ;;  %3948 = vmatprep.subr.bf16.mxu0 %v4562_v58  ;;  %v4577_v35 = vcombine.low %v599_v40, %v603_v42  ;;  %v639_v58 = vld [vmem:[#allocation8 + $0x610] sm:$0xff]  ;;  %v648_v40 = vld [vmem:[#allocation8 + $0x658] sm:$0xff]  ;;  %v4651_v44 = vcombine.low %v672_v25, %v676_v26 }
 0x25a   :  { %4120 = vmatprep.subr.bf16.mxu1 %v4564_v61  ;;  %v644_v61 = vld [vmem:[#allocation8 + $0x638] sm:$0xff]  ;;  %v4617_v2 = vcombine.low %v639_v58, %v643_v59 }
 0x25b   :  { %3949 = vmatpush1.bf16.msra.mxu0 %v4561_v0  ;;  %v4618_v0 = vcombine.high %v639_v58, %v643_v59  ;;  %v652_v42 = vld [vmem:[#allocation8 + $0x678] sm:$0xff]  ;;  %v4619_v3 = vcombine.low %v640_v60, %v644_v61 }
 0x25c   :  { %4121 = vmatpush1.bf16.msra.mxu1 %v4563_v1  ;;  %3950 = vmatprep.subr.bf16.mxu0 %v4570_v36  ;;  %v4620_v1 = vcombine.high %v640_v60, %v644_v61  ;;  %v647_v36 = vld [vmem:[#allocation8 + $0x650] sm:$0xff]  ;;  %v4627_v10 = vcombine.low %v648_v40, %v652_v42  ;;  %v680_v34 = vld [vmem:[#allocation8 + $0x758] sm:$0xff] }
 0x25d   :  { %4122 = vmatprep.subr.bf16.mxu1 %v4572_v38  ;;  %v651_v38 = vld [vmem:[#allocation8 + $0x670] sm:$0xff]  ;;  %v684_v39 = vld [vmem:[#allocation8 + $0x778] sm:$0xff] }
 0x25e   :  { %v4625_v9 = vcombine.low %v647_v36, %v651_v38  ;;  %v688_v58 = vld [vmem:[#allocation8 + $0x798] sm:$0xff]  ;;  %v4659_v61 = vcombine.low %v680_v34, %v684_v39 }
 0x25f   :  { %3951 = vmatpush1.bf16.msra.mxu0 %v4569_v4  ;;  %v4626_v4 = vcombine.high %v647_v36, %v651_v38  ;;  %v692_v59 = vld [vmem:[#allocation8 + $0x7b8] sm:$0xff] }
 0x260   :  { %4123 = vmatpush1.bf16.msra.mxu1 %v4571_v21  ;;  %3952 = vmatprep.subr.bf16.mxu0 %v4578_v5  ;;  %v4628_v21 = vcombine.high %v648_v40, %v652_v42  ;;  %v655_v5 = vld [vmem:[#allocation8 + $0x690] sm:$0xff]  ;;  %v696_v36 = vld [vmem:[#allocation8 + $0x7d8] sm:$0xff]  ;;  %v4667_v42 = vcombine.low %v688_v58, %v692_v59 }
 0x261   :  { %4124 = vmatprep.subr.bf16.mxu1 %v4580_v6  ;;  %v659_v6 = vld [vmem:[#allocation8 + $0x6b0] sm:$0xff]  ;;  %v700_v38 = vld [vmem:[#allocation8 + $0x7f8] sm:$0xff] }
 0x262   :  { %v4633_v17 = vcombine.low %v655_v5, %v659_v6 }
 0x263   :  { %3953 = vmatpush1.bf16.msra.mxu0 %v4577_v35  ;;  %v4634_v35 = vcombine.high %v655_v5, %v659_v6  ;;  %v704_v5 = vld [vmem:[#allocation8 + $0x818] sm:$0xff] }
 0x264   :  { %4125 = vmatpush1.bf16.msra.mxu1 %v4579_v11  ;;  %3954 = vmatprep.subr.bf16.mxu0 %v4586_v12  ;;  %v4636_v11 = vcombine.high %v656_v7, %v660_v8  ;;  %v663_v12 = vld [vmem:[#allocation8 + $0x6d0] sm:$0xff]  ;;  %v708_v6 = vld [vmem:[#allocation8 + $0x838] sm:$0xff]  ;;  %v4675_v8 = vcombine.low %v696_v36, %v700_v38 }
 0x265   :  { %4126 = vmatprep.subr.bf16.mxu1 %v4588_v13  ;;  %v667_v13 = vld [vmem:[#allocation8 + $0x6f0] sm:$0xff] }
 0x266   :  { %v4641_v27 = vcombine.low %v663_v12, %v667_v13 }
 0x267   :  { %3955 = vmatpush1.bf16.msra.mxu0 %v4585_v19  ;;  %v4642_v19 = vcombine.high %v663_v12, %v667_v13  ;;  %v712_v13 = vld [vmem:[#allocation8 + $0x858] sm:$0xff] }
 0x268   :  { %4127 = vmatpush1.bf16.msra.mxu1 %v4587_v20  ;;  %3956 = vmatprep.subr.bf16.mxu0 %v4594_v22  ;;  %v4644_v20 = vcombine.high %v664_v14, %v668_v16  ;;  %v671_v22 = vld [vmem:[#allocation8 + $0x710] sm:$0xff]  ;;  %v716_v14 = vld [vmem:[#allocation8 + $0x878] sm:$0xff]  ;;  %v4683_v16 = vcombine.low %v704_v5, %v708_v6 }
 0x269   :  { %4128 = vmatprep.subr.bf16.mxu1 %v4596_v24  ;;  %v675_v24 = vld [vmem:[#allocation8 + $0x730] sm:$0xff] }
 0x26a   :  { %v4649_v43 = vcombine.low %v671_v22, %v675_v24 }
 0x26b   :  { %3957 = vmatpush1.bf16.msra.mxu0 %v4593_v23  ;;  %v4650_v23 = vcombine.high %v671_v22, %v675_v24  ;;  %v720_v22 = vld [vmem:[#allocation8 + $0x898] sm:$0xff] }
 0x26c   :  { %4129 = vmatpush1.bf16.msra.mxu1 %v4595_v30  ;;  %3958 = vmatprep.subr.bf16.mxu0 %v4602_v32  ;;  %v4652_v30 = vcombine.high %v672_v25, %v676_v26  ;;  %v679_v32 = vld [vmem:[#allocation8 + $0x750] sm:$0xff]  ;;  %v724_v24 = vld [vmem:[#allocation8 + $0x8b8] sm:$0xff]  ;;  %v4691_v26 = vcombine.low %v712_v13, %v716_v14 }
 0x26d   :  { %4130 = vmatprep.subr.bf16.mxu1 %v4604_v33  ;;  %v683_v33 = vld [vmem:[#allocation8 + $0x770] sm:$0xff] }
 0x26e   :  { %v4657_v60 = vcombine.low %v679_v32, %v683_v33 }
 0x26f   :  { %3959 = vmatpush1.bf16.msra.mxu0 %v4601_v51  ;;  %v4658_v51 = vcombine.high %v679_v32, %v683_v33  ;;  %v728_v32 = vld [vmem:[#allocation8 + $0x8d8] sm:$0xff] }
 0x270   :  { %4131 = vmatpush1.bf16.msra.mxu1 %v4603_v53  ;;  %3960 = vmatprep.subr.bf16.mxu0 %v4610_v54  ;;  %v4660_v53 = vcombine.high %v680_v34, %v684_v39  ;;  %v687_v54 = vld [vmem:[#allocation8 + $0x790] sm:$0xff]  ;;  %v732_v33 = vld [vmem:[#allocation8 + $0x8f8] sm:$0xff] }
 0x271   :  { %4132 = vmatprep.subr.bf16.mxu1 %v4612_v55  ;;  %v691_v55 = vld [vmem:[#allocation8 + $0x7b0] sm:$0xff] }
 0x272   :  { %v4665_v40 = vcombine.low %v687_v54, %v691_v55 }
 0x273   :  { %3961 = vmatpush1.bf16.msra.mxu0 %v4609_v62  ;;  %v4666_v62 = vcombine.high %v687_v54, %v691_v55  ;;  %v740_v54 = vld [vmem:[#allocation8 + $0x938] sm:$0xff]  ;;  %v4707_v55 = vcombine.low %v728_v32, %v732_v33 }
 0x274   :  { %4133 = vmatpush1.bf16.msra.mxu1 %v4611_v63  ;;  %3962 = vmatprep.subr.bf16.mxu0 %v4618_v0  ;;  %v4668_v63 = vcombine.high %v688_v58, %v692_v59  ;;  %v695_v0 = vld [vmem:[#allocation8 + $0x7d0] sm:$0xff] }
 0x275   :  { %4134 = vmatprep.subr.bf16.mxu1 %v4620_v1  ;;  %v699_v1 = vld [vmem:[#allocation8 + $0x7f0] sm:$0xff] }
 0x276   :  { %v4673_v7 = vcombine.low %v695_v0, %v699_v1 }
 0x277   :  { %3963 = vmatpush1.bf16.msra.mxu0 %v4617_v2  ;;  %v4674_v2 = vcombine.high %v695_v0, %v699_v1 }
 0x278   :  { %4135 = vmatpush1.bf16.msra.mxu1 %v4619_v3  ;;  %3964 = vmatprep.subr.bf16.mxu0 %v4626_v4  ;;  %v4676_v3 = vcombine.high %v696_v36, %v700_v38  ;;  %v703_v4 = vld [vmem:[#allocation8 + $0x810] sm:$0xff] }
 0x279   :  { %4136 = vmatprep.subr.bf16.mxu1 %v4628_v21  ;;  %v707_v21 = vld [vmem:[#allocation8 + $0x830] sm:$0xff] }
 0x27a   :  { %v4681_v12 = vcombine.low %v703_v4, %v707_v21 }
 0x27b   :  { %3965 = vmatpush1.bf16.msra.mxu0 %v4625_v9  ;;  %v4682_v9 = vcombine.high %v703_v4, %v707_v21 }
 0x27c   :  { %4137 = vmatpush1.bf16.msra.mxu1 %v4627_v10  ;;  %3966 = vmatprep.subr.bf16.mxu0 %v4634_v35  ;;  %v4684_v10 = vcombine.high %v704_v5, %v708_v6  ;;  %v711_v35 = vld [vmem:[#allocation8 + $0x850] sm:$0xff] }
 0x27d   :  { %4138 = vmatprep.subr.bf16.mxu1 %v4636_v11  ;;  %v715_v11 = vld [vmem:[#allocation8 + $0x870] sm:$0xff] }
 0x27e   :  { %v4689_v25 = vcombine.low %v711_v35, %v715_v11 }
 0x27f   :  { %3967 = vmatpush1.bf16.msra.mxu0 %v4633_v17  ;;  %v4690_v17 = vcombine.high %v711_v35, %v715_v11 }
 0x280   :  { %4139 = vmatpush1.bf16.msra.mxu1 %v4635_v18  ;;  %3968 = vmatprep.subr.bf16.mxu0 %v4642_v19  ;;  %v719_v18 = vld [vmem:[#allocation8 + $0x890] sm:$0xff] }
 0x281   :  { %4140 = vmatprep.subr.bf16.mxu1 %v4644_v20  ;;  %v723_v19 = vld [vmem:[#allocation8 + $0x8b0] sm:$0xff]  ;;  %v4692_v20 = vcombine.high %v712_v13, %v716_v14 }
 0x282   :  { %v4697_v34 = vcombine.low %v719_v18, %v723_v19  ;;  %v767_v14 = vld [vmem:[#allocation8 + $0xa10] sm:$0xff] }
 0x283   :  { %3969 = vmatpush1.bf16.msra.mxu0 %v4641_v27  ;;  %v4698_v27 = vcombine.high %v719_v18, %v723_v19  ;;  %v772_v18 = vld [vmem:[#allocation8 + $0xa38] sm:$0xff] }
 0x284   :  { %4141 = vmatpush1.bf16.msra.mxu1 %v4643_v28  ;;  %3970 = vmatprep.subr.bf16.mxu0 %v4650_v23  ;;  %v4700_v28 = vcombine.high %v720_v22, %v724_v24  ;;  %v727_v23 = vld [vmem:[#allocation8 + $0x8d0] sm:$0xff] }
 0x285   :  { %4142 = vmatprep.subr.bf16.mxu1 %v4652_v30  ;;  %v731_v30 = vld [vmem:[#allocation8 + $0x8f0] sm:$0xff] }
 0x286   :  { %v4706_v39 = vcombine.high %v727_v23, %v731_v30 }
 0x287   :  { %3971 = vmatpush1.bf16.msra.mxu0 %v4649_v43  ;;  %v4708_v43 = vcombine.high %v728_v32, %v732_v33 }
 0x288   :  { %4143 = vmatpush1.bf16.msra.mxu1 %v4651_v44  ;;  %3972 = vmatprep.subr.bf16.mxu0 %v4658_v51  ;;  %v735_v44 = vld [vmem:[#allocation8 + $0x910] sm:$0xff] }
 0x289   :  { %4144 = vmatprep.subr.bf16.mxu1 %v4660_v53  ;;  %v739_v51 = vld [vmem:[#allocation8 + $0x930] sm:$0xff]  ;;  %v736_v53 = vld [vmem:[#allocation8 + $0x918] sm:$0xff] }
 0x28a   :  { %v4714_v58 = vcombine.high %v735_v44, %v739_v51  ;;  %v4716_v59 = vcombine.high %v736_v53, %v740_v54  ;;  %v4713_v0 = vcombine.low %v735_v44, %v739_v51  ;;  %v4715_v1 = vcombine.low %v736_v53, %v740_v54 }
 0x28b   :  { %3973 = vmatpush1.bf16.msra.mxu0 %v4657_v60  ;;  %v743_v60 = vld [vmem:[#allocation8 + $0x950] sm:$0xff] }
 0x28c   :  { %4145 = vmatpush1.bf16.msra.mxu1 %v4659_v61  ;;  %3974 = vmatprep.subr.bf16.mxu0 %v4666_v62  ;;  %v747_v61 = vld [vmem:[#allocation8 + $0x970] sm:$0xff]  ;;  %v744_v62 = vld [vmem:[#allocation8 + $0x958] sm:$0xff] }
 0x28d   :  { %4146 = vmatprep.subr.bf16.mxu1 %v4668_v63  ;;  %v748_v63 = vld [vmem:[#allocation8 + $0x978] sm:$0xff]  ;;  %v4722_v36 = vcombine.high %v743_v60, %v747_v61  ;;  %v4721_v4 = vcombine.low %v743_v60, %v747_v61 }
 0x28e   :  { %v4724_v38 = vcombine.high %v744_v62, %v748_v63  ;;  %v4723_v21 = vcombine.low %v744_v62, %v748_v63 }
 0x28f   :  { %3975 = vmatpush1.bf16.msra.mxu0 %v4665_v40  ;;  %v751_v40 = vld [vmem:[#allocation8 + $0x990] sm:$0xff] }
 0x290   :  { %4147 = vmatpush1.bf16.msra.mxu1 %v4667_v42  ;;  %3976 = vmatprep.subr.bf16.mxu0 %v4674_v2  ;;  %v755_v42 = vld [vmem:[#allocation8 + $0x9b0] sm:$0xff]  ;;  %v752_v2 = vld [vmem:[#allocation8 + $0x998] sm:$0xff] }
 0x291   :  { %4148 = vmatprep.subr.bf16.mxu1 %v4676_v3  ;;  %v756_v3 = vld [vmem:[#allocation8 + $0x9b8] sm:$0xff]  ;;  %v4730_v5 = vcombine.high %v751_v40, %v755_v42  ;;  %v4729_v35 = vcombine.low %v751_v40, %v755_v42 }
 0x292   :  { %v4732_v6 = vcombine.high %v752_v2, %v756_v3  ;;  %v4731_v11 = vcombine.low %v752_v2, %v756_v3 }
 0x293   :  { %3977 = vmatpush1.bf16.msra.mxu0 %v4673_v7  ;;  %v759_v7 = vld [vmem:[#allocation8 + $0x9d0] sm:$0xff] }
 0x294   :  { %4149 = vmatpush1.bf16.msra.mxu1 %v4675_v8  ;;  %3989 = vmatprep.subr.bf16.mxu0 %v4682_v9  ;;  %v763_v8 = vld [vmem:[#allocation8 + $0x9f0] sm:$0xff]  ;;  %v760_v9 = vld [vmem:[#allocation8 + $0x9d8] sm:$0xff] }
 0x295   :  { %4161 = vmatprep.subr.bf16.mxu1 %v4684_v10  ;;  %v764_v10 = vld [vmem:[#allocation8 + $0x9f8] sm:$0xff]  ;;  %v4737_v19 = vcombine.low %v759_v7, %v763_v8 }
 0x296   :  { %3979 = vmatmul.mubr.bf16.vlgmr.msra.gmra.mrb[12].mxu0 %v5336_v29  ;;  %v4740_v13 = vcombine.high %v760_v9, %v764_v10 }
 0x297   :  { %4151 = vmatmul.mubr.bf16.vlgmr.msra.gmra.mrb[12].mxu1 %v5336_v29  ;;  %3990 = vmatpush1.bf16.msra.mxu0 %v4681_v12  ;;  %v4699_v29 = vcombine.low %v720_v22, %v724_v24  ;;  %v4738_v12 = vcombine.high %v759_v7, %v763_v8 }
 0x298   :  { %4021 = vmatprep.mubr.bf16.mxu0 %v5354_v41  ;;  %4162 = vmatpush1.bf16.msra.mxu1 %v4683_v16  ;;  %v771_v16 = vld [vmem:[#allocation8 + $0xa30] sm:$0xff] }
 0x299   :  { %4193 = vmatprep.mubr.bf16.mxu1 %v5354_v41  ;;  %3991 = vmatprep.subr.bf16.mxu0 %v4690_v17  ;;  %v4705_v41 = vcombine.low %v727_v23, %v731_v30  ;;  %v768_v17 = vld [vmem:[#allocation8 + $0xa18] sm:$0xff]  ;;  %v4746_v22 = vcombine.high %v767_v14, %v771_v16  ;;  %v4745_v23 = vcombine.low %v767_v14, %v771_v16 }
 0x29a   :  { %4163 = vmatprep.subr.bf16.mxu1 %v4692_v20  ;;  %v4739_v20 = vcombine.low %v760_v9, %v764_v10  ;;  %v4748_v24 = vcombine.high %v768_v17, %v772_v18  ;;  %v4747_v30 = vcombine.low %v768_v17, %v772_v18 }
 0x29b   :  { %3992 = vmatpush1.bf16.msra.mxu0 %v4689_v25  ;;  %v775_v25 = vld [vmem:[#allocation8 + $0xa50] sm:$0xff] }
 0x29c   :  { %4164 = vmatpush1.bf16.msra.mxu1 %v4691_v26  ;;  %3993 = vmatprep.subr.bf16.mxu0 %v4698_v27  ;;  %v779_v26 = vld [vmem:[#allocation8 + $0xa70] sm:$0xff]  ;;  %v776_v27 = vld [vmem:[#allocation8 + $0xa58] sm:$0xff] }
 0x29d   :  { %4165 = vmatprep.subr.bf16.mxu1 %v4700_v28  ;;  %v780_v28 = vld [vmem:[#allocation8 + $0xa78] sm:$0xff]  ;;  %v4754_v32 = vcombine.high %v775_v25, %v779_v26  ;;  %v4753_v44 = vcombine.low %v775_v25, %v779_v26 }
 0x29e   :  { %v4756_v33 = vcombine.high %v776_v27, %v780_v28  ;;  %v4755_v51 = vcombine.low %v776_v27, %v780_v28 }
 0x29f   :  { %3994 = vmatpush1.bf16.msra.mxu0 %v4697_v34  ;;  %v783_v34 = vld [vmem:[#allocation8 + $0xa90] sm:$0xff] }
 0x2a0   :  { %4166 = vmatpush1.bf16.msra.mxu1 %v4699_v29  ;;  %3995 = vmatprep.subr.bf16.mxu0 %v4706_v39  ;;  %v787_v29 = vld [vmem:[#allocation8 + $0xab0] sm:$0xff]  ;;  %v784_v39 = vld [vmem:[#allocation8 + $0xa98] sm:$0xff] }
 0x2a1   :  { %4167 = vmatprep.subr.bf16.mxu1 %v4708_v43  ;;  %v788_v43 = vld [vmem:[#allocation8 + $0xab8] sm:$0xff]  ;;  %v4762_v53 = vcombine.high %v783_v34, %v787_v29  ;;  %v4761_v60 = vcombine.low %v783_v34, %v787_v29 }
 0x2a2   :  { %v4764_v54 = vcombine.high %v784_v39, %v788_v43  ;;  %v4763_v61 = vcombine.low %v784_v39, %v788_v43 }
 0x2a3   :  { %3996 = vmatpush1.bf16.msra.mxu0 %v4705_v41  ;;  %v791_v41 = vld [vmem:[#allocation8 + $0xad0] sm:$0xff] }
 0x2a4   :  { %4168 = vmatpush1.bf16.msra.mxu1 %v4707_v55  ;;  %3997 = vmatprep.subr.bf16.mxu0 %v4714_v58  ;;  %v795_v55 = vld [vmem:[#allocation8 + $0xaf0] sm:$0xff]  ;;  %v792_v58 = vld [vmem:[#allocation8 + $0xad8] sm:$0xff] }
 0x2a5   :  { %4169 = vmatprep.subr.bf16.mxu1 %v4716_v59  ;;  %v796_v59 = vld [vmem:[#allocation8 + $0xaf8] sm:$0xff]  ;;  %v4770_v62 = vcombine.high %v791_v41, %v795_v55  ;;  %v4769_v40 = vcombine.low %v791_v41, %v795_v55 }
 0x2a6   :  { %v4772_v63 = vcombine.high %v792_v58, %v796_v59  ;;  %v4771_v42 = vcombine.low %v792_v58, %v796_v59  ;;  %v844_v41 = vld [vmem:[#allocation8 + $0xc78] sm:$0xff]  ;;  %v847_v59 = vld [vmem:[#allocation8 + $0xc90] sm:$0xff] }
 0x2a7   :  { %3998 = vmatpush1.bf16.msra.mxu0 %v4713_v0  ;;  %v799_v0 = vld [vmem:[#allocation8 + $0xb10] sm:$0xff] }
 0x2a8   :  { %4170 = vmatpush1.bf16.msra.mxu1 %v4715_v1  ;;  %3999 = vmatprep.subr.bf16.mxu0 %v4722_v36  ;;  %v803_v1 = vld [vmem:[#allocation8 + $0xb30] sm:$0xff]  ;;  %v800_v36 = vld [vmem:[#allocation8 + $0xb18] sm:$0xff] }
 0x2a9   :  { %4171 = vmatprep.subr.bf16.mxu1 %v4724_v38  ;;  %v804_v38 = vld [vmem:[#allocation8 + $0xb38] sm:$0xff]  ;;  %v4778_v2 = vcombine.high %v799_v0, %v803_v1  ;;  %v4777_v7 = vcombine.low %v799_v0, %v803_v1 }
 0x2aa   :  { %v4780_v3 = vcombine.high %v800_v36, %v804_v38  ;;  %v4779_v8 = vcombine.low %v800_v36, %v804_v38 }
 0x2ab   :  { %4000 = vmatpush1.bf16.msra.mxu0 %v4721_v4  ;;  %v807_v4 = vld [vmem:[#allocation8 + $0xb50] sm:$0xff] }
 0x2ac   :  { %4172 = vmatpush1.bf16.msra.mxu1 %v4723_v21  ;;  %4001 = vmatprep.subr.bf16.mxu0 %v4730_v5  ;;  %v811_v21 = vld [vmem:[#allocation8 + $0xb70] sm:$0xff]  ;;  %v808_v5 = vld [vmem:[#allocation8 + $0xb58] sm:$0xff] }
 0x2ad   :  { %4173 = vmatprep.subr.bf16.mxu1 %v4732_v6  ;;  %v812_v6 = vld [vmem:[#allocation8 + $0xb78] sm:$0xff]  ;;  %v4786_v9 = vcombine.high %v807_v4, %v811_v21  ;;  %v4785_v14 = vcombine.low %v807_v4, %v811_v21 }
 0x2ae   :  { %v4788_v10 = vcombine.high %v808_v5, %v812_v6  ;;  %v4787_v16 = vcombine.low %v808_v5, %v812_v6  ;;  %v863_v6 = vld [vmem:[#allocation8 + $0xd10] sm:$0xff] }
 0x2af   :  { %4002 = vmatpush1.bf16.msra.mxu0 %v4729_v35  ;;  %v815_v35 = vld [vmem:[#allocation8 + $0xb90] sm:$0xff] }
 0x2b0   :  { %4174 = vmatpush1.bf16.msra.mxu1 %v4731_v11  ;;  %4003 = vmatprep.subr.bf16.mxu0 %v4738_v12  ;;  %v819_v11 = vld [vmem:[#allocation8 + $0xbb0] sm:$0xff]  ;;  %v816_v12 = vld [vmem:[#allocation8 + $0xb98] sm:$0xff] }
 0x2b1   :  { %4175 = vmatprep.subr.bf16.mxu1 %v4740_v13  ;;  %v820_v13 = vld [vmem:[#allocation8 + $0xbb8] sm:$0xff]  ;;  %v4794_v17 = vcombine.high %v815_v35, %v819_v11  ;;  %v4793_v25 = vcombine.low %v815_v35, %v819_v11 }
 0x2b2   :  { %v4796_v18 = vcombine.high %v816_v12, %v820_v13  ;;  %v4795_v26 = vcombine.low %v816_v12, %v820_v13 }
 0x2b3   :  { %4004 = vmatpush1.bf16.msra.mxu0 %v4737_v19  ;;  %v823_v19 = vld [vmem:[#allocation8 + $0xbd0] sm:$0xff] }
 0x2b4   :  { %4176 = vmatpush1.bf16.msra.mxu1 %v4739_v20  ;;  %4005 = vmatprep.subr.bf16.mxu0 %v4746_v22  ;;  %v827_v20 = vld [vmem:[#allocation8 + $0xbf0] sm:$0xff]  ;;  %v824_v22 = vld [vmem:[#allocation8 + $0xbd8] sm:$0xff] }
 0x2b5   :  { %4177 = vmatprep.subr.bf16.mxu1 %v4748_v24  ;;  %v828_v24 = vld [vmem:[#allocation8 + $0xbf8] sm:$0xff]  ;;  %v4802_v27 = vcombine.high %v823_v19, %v827_v20  ;;  %v4801_v34 = vcombine.low %v823_v19, %v827_v20  ;;  %v5396_v20 = vld [vmem:[#allocation10] sm:$0xff] }
 0x2b6   :  { %v4804_v28 = vcombine.high %v824_v22, %v828_v24  ;;  %v4803_v29 = vcombine.low %v824_v22, %v828_v24 }
 0x2b7   :  { %4006 = vmatpush1.bf16.msra.mxu0 %v4745_v23  ;;  %v831_v23 = vld [vmem:[#allocation8 + $0xc10] sm:$0xff] }
 0x2b8   :  { %4178 = vmatpush1.bf16.msra.mxu1 %v4747_v30  ;;  %4007 = vmatprep.subr.bf16.mxu0 %v4754_v32  ;;  %v835_v30 = vld [vmem:[#allocation8 + $0xc30] sm:$0xff]  ;;  %v832_v32 = vld [vmem:[#allocation8 + $0xc18] sm:$0xff] }
 0x2b9   :  { %4179 = vmatprep.subr.bf16.mxu1 %v4756_v33  ;;  %v836_v33 = vld [vmem:[#allocation8 + $0xc38] sm:$0xff]  ;;  %v4810_v39 = vcombine.high %v831_v23, %v835_v30 }
 0x2ba   :  { %v4812_v43 = vcombine.high %v832_v32, %v836_v33  ;;  %v4811_v55 = vcombine.low %v832_v32, %v836_v33  ;;  %v962_v32 = vrot.slane %v5396_v20, %v5304_v46  ;;  %v970_v33 = vrot.slane %v5396_v20, %v5310_v49 }
 0x2bb   :  { %4008 = vmatpush1.bf16.msra.mxu0 %v4753_v44  ;;  %v839_v44 = vld [vmem:[#allocation8 + $0xc50] sm:$0xff] }
 0x2bc   :  { %4180 = vmatpush1.bf16.msra.mxu1 %v4755_v51  ;;  %4009 = vmatprep.subr.bf16.mxu0 %v4762_v53  ;;  %v843_v51 = vld [vmem:[#allocation8 + $0xc70] sm:$0xff]  ;;  %v4809_v53 = vcombine.low %v831_v23, %v835_v30 }
 0x2bd   :  { %4181 = vmatprep.subr.bf16.mxu1 %v4764_v54  ;;  %v840_v54 = vld [vmem:[#allocation8 + $0xc58] sm:$0xff]  ;;  %v4818_v58 = vcombine.high %v839_v44, %v843_v51  ;;  %v4817_v0 = vcombine.low %v839_v44, %v843_v51  ;;  %v5401_v23 = vld [vmem:[#allocation8 + $0xd90] sm:$0xff]  ;;  %v974_v44 = vrot.slane %v5396_v20, %v139_v50 }
 0x2be   :  { %v4819_v1 = vcombine.low %v840_v54, %v844_v41  ;;  %v5403_v30 = vld [vmem:[#allocation8 + $0xdb0] sm:$0xff] }
 0x2bf   :  { %4010 = vmatpush1.bf16.msra.mxu0 %v4761_v60  ;;  %v851_v60 = vld [vmem:[#allocation8 + $0xcb0] sm:$0xff] }
 0x2c0   :  { %4182 = vmatpush1.bf16.msra.mxu1 %v4763_v61  ;;  %4011 = vmatprep.subr.bf16.mxu0 %v4770_v62  ;;  %v4820_v61 = vcombine.high %v840_v54, %v844_v41  ;;  %v848_v62 = vld [vmem:[#allocation8 + $0xc98] sm:$0xff]  ;;  %v4826_v36 = vcombine.high %v847_v59, %v851_v60  ;;  %v4825_v4 = vcombine.low %v847_v59, %v851_v60  ;;  %v5418_v41 = vld [vmem:[#allocation8 + $0xdd0] sm:$0xff] }
 0x2c1   :  { %4183 = vmatprep.subr.bf16.mxu1 %v4772_v63  ;;  %v852_v63 = vld [vmem:[#allocation8 + $0xcb8] sm:$0xff]  ;;  %v4858_v54 = vcombine.high %v5401_v23, %v5403_v30 }
 0x2c2   :  { %v4828_v38 = vcombine.high %v848_v62, %v852_v63 }
 0x2c3   :  { %4012 = vmatpush1.bf16.msra.mxu0 %v4769_v40  ;;  %v855_v40 = vld [vmem:[#allocation8 + $0xcd0] sm:$0xff] }
 0x2c4   :  { %4184 = vmatpush1.bf16.msra.mxu1 %v4771_v42  ;;  %4013 = vmatprep.subr.bf16.mxu0 %v4778_v2  ;;  %v859_v42 = vld [vmem:[#allocation8 + $0xcf0] sm:$0xff]  ;;  %v856_v2 = vld [vmem:[#allocation8 + $0xcd8] sm:$0xff] }
 0x2c5   :  { %4185 = vmatprep.subr.bf16.mxu1 %v4780_v3  ;;  %v860_v3 = vld [vmem:[#allocation8 + $0xcf8] sm:$0xff]  ;;  %v4834_v21 = vcombine.high %v855_v40, %v859_v42 }
 0x2c6   :  { %v4836_v5 = vcombine.high %v856_v2, %v860_v3  ;;  %v4835_v35 = vcombine.low %v856_v2, %v860_v3 }
 0x2c7   :  { %4014 = vmatpush1.bf16.msra.mxu0 %v4777_v7  ;;  %v867_v7 = vld [vmem:[#allocation8 + $0xd30] sm:$0xff] }
 0x2c8   :  { %4186 = vmatpush1.bf16.msra.mxu1 %v4779_v8  ;;  %4015 = vmatprep.subr.bf16.mxu0 %v4786_v9  ;;  %v864_v8 = vld [vmem:[#allocation8 + $0xd18] sm:$0xff]  ;;  %v4842_v11 = vcombine.high %v863_v6, %v867_v7  ;;  %v4841_v19 = vcombine.low %v863_v6, %v867_v7 }
 0x2c9   :  { %4187 = vmatprep.subr.bf16.mxu1 %v4788_v10  ;;  %v868_v9 = vld [vmem:[#allocation8 + $0xd38] sm:$0xff]  ;;  %v4833_v10 = vcombine.low %v855_v40, %v859_v42  ;;  %v4857_v42 = vcombine.low %v5401_v23, %v5403_v30 }
 0x2ca   :  { %v4844_v12 = vcombine.high %v864_v8, %v868_v9  ;;  %v4843_v22 = vcombine.low %v864_v8, %v868_v9 }
 0x2cb   :  { %4016 = vmatpush1.bf16.msra.mxu0 %v4785_v14  ;;  %v871_v14 = vld [vmem:[#allocation8 + $0xd50] sm:$0xff] }
 0x2cc   :  { %4188 = vmatpush1.bf16.msra.mxu1 %v4787_v16  ;;  %4017 = vmatprep.subr.bf16.mxu0 %v4794_v17  ;;  %v875_v16 = vld [vmem:[#allocation8 + $0xd70] sm:$0xff]  ;;  %v872_v17 = vld [vmem:[#allocation8 + $0xd58] sm:$0xff] }
 0x2cd   :  { %4189 = vmatprep.subr.bf16.mxu1 %v4796_v18  ;;  %v876_v18 = vld [vmem:[#allocation8 + $0xd78] sm:$0xff]  ;;  %v4850_v24 = vcombine.high %v871_v14, %v875_v16  ;;  %v4849_v51 = vcombine.low %v871_v14, %v875_v16 }
 0x2cf   :  { %4018 = vmatpush1.bf16.msra.mxu0 %v4793_v25 }
 0x2d0   :  { %4190 = vmatpush1.bf16.msra.mxu1 %v4795_v26  ;;  %4019 = vmatprep.subr.bf16.mxu0 %v4802_v27 }
 0x2d1   :  { %4191 = vmatprep.subr.bf16.mxu1 %v4804_v28  ;;  %v4852_v28 = vcombine.high %v872_v17, %v876_v18 }
 0x2d3   :  { %4020 = vmatpush1.bf16.msra.mxu0 %v4801_v34 }
 0x2d4   :  { %4192 = vmatpush1.bf16.msra.mxu1 %v4803_v29  ;;  %4032 = vmatprep.subr.bf16.mxu0 %v4810_v39  ;;  %v880_v29 = vld [vmem:[#allocation8 + $0xd98] sm:$0xff] }
 0x2d5   :  { %4204 = vmatprep.subr.bf16.mxu1 %v4812_v43  ;;  %v884_v39 = vld [vmem:[#allocation8 + $0xdb8] sm:$0xff]  ;;  %v966_v43 = vrot.slane %v5396_v20, %v131_v48 }
 0x2d6   :  { %4022 = vmatmul.mubr.bf16.vlgmr.msra.gmra.mrb[12].mxu0 %v5352_v37  ;;  %v4860_v50 = vcombine.high %v880_v29, %v884_v39 }
 0x2d7   :  { %4194 = vmatmul.mubr.bf16.vlgmr.msra.gmra.mrb[12].mxu1 %v5352_v37  ;;  %4033 = vmatpush1.bf16.msra.mxu0 %v4809_v53  ;;  %v4827_v37 = vcombine.low %v848_v62, %v852_v63  ;;  %v4851_v53 = vcombine.low %v872_v17, %v876_v18  ;;  %v888_v62 = vld [vmem:[#allocation8 + $0xdd8] sm:$0xff]  ;;  %v899_v17 = vld [vmem:[#allocation8 + $0xe30] sm:$0xff] }
 0x2d8   :  { %4064 = vmatprep.mubr.bf16.mxu0 %v5367_v15  ;;  %4205 = vmatpush1.bf16.msra.mxu1 %v4811_v55  ;;  %v5420_v55 = vld [vmem:[#allocation8 + $0xdf0] sm:$0xff]  ;;  %v892_v63 = vld [vmem:[#allocation8 + $0xdf8] sm:$0xff] }
 0x2d9   :  { %4236 = vmatprep.mubr.bf16.mxu1 %v5367_v15  ;;  %4034 = vmatprep.subr.bf16.mxu0 %v4818_v58  ;;  %v5393_v15 = vld [vmem:[#allocation11] sm:$0xff]  ;;  %v896_v18 = vld [vmem:[#allocation8 + $0xe18] sm:$0xff] }
 0x2da   :  { %4206 = vmatprep.subr.bf16.mxu1 %v4820_v61  ;;  %v4264_v13 = vunpack.c.l.bf16 %v5393_v15 }
 0x2db   :  { %4035 = vmatpush1.bf16.msra.mxu0 %v4817_v0 }
 0x2dc   :  { %4207 = vmatpush1.bf16.msra.mxu1 %v4819_v1  ;;  %4036 = vmatprep.subr.bf16.mxu0 %v4826_v36  ;;  %v4271_v25 = vrot.slane %v4264_v13, %v5304_v46  ;;  %v4279_v26 = vrot.slane %v4264_v13, %v5324_v56  ;;  %v4275_v27 = vrot.slane %v4264_v13, %v5310_v49 }
 0x2dd   :  { %4208 = vmatprep.subr.bf16.mxu1 %v4828_v38  ;;  %v4283_v34 = vrot.slane %v4264_v13, %v5357_v31 }
 0x2de   :  { %v4311_v59 = vrot.slane %v4271_v25, %v5304_v46  ;;  %v4319_v48 = vrot.slane %v4279_v26, %v5304_v46  ;;  %v4315_v61 = vrot.slane %v4275_v27, %v5304_v46  ;;  %v4865_v25 = vcombine.low %v5418_v41, %v5420_v55 }
 0x2df   :  { %4037 = vmatpush1.bf16.msra.mxu0 %v4825_v4  ;;  %v4323_v40 = vrot.slane %v4283_v34, %v5304_v46  ;;  %v4867_v26 = vcombine.low %v888_v62, %v892_v63 }
 0x2e0   :  { %4209 = vmatpush1.bf16.msra.mxu1 %v4827_v37  ;;  %4038 = vmatprep.subr.bf16.mxu0 %v4834_v21  ;;  %v4859_v21 = vcombine.low %v880_v29, %v884_v39 }
 0x2e1   :  { %4210 = vmatprep.subr.bf16.mxu1 %v4836_v5  ;;  %v4866_v5 = vcombine.high %v5418_v41, %v5420_v55  ;;  %v904_v41 = vld [vmem:[#allocation8 + $0xe58] sm:$0xff] }
 0x2e2   :  { %v908_v55 = vld [vmem:[#allocation8 + $0xe78] sm:$0xff] }
 0x2e3   :  { %4039 = vmatpush1.bf16.msra.mxu0 %v4833_v10 }
 0x2e4   :  { %4211 = vmatpush1.bf16.msra.mxu1 %v4835_v35  ;;  %4040 = vmatprep.subr.bf16.mxu0 %v4842_v11  ;;  %v4868_v35 = vcombine.high %v888_v62, %v892_v63  ;;  %v895_v11 = vld [vmem:[#allocation8 + $0xe10] sm:$0xff] }
 0x2e5   :  { %4212 = vmatprep.subr.bf16.mxu1 %v4844_v12 }
 0x2e7   :  { %4041 = vmatpush1.bf16.msra.mxu0 %v4841_v19  ;;  %v900_v19 = vld [vmem:[#allocation8 + $0xe38] sm:$0xff] }
 0x2e8   :  { %4213 = vmatpush1.bf16.msra.mxu1 %v4843_v22  ;;  %4042 = vmatprep.subr.bf16.mxu0 %v4850_v24  ;;  %v4876_v34 = vcombine.high %v896_v18, %v900_v19 }
 0x2e9   :  { %v3722_v58 = vpop.f32.mrb[8].mxu0  ;;  %v3894_v60 = vpop.f32.mrb[8].mxu1  ;;  %4214 = vmatprep.subr.bf16.mxu1 %v4852_v28 }
 0x2ea   :  { %v4935_v0 = vadd.f32 %v3722_v58, %v962_v32  ;;  %v4939_v1 = vadd.f32 %v3894_v60, %v970_v33  ;;  %v3724_v36 = vpop.f32.mrb[9].mxu0  ;;  %v3896_v38 = vpop.f32.mrb[9].mxu1 }
 0x2eb   :  { %v4936_v2 = vadd.f32 %v3724_v36, %v966_v43  ;;  %v4940_v3 = vadd.f32 %v3896_v38, %v974_v44  ;;  %v3726_v4 = vpop.f32.mrb[10].mxu0  ;;  %v3898_v37 = vpop.f32.mrb[10].mxu1  ;;  %4043 = vmatpush1.bf16.msra.mxu0 %v4849_v51  ;;  %v903_v51 = vld [vmem:[#allocation8 + $0xe50] sm:$0xff]  ;;  %v4884_v36 = vcombine.high %v904_v41, %v908_v55 }
 0x2ec   :  { %v4247_v6 = vmax.f32 %v4935_v0, 0.0  ;;  %v4937_v7 = vadd.f32 %v3726_v4, %v962_v32  ;;  %v4941_v8 = vadd.f32 %v3898_v37, %v970_v33  ;;  %4215 = vmatpush1.bf16.msra.mxu1 %v4851_v53  ;;  %v3728_v9 = vpop.f32.mrb[11].mxu0  ;;  %v3900_v10 = vpop.f32.mrb[11].mxu1  ;;  %4044 = vmatprep.subr.bf16.mxu0 %v4858_v54  ;;  %v4249_v12 = vmax.f32 %v4939_v1, 0.0  ;;  %v907_v53 = vld [vmem:[#allocation8 + $0xe70] sm:$0xff] }
 0x2ed   :  { %v4248_v13 = vmax.f32 %v4936_v2, 0.0  ;;  %v4938_v14 = vadd.f32 %v3728_v9, %v966_v43  ;;  %v4942_v16 = vadd.f32 %v3900_v10, %v974_v44  ;;  %4216 = vmatprep.subr.bf16.mxu1 %v4860_v50  ;;  %v4250_v28 = vmax.f32 %v4940_v3, 0.0  ;;  %v911_v38 = vld [vmem:[#allocation8 + $0xe90] sm:$0xff]  ;;  %v912_v2 = vld [vmem:[#allocation8 + $0xe98] sm:$0xff] }
 0x2ee   :  { %v4340_v22 = vmul.f32 %v4311_v59, %v4247_v6  ;;  %v4255_v24 = vmax.f32 %v4937_v7, 0.0  ;;  %v4257_v23 = vmax.f32 %v4941_v8, 0.0  ;;  %v4874_v33 = vcombine.high %v895_v11, %v899_v17  ;;  %v916_v3 = vld [vmem:[#allocation8 + $0xeb8] sm:$0xff]  ;;  %v919_v6 = vld [vmem:[#allocation8 + $0xed0] sm:$0xff] }
 0x2ef   :  { %v4341_v27 = vmul.f32 %v4315_v61, %v4248_v13  ;;  %v4256_v30 = vmax.f32 %v4938_v14, 0.0  ;;  %4045 = vmatpush1.bf16.msra.mxu0 %v4857_v42  ;;  %v4342_v29 = vmul.f32 %v4319_v48, %v4249_v12  ;;  %v4258_v44 = vmax.f32 %v4942_v16, 0.0  ;;  %v915_v42 = vld [vmem:[#allocation8 + $0xeb0] sm:$0xff]  ;;  %v924_v8 = vld [vmem:[#allocation8 + $0xef8] sm:$0xff] }
 0x2f0   :  { %v4348_v32 = vmul.f32 %v4311_v59, %v4255_v24  ;;  %4217 = vmatpush1.bf16.msra.mxu1 %v4859_v21  ;;  %4046 = vmatprep.subr.bf16.mxu0 %v4866_v5  ;;  %v4873_v54 = vcombine.low %v895_v11, %v899_v17  ;;  %v4343_v58 = vmul.f32 %v4323_v40, %v4250_v28  ;;  %v923_v7 = vld [vmem:[#allocation8 + $0xef0] sm:$0xff]  ;;  %v928_v14 = vld [vmem:[#allocation8 + $0xf18] sm:$0xff] }
 0x2f1   :  { %v4356_v39 = vadd.f32 %v4341_v27, %v4340_v22  ;;  %v4349_v43 = vmul.f32 %v4315_v61, %v4256_v30  ;;  %4218 = vmatprep.subr.bf16.mxu1 %v4868_v35  ;;  %v4350_v50 = vmul.f32 %v4319_v48, %v4257_v23  ;;  %v4875_v59 = vcombine.low %v896_v18, %v900_v19  ;;  %v927_v12 = vld [vmem:[#allocation8 + $0xf10] sm:$0xff]  ;;  %v932_v16 = vld [vmem:[#allocation8 + $0xf38] sm:$0xff] }
 0x2f2   :  { %v4882_v63 = vcombine.high %v903_v51, %v907_v53  ;;  %v4351_v1 = vmul.f32 %v4323_v40, %v4258_v44  ;;  %v4881_v48 = vcombine.low %v903_v51, %v907_v53  ;;  %v4883_v37 = vcombine.low %v904_v41, %v908_v55  ;;  %v920_v40 = vld [vmem:[#allocation8 + $0xed8] sm:$0xff]  ;;  %v931_v13 = vld [vmem:[#allocation8 + $0xf30] sm:$0xff] }
 0x2f3   :  { %v4357_v60 = vadd.f32 %v4356_v39, %v4342_v29  ;;  %v4365_v62 = vadd.f32 %v4349_v43, %v4348_v32  ;;  %4047 = vmatpush1.bf16.msra.mxu0 %v4865_v25  ;;  %v4890_v21 = vcombine.high %v911_v38, %v915_v42  ;;  %v4892_v5 = vcombine.high %v912_v2, %v916_v3  ;;  %v935_v24 = vld [vmem:[#allocation8 + $0xf50] sm:$0xff]  ;;  %v940_v27 = vld [vmem:[#allocation8 + $0xf78] sm:$0xff] }
 0x2f4   :  { %4219 = vmatpush1.bf16.msra.mxu1 %v4867_v26  ;;  %4048 = vmatprep.subr.bf16.mxu0 %v4874_v33  ;;  %v4889_v9 = vcombine.low %v911_v38, %v915_v42  ;;  %v4891_v10 = vcombine.low %v912_v2, %v916_v3  ;;  %v4898_v35 = vcombine.high %v919_v6, %v923_v7  ;;  %v939_v25 = vld [vmem:[#allocation8 + $0xf70] sm:$0xff]  ;;  %v936_v26 = vld [vmem:[#allocation8 + $0xf58] sm:$0xff] }
 0x2f5   :  { %v5432_v0 = vadd.f32 %v4357_v60, %v4343_v58  ;;  %v4366_v61 = vadd.f32 %v4365_v62, %v4350_v50  ;;  %4220 = vmatprep.subr.bf16.mxu1 %v4876_v34  ;;  %v4900_v11 = vcombine.high %v920_v40, %v924_v8  ;;  %v4897_v17 = vcombine.low %v919_v6, %v923_v7  ;;  %v943_v33 = vld [vmem:[#allocation8 + $0xf90] sm:$0xff]  ;;  %v944_v29 = vld [vmem:[#allocation8 + $0xf98] sm:$0xff] }
 0x2f6   :  { %v4899_v18 = vcombine.low %v920_v40, %v924_v8  ;;  %v4906_v19 = vcombine.high %v927_v12, %v931_v13  ;;  %v4908_v22 = vcombine.high %v928_v14, %v932_v16  ;;  %v4905_v28 = vcombine.low %v927_v12, %v931_v13  ;;  %v947_v34 = vld [vmem:[#allocation8 + $0xfb0] sm:$0xff]  ;;  %v948_v39 = vld [vmem:[#allocation8 + $0xfb8] sm:$0xff] }
 0x2f7   :  { %v5434_v4 = vadd.f32 %v4366_v61, %v4351_v1  ;;  %4049 = vmatpush1.bf16.msra.mxu0 %v4873_v54  ;;  %v4907_v23 = vcombine.low %v928_v14, %v932_v16  ;;  %v4914_v30 = vcombine.high %v935_v24, %v939_v25  ;;  %v4916_v32 = vcombine.high %v936_v26, %v940_v27  ;;  %v951_v54 = vld [vmem:[#allocation8 + $0xfd0] sm:$0xff]  ;;  %v952_v55 = vld [vmem:[#allocation8 + $0xfd8] sm:$0xff] }
 0x2f8   :  { %4221 = vmatpush1.bf16.msra.mxu1 %v4875_v59  ;;  %4050 = vmatprep.subr.bf16.mxu0 %v4882_v63  ;;  %v4913_v43 = vcombine.low %v935_v24, %v939_v25  ;;  %v4915_v44 = vcombine.low %v936_v26, %v940_v27  ;;  %v4922_v51 = vcombine.high %v943_v33, %v947_v34  ;;  %v955_v41 = vld [vmem:[#allocation8 + $0xff0] sm:$0xff]  ;;  %v956_v58 = vld [vmem:[#allocation8 + $0xff8] sm:$0xff]  ;;  %v4265_v61 = vunpack.c.h.bf16 %v5393_v15 }
 0x2f9   :  { %4222 = vmatprep.subr.bf16.mxu1 %v4884_v36  ;;  %v4924_v53 = vcombine.high %v944_v29, %v948_v39  ;;  %v4921_v60 = vcombine.low %v943_v33, %v947_v34  ;;  %v4923_v50 = vcombine.low %v944_v29, %v948_v39  ;;  %v4930_v62 = vcombine.high %v951_v54, %v955_v41 }
 0x2fa   :  { %v4932_v59 = vcombine.high %v952_v55, %v956_v58  ;;  %v4929_v63 = vcombine.low %v951_v54, %v955_v41  ;;  %v4931_v1 = vcombine.low %v952_v55, %v956_v58  ;;  %v978_v36 = vrot.slane %v5396_v20, %v5324_v56 }
 0x2fb   :  { %4051 = vmatpush1.bf16.msra.mxu0 %v4881_v48  ;;  %v4287_v38 = vrot.slane %v4265_v61, %v5304_v46  ;;  %v986_v42 = vrot.slane %v5396_v20, %v5357_v31  ;;  %v982_v2 = vrot.slane %v5396_v20, %v147_v57  ;;  %v4291_v3 = vrot.slane %v4265_v61, %v5310_v49 }
 0x2fc   :  { %4223 = vmatpush1.bf16.msra.mxu1 %v4883_v37  ;;  %4052 = vmatprep.subr.bf16.mxu0 %v4890_v21  ;;  %v4295_v15 = vrot.slane %v4265_v61, %v5324_v56  ;;  %v4299_v49 = vrot.slane %v4265_v61, %v5357_v31 }
 0x2fd   :  { %4224 = vmatprep.subr.bf16.mxu1 %v4892_v5  ;;  %v4327_v21 = vrot.slane %v4287_v38, %v5304_v46  ;;  %v4331_v8 = vrot.slane %v4291_v3, %v5304_v46 }
 0x2fe   :  { %v4335_v56 = vrot.slane %v4295_v15, %v5304_v46  ;;  %v4339_v25 = vrot.slane %v4299_v49, %v5304_v46 }
 0x2ff   :  { %4053 = vmatpush1.bf16.msra.mxu0 %v4889_v9 }
 0x300   :  { %4225 = vmatpush1.bf16.msra.mxu1 %v4891_v10  ;;  %4054 = vmatprep.subr.bf16.mxu0 %v4898_v35 }
 0x301   :  { %4226 = vmatprep.subr.bf16.mxu1 %v4900_v11 }
 0x303   :  { %4055 = vmatpush1.bf16.msra.mxu0 %v4897_v17 }
 0x304   :  { %4227 = vmatpush1.bf16.msra.mxu1 %v4899_v18  ;;  %4056 = vmatprep.subr.bf16.mxu0 %v4906_v19 }
 0x305   :  { %4228 = vmatprep.subr.bf16.mxu1 %v4908_v22 }
 0x307   :  { %4057 = vmatpush1.bf16.msra.mxu0 %v4905_v28 }
 0x308   :  { %4229 = vmatpush1.bf16.msra.mxu1 %v4907_v23  ;;  %4058 = vmatprep.subr.bf16.mxu0 %v4914_v30 }
 0x309   :  { %4230 = vmatprep.subr.bf16.mxu1 %v4916_v32 }
 0x30b   :  { %4059 = vmatpush1.bf16.msra.mxu0 %v4913_v43 }
 0x30c   :  { %4231 = vmatpush1.bf16.msra.mxu1 %v4915_v44  ;;  %4060 = vmatprep.subr.bf16.mxu0 %v4922_v51 }
 0x30d   :  { %4232 = vmatprep.subr.bf16.mxu1 %v4924_v53 }
 0x30f   :  { %4061 = vmatpush1.bf16.msra.mxu0 %v4921_v60 }
 0x310   :  { %4233 = vmatpush1.bf16.msra.mxu1 %v4923_v50  ;;  %4062 = vmatprep.subr.bf16.mxu0 %v4930_v62 }
 0x311   :  { %4234 = vmatprep.subr.bf16.mxu1 %v4932_v59 }
 0x313   :  { %4063 = vmatpush1.bf16.msra.mxu0 %v4929_v63 }
 0x314   :  { %4235 = vmatpush1.bf16.msra.mxu1 %v4931_v1 }
 0x316   :  { %4065 = vmatmul.mubr.bf16.vlgmr.msra.gmra.mrb[12].mxu0 %v5365_v47 }
 0x317   :  { %4237 = vmatmul.mubr.bf16.vlgmr.msra.gmra.mrb[12].mxu1 %v5365_v47  ;;  %v990_v47 = vrot.slane %v5396_v20, %v155_v52 }
 0x3e9   :  { %v4066_v48 = vpop.f32.mrb[12].mxu0 }
 0x3ea   :  { %v4943_v37 = vadd.f32 %v4066_v48, %v978_v36  ;;  %v4238_v5 = vpop.f32.mrb[12].mxu1  ;;  %v4068_v6 = vpop.f32.mrb[13].mxu0 }
 0x3eb   :  { %v4947_v7 = vadd.f32 %v4238_v5, %v986_v42  ;;  %v4944_v40 = vadd.f32 %v4068_v6, %v982_v2  ;;  %v4240_v9 = vpop.f32.mrb[13].mxu1  ;;  %v4070_v57 = vpop.f32.mrb[14].mxu0 }
 0x3ec   :  { %v4251_v10 = vmax.f32 %v4943_v37, 0.0  ;;  %v4948_v45 = vadd.f32 %v4240_v9, %v990_v47  ;;  %v4945_v35 = vadd.f32 %v4070_v57, %v978_v36  ;;  %v4242_v52 = vpop.f32.mrb[14].mxu1  ;;  %v4072_v20 = vpop.f32.mrb[15].mxu0 }
 0x3ed   :  { %v4252_v11 = vmax.f32 %v4944_v40, 0.0  ;;  %v4949_v12 = vadd.f32 %v4242_v52, %v986_v42  ;;  %v4946_v13 = vadd.f32 %v4072_v20, %v982_v2  ;;  %v4244_v14 = vpop.f32.mrb[15].mxu1  ;;  %v4253_v17 = vmax.f32 %v4947_v7, 0.0 }
 0x3ee   :  { %v4344_v16 = vmul.f32 %v4327_v21, %v4251_v10  ;;  %v4259_v18 = vmax.f32 %v4945_v35, 0.0  ;;  %v4950_v19 = vadd.f32 %v4244_v14, %v990_v47  ;;  %v4254_v26 = vmax.f32 %v4948_v45, 0.0 }
 0x3ef   :  { %v4345_v22 = vmul.f32 %v4331_v8, %v4252_v11  ;;  %v4260_v24 = vmax.f32 %v4946_v13, 0.0  ;;  %v4261_v28 = vmax.f32 %v4949_v12, 0.0  ;;  %v4346_v30 = vmul.f32 %v4335_v56, %v4253_v17 }
 0x3f0   :  { %v4359_v31 = vadd.f32 %v5432_v0, %v4344_v16  ;;  %v4352_v27 = vmul.f32 %v4327_v21, %v4259_v18  ;;  %v4262_v33 = vmax.f32 %v4950_v19, 0.0  ;;  %v4347_v43 = vmul.f32 %v4339_v25, %v4254_v26 }
 0x3f1   :  { %v4353_v23 = vmul.f32 %v4331_v8, %v4260_v24  ;;  %v4354_v29 = vmul.f32 %v4335_v56, %v4261_v28  ;;  %v4375_v0 = vstv %s5474_s6 }
 0x3f2   :  { %v4368_v32 = vadd.f32 %v5434_v4, %v4352_v27  ;;  %v4360_v34 = vadd.f32 %v4359_v31, %v4345_v22  ;;  %v4355_v51 = vmul.f32 %v4339_v25, %v4262_v33 }
 0x3f4   :  { %v4369_v39 = vadd.f32 %v4368_v32, %v4353_v23  ;;  %v4361_v44 = vadd.f32 %v4360_v34, %v4346_v30 }
 0x3f6   :  { %v4362_v53 = vadd.f32 %v4361_v44, %v4347_v43  ;;  %v4370_v54 = vadd.f32 %v4369_v39, %v4354_v29 }
 0x3f8   :  { %4363 = vadd.xlane.f32.xlu0 %v4362_v53  ;;  %v4371_v46 = vadd.f32 %v4370_v54, %v4355_v51 }
 0x3fc   :  { %4372 = vadd.xlane.f32.xlu0 %v4371_v46 }
 0x485   :  { %v4364_v41 = vpop.xlane.xlu0 %4363 }
 0x486   :  { %v4376_v55 = vadd.f32 %v4375_v0, %v4364_v41 }
 0x488   :  { %v4933_v58 = vmul.f32 -1.442695, %v4376_v55 }
 0x489   :  { %v4373_v4 = vpop.xlane.xlu0 %4372 }
 0x48a   :  { %5010 = vpow2.f32 %v4933_v58  ;;  %v4377_v60 = vadd.f32 %v4375_v0, %v4373_v4 }
 0x48c   :  { %v4934_v50 = vmul.f32 -1.442695, %v4377_v60 }
 0x48e   :  { %5012 = vpow2.f32 %v4934_v50 }
 0x494   :  { %v5011_v62 = vpop.eup %5010 }
 0x495   :  { %v4384_v59 = vadd.f32 1.0, %v5011_v62 }
 0x497   :  { %5014 = vrcp.f32 %v4384_v59 }
 0x498   :  { %v5013_v63 = vpop.eup %5012 }
 0x499   :  { %v4385_v1 = vadd.f32 1.0, %v5013_v63 }
 0x49b   :  { %5016 = vrcp.f32 %v4385_v1 }
 0x4a1   :  { %v5015_v61 = vpop.eup %5014 }
 0x4a2   :  { %4391 = vst.msk [vmem:[%s5475_s7] sm:$0xff] %vm4390_vm1, %v5015_v61 }
 0x4a5   :  { %v5017_v36 = vpop.eup %5016 }
 0x4a6   :  { %4392 = vst.msk [vmem:[%s5475_s7 + $0x8] sm:$0xff] %vm4390_vm1, %v5017_v36 }
 0x4a7   :  { %4397 = vsyncpa [#allocation4], 1 }
 0x4a8   :  { %4398 = vsyncpa [#allocation6], 1 }
 0x4a9   :  { %4399 = vsyncpa [#allocation9], 1 }
 0x4aa   :  { %4400 = vsyncpa [#allocation12], 1 }

</bundles_post_ra>
